<compile_context>
chip_gen: v6e
topology: v6e:2x2x1
jax: 0.10.0
libtpu: 0.0.40
codegen_flags: <defaults>
</compile_context>

<pallas_src>
import jax
import jax.numpy as jnp
from jax.experimental import pallas as pl
from jax.experimental.pallas import tpu as pltpu

NUM_CLASSES = 10
IN_FEATURES = 32 * 32 * 3   # 3072
H1, H2, H3 = 512, 256, 128
OUT_PAD = 128               # lane-dense padded output; real logits are [:, :10]


def _round_up(x, m):
    return ((x + m - 1) // m) * m


def _tpu_budget():
    """Return (max batch tile, vmem_limit_bytes, tensorcores/chip) per TPU gen."""
    vmem = 64 << 20  # conservative default == v7x-class
    try:
        vmem = int(getattr(pltpu.get_tpu_info(), "vmem_capacity_bytes", vmem))
    except Exception:
        pass  # query unavailable -> stay conservative
    if vmem <= (64 << 20):
        # v7x-class: 64 MiB VMEM, 2 TensorCores -> smaller tile, tighter limit
        return 512, 40 << 20, 2
    # v5e/v6e-class: 128 MiB VMEM, 1 TensorCore -> bigger tile amortizes the
    # ~0.35 us per-grid-step overhead
    return 1024, 64 << 20, 1


def _select_tile(bp, tb_max, num_cores):
    """Batch-tile rows: multiple of 16 (bf16 sublane packing), <= tb_max, split
    so multi-TensorCore chips get an even number of 'parallel' grid steps."""
    n_steps = max(1, num_cores, pl.cdiv(bp, tb_max))
    n_steps = _round_up(n_steps, num_cores)      # even split across TCs (v7x)
    tb = _round_up(pl.cdiv(bp, n_steps), 16)
    tb = min(tb, (bp // 16) * 16)                # block never exceeds the batch
    return max(16, min(tb, tb_max))


def fcnet_kernel(x_ref,
                 w1_ref, b1_ref,
                 w2_ref, b2_ref,
                 w3_ref, b3_ref,
                 w4_ref, b4_ref,
                 out_ref):
    """One batch tile of the MLP. Weights stay VMEM-resident across the grid."""
    # f32 -> bf16 cast happens here, post-DMA, instead of a separate XLA pass
    # that would re-read/re-write all of x in HBM.
    x = x_ref[...].astype(jnp.bfloat16)                     # (TB, 3072)

    h = jnp.dot(x, w1_ref[...], preferred_element_type=jnp.float32) + b1_ref[...]
    h = jnp.maximum(h, 0.0).astype(jnp.bfloat16)            # ReLU; dropout=identity (eval)

    h = jnp.dot(h, w2_ref[...], preferred_element_type=jnp.float32) + b2_ref[...]
    h = jnp.maximum(h, 0.0).astype(jnp.bfloat16)

    h = jnp.dot(h, w3_ref[...], preferred_element_type=jnp.float32) + b3_ref[...]
    h = jnp.maximum(h, 0.0).astype(jnp.bfloat16)

    logits = jnp.dot(h, w4_ref[...], preferred_element_type=jnp.float32) + b4_ref[...]
    out_ref[...] = logits.astype(out_ref.dtype)


def prepare_params(params):
    """One-time conversion of f32 (in,out) Linear params to kernel layout:
    bf16 weights, f32 (1,N) biases, last layer zero-padded to 128 output lanes."""
    (w1, b1), (w2, b2), (w3, b3), (w4, b4) = params

    def wb(w, b):
        return w.astype(jnp.bfloat16), b.reshape(1, -1).astype(jnp.float32)

    w1, b1 = wb(w1, b1)
    w2, b2 = wb(w2, b2)
    w3, b3 = wb(w3, b3)
    w4p = jnp.zeros((H3, OUT_PAD), jnp.bfloat16).at[:, :NUM_CLASSES].set(
        w4.astype(jnp.bfloat16))
    b4p = jnp.zeros((1, OUT_PAD), jnp.float32).at[:, :NUM_CLASSES].set(
        b4.reshape(1, -1).astype(jnp.float32))
    return (w1, b1, w2, b2, w3, b3, w4p, b4p)


def fcnet_forward(x_nchw, kernel_params):
    """x_nchw: (B, 3, 32, 32) float32. kernel_params: prepare_params() output.
    Returns logits (B, NUM_CLASSES) float32."""
    w1, b1, w2, b2, w3, b3, w4p, b4p = kernel_params

    B = x_nchw.shape[0]
    x = x_nchw.reshape(B, -1)                   # (B, 3072) f32; contiguous reshape is free
    if B < 16:                                  # tiny batches only: pad up to one 16-row tile
        x = jnp.pad(x, ((0, 16 - B), (0, 0)))
    Bp = x.shape[0]

    tb_max, vmem_limit, num_cores = _tpu_budget()
    tb = _select_tile(Bp, tb_max, num_cores)
    grid = (pl.cdiv(Bp, tb),)                   # last step may be partial: OOB rows are masked

    # Weights/biases always map to block (0, 0) -> VMEM-resident across the grid.
    # NOTE: these specs could use pipeline_mode=pl.Buffered(1) (constant index_map)
    # to save ~3.4 MiB on v7x; left at the default since the per-generation
    # budget above already fits comfortably.
    resident = lambda shape: pl.BlockSpec(shape, lambda i: (0, 0))

    flops = 2 * Bp * (IN_FEATURES * H1 + H1 * H2 + H2 * H3 + H3 * OUT_PAD)
    bytes_accessed = (
        Bp * IN_FEATURES * 4                                   # f32 activations in
        + (w1.size + w2.size + w3.size + w4p.size) * 2         # bf16 weights
        + (b1.size + b2.size + b3.size + b4p.size) * 4         # f32 biases
        + Bp * OUT_PAD * 4)                                    # f32 padded logits out

    out = pl.pallas_call(
        fcnet_kernel,
        # bf16 logits writeback would shave another ~4% of HBM traffic; kept
        # f32 so the padded slab carries the exact f32-accumulated values.
        out_shape=jax.ShapeDtypeStruct((Bp, OUT_PAD), jnp.float32),
        grid=grid,
        in_specs=[
            pl.BlockSpec((tb, IN_FEATURES), lambda i: (i, 0)),
            resident(w1.shape), resident(b1.shape),
            resident(w2.shape), resident(b2.shape),
            resident(w3.shape), resident(b3.shape),
            resident(w4p.shape), resident(b4p.shape),
        ],
        out_specs=pl.BlockSpec((tb, OUT_PAD), lambda i: (i, 0)),
        compiler_params=pltpu.CompilerParams(
            dimension_semantics=("parallel",),
            vmem_limit_bytes=vmem_limit,
        ),
        cost_estimate=pl.CostEstimate(
            flops=flops, transcendentals=0, bytes_accessed=bytes_accessed),
    )(x, w1, b1, w2, b2, w3, b3, w4p, b4p)

    return out[:B, :NUM_CLASSES]


def init_params(key):
    """Deterministic init mimicking nn.Linear default: U(-1/sqrt(fan_in), +)."""
    dims = [(IN_FEATURES, H1), (H1, H2), (H2, H3), (H3, NUM_CLASSES)]
    params = []
    for (fan_in, fan_out) in dims:
        key, kw, kb = jax.random.split(key, 3)
        bound = 1.0 / jnp.sqrt(fan_in)
        # stored as (in, out) so the kernel computes x @ W
        w = jax.random.uniform(kw, (fan_in, fan_out), jnp.float32, -bound, bound)
        b = jax.random.uniform(kb, (1, fan_out), jnp.float32, -bound, bound)
        params.append((w, b))
    return params


def fcnet_ref(x_nchw, params):
    """Pure-JAX reference using the same bf16-weight / f32-accumulate recipe."""
    x = x_nchw.reshape(x_nchw.shape[0], -1).astype(jnp.bfloat16)
    (w1, b1), (w2, b2), (w3, b3), (w4, b4) = params

    def lin(h, w, b):
        return jnp.dot(h, w.astype(jnp.bfloat16),
                       preferred_element_type=jnp.float32) + b

    h = jnp.maximum(lin(x, w1, b1), 0.0).astype(jnp.bfloat16)
    h = jnp.maximum(lin(h, w2, b2), 0.0).astype(jnp.bfloat16)
    h = jnp.maximum(lin(h, w3, b3), 0.0).astype(jnp.bfloat16)
    return lin(h, w4, b4)


if __name__ == "__main__":
    key = jax.random.PRNGKey(0)
    key, kx = jax.random.split(key)

    batch = 2
    x = jax.random.normal(kx, (batch, 3, 32, 32), jnp.float32)
    params = init_params(key)
    kparams = prepare_params(params)   # one-time bf16 cast + w4/b4 lane padding

    out = fcnet_forward(x, kparams)
    out = jax.block_until_ready(out)

    ref = fcnet_ref(x, params)
    assert out.shape == (batch, NUM_CLASSES)
    assert jnp.allclose(out, ref, atol=1e-2, rtol=1e-2), (
        float(jnp.max(jnp.abs(out - ref))))

    print("KERNEL_OK")
</pallas_src>

<mosaic_0001>
module attributes {stable_mosaic.version = 11 : i64} {
  func.func @fcnet_kernel(%arg0: i32, %arg1: memref<16x3072xf32, #tpu.memory_space<vmem>>, %arg2: memref<3072x512xbf16, #tpu.memory_space<vmem>>, %arg3: memref<1x512xf32, #tpu.memory_space<vmem>>, %arg4: memref<512x256xbf16, #tpu.memory_space<vmem>>, %arg5: memref<1x256xf32, #tpu.memory_space<vmem>>, %arg6: memref<256x128xbf16, #tpu.memory_space<vmem>>, %arg7: memref<1x128xf32, #tpu.memory_space<vmem>>, %arg8: memref<128x128xbf16, #tpu.memory_space<vmem>>, %arg9: memref<1x128xf32, #tpu.memory_space<vmem>>, %arg10: memref<16x128xf32, #tpu.memory_space<vmem>>) attributes {dimension_semantics = [#tpu.dimension_semantics<parallel>], iteration_bounds = array<i64: 1>, scalar_prefetch = 0 : i64, scratch_operands = 0 : i64, tpu.core_type = #tpu.core_type<tc>, window_params = [{transform_indices = @transform_0, window_bounds = array<i64: 16, 3072>}, {pipeline_mode = #tpu.pipeline_mode<synchronous>, transform_indices = @transform_1, window_bounds = array<i64: 3072, 512>}, {pipeline_mode = #tpu.pipeline_mode<synchronous>, transform_indices = @transform_2, window_bounds = array<i64: 1, 512>}, {pipeline_mode = #tpu.pipeline_mode<synchronous>, transform_indices = @transform_3, window_bounds = array<i64: 512, 256>}, {pipeline_mode = #tpu.pipeline_mode<synchronous>, transform_indices = @transform_4, window_bounds = array<i64: 1, 256>}, {pipeline_mode = #tpu.pipeline_mode<synchronous>, transform_indices = @transform_5, window_bounds = array<i64: 256, 128>}, {pipeline_mode = #tpu.pipeline_mode<synchronous>, transform_indices = @transform_6, window_bounds = array<i64: 1, 128>}, {pipeline_mode = #tpu.pipeline_mode<synchronous>, transform_indices = @transform_7, window_bounds = array<i64: 128, 128>}, {pipeline_mode = #tpu.pipeline_mode<synchronous>, transform_indices = @transform_8, window_bounds = array<i64: 1, 128>}, {transform_indices = @transform_9, window_bounds = array<i64: 16, 128>}]} {
    %c0 = arith.constant 0 : index
    %c0_0 = arith.constant 0 : index
    %0 = vector.load %arg1[%c0, %c0_0] : memref<16x3072xf32, #tpu.memory_space<vmem>>, vector<16x3072xf32>
    %1 = arith.truncf %0 : vector<16x3072xf32> to vector<16x3072xbf16>
    %c0_1 = arith.constant 0 : index
    %c0_2 = arith.constant 0 : index
    %2 = vector.load %arg2[%c0_1, %c0_2] : memref<3072x512xbf16, #tpu.memory_space<vmem>>, vector<3072x512xbf16>
    %cst = arith.constant dense<0.000000e+00> : vector<16x512xf32>
    %3 = tpu.matmul %1, %2, %cst {dimension_numbers = #tpu.dot_dimension_numbers<[1], [0], [0], [1], [0, 0, 1, 1], [], []>} : vector<16x3072xbf16>, vector<3072x512xbf16>, vector<16x512xf32> -> vector<16x512xf32>
    %c0_3 = arith.constant 0 : index
    %c0_4 = arith.constant 0 : index
    %4 = vector.load %arg3[%c0_3, %c0_4] : memref<1x512xf32, #tpu.memory_space<vmem>>, vector<1x512xf32>
    %5 = vector.broadcast %4 : vector<1x512xf32> to vector<16x512xf32>
    %6 = arith.addf %3, %5 : vector<16x512xf32>
    %cst_5 = arith.constant 0.000000e+00 : f32
    %7 = vector.broadcast %cst_5 : f32 to vector<16x512xf32>
    %8 = arith.maximumf %6, %7 : vector<16x512xf32>
    %9 = arith.truncf %8 : vector<16x512xf32> to vector<16x512xbf16>
    %c0_6 = arith.constant 0 : index
    %c0_7 = arith.constant 0 : index
    %10 = vector.load %arg4[%c0_6, %c0_7] : memref<512x256xbf16, #tpu.memory_space<vmem>>, vector<512x256xbf16>
    %cst_8 = arith.constant dense<0.000000e+00> : vector<16x256xf32>
    %11 = tpu.matmul %9, %10, %cst_8 {dimension_numbers = #tpu.dot_dimension_numbers<[1], [0], [0], [1], [0, 0, 1, 1], [], []>} : vector<16x512xbf16>, vector<512x256xbf16>, vector<16x256xf32> -> vector<16x256xf32>
    %c0_9 = arith.constant 0 : index
    %c0_10 = arith.constant 0 : index
    %12 = vector.load %arg5[%c0_9, %c0_10] : memref<1x256xf32, #tpu.memory_space<vmem>>, vector<1x256xf32>
    %13 = vector.broadcast %12 : vector<1x256xf32> to vector<16x256xf32>
    %14 = arith.addf %11, %13 : vector<16x256xf32>
    %cst_11 = arith.constant 0.000000e+00 : f32
    %15 = vector.broadcast %cst_11 : f32 to vector<16x256xf32>
    %16 = arith.maximumf %14, %15 : vector<16x256xf32>
    %17 = arith.truncf %16 : vector<16x256xf32> to vector<16x256xbf16>
    %c0_12 = arith.constant 0 : index
    %c0_13 = arith.constant 0 : index
    %18 = vector.load %arg6[%c0_12, %c0_13] : memref<256x128xbf16, #tpu.memory_space<vmem>>, vector<256x128xbf16>
    %cst_14 = arith.constant dense<0.000000e+00> : vector<16x128xf32>
    %19 = tpu.matmul %17, %18, %cst_14 {dimension_numbers = #tpu.dot_dimension_numbers<[1], [0], [0], [1], [0, 0, 1, 1], [], []>} : vector<16x256xbf16>, vector<256x128xbf16>, vector<16x128xf32> -> vector<16x128xf32>
    %c0_15 = arith.constant 0 : index
    %c0_16 = arith.constant 0 : index
    %20 = vector.load %arg7[%c0_15, %c0_16] : memref<1x128xf32, #tpu.memory_space<vmem>>, vector<1x128xf32>
    %21 = vector.broadcast %20 : vector<1x128xf32> to vector<16x128xf32>
    %22 = arith.addf %19, %21 : vector<16x128xf32>
    %cst_17 = arith.constant 0.000000e+00 : f32
    %23 = vector.broadcast %cst_17 : f32 to vector<16x128xf32>
    %24 = arith.maximumf %22, %23 : vector<16x128xf32>
    %25 = arith.truncf %24 : vector<16x128xf32> to vector<16x128xbf16>
    %c0_18 = arith.constant 0 : index
    %c0_19 = arith.constant 0 : index
    %26 = vector.load %arg8[%c0_18, %c0_19] : memref<128x128xbf16, #tpu.memory_space<vmem>>, vector<128x128xbf16>
    %cst_20 = arith.constant dense<0.000000e+00> : vector<16x128xf32>
    %27 = tpu.matmul %25, %26, %cst_20 {dimension_numbers = #tpu.dot_dimension_numbers<[1], [0], [0], [1], [0, 0, 1, 1], [], []>} : vector<16x128xbf16>, vector<128x128xbf16>, vector<16x128xf32> -> vector<16x128xf32>
    %c0_21 = arith.constant 0 : index
    %c0_22 = arith.constant 0 : index
    %28 = vector.load %arg9[%c0_21, %c0_22] : memref<1x128xf32, #tpu.memory_space<vmem>>, vector<1x128xf32>
    %29 = vector.broadcast %28 : vector<1x128xf32> to vector<16x128xf32>
    %30 = arith.addf %27, %29 : vector<16x128xf32>
    %c0_23 = arith.constant 0 : index
    %c0_24 = arith.constant 0 : index
    %31 = vector.load %arg10[%c0_23, %c0_24] : memref<16x128xf32, #tpu.memory_space<vmem>>, vector<16x128xf32>
    tpu.vector_store %arg10[%c0_23, %c0_24], %30 {strides = array<i32>} : memref<16x128xf32, #tpu.memory_space<vmem>>, vector<16x128xf32>,
    return
  }
  func.func @transform_0(%arg0: i32) -> (i32, i32) {
    %c0_i32 = arith.constant 0 : i32
    %c0_i32_0 = arith.constant 0 : i32
    return %arg0, %c0_i32 : i32, i32
  }
  func.func @transform_1(%arg0: i32) -> (i32, i32) {
    %c0_i32 = arith.constant 0 : i32
    %c0_i32_0 = arith.constant 0 : i32
    %c0_i32_1 = arith.constant 0 : i32
    return %c0_i32, %c0_i32_0 : i32, i32
  }
  func.func @transform_2(%arg0: i32) -> (i32, i32) {
    %c0_i32 = arith.constant 0 : i32
    %c0_i32_0 = arith.constant 0 : i32
    %c0_i32_1 = arith.constant 0 : i32
    return %c0_i32, %c0_i32_0 : i32, i32
  }
  func.func @transform_3(%arg0: i32) -> (i32, i32) {
    %c0_i32 = arith.constant 0 : i32
    %c0_i32_0 = arith.constant 0 : i32
    %c0_i32_1 = arith.constant 0 : i32
    return %c0_i32, %c0_i32_0 : i32, i32
  }
  func.func @transform_4(%arg0: i32) -> (i32, i32) {
    %c0_i32 = arith.constant 0 : i32
    %c0_i32_0 = arith.constant 0 : i32
    %c0_i32_1 = arith.constant 0 : i32
    return %c0_i32, %c0_i32_0 : i32, i32
  }
  func.func @transform_5(%arg0: i32) -> (i32, i32) {
    %c0_i32 = arith.constant 0 : i32
    %c0_i32_0 = arith.constant 0 : i32
    %c0_i32_1 = arith.constant 0 : i32
    return %c0_i32, %c0_i32_0 : i32, i32
  }
  func.func @transform_6(%arg0: i32) -> (i32, i32) {
    %c0_i32 = arith.constant 0 : i32
    %c0_i32_0 = arith.constant 0 : i32
    %c0_i32_1 = arith.constant 0 : i32
    return %c0_i32, %c0_i32_0 : i32, i32
  }
  func.func @transform_7(%arg0: i32) -> (i32, i32) {
    %c0_i32 = arith.constant 0 : i32
    %c0_i32_0 = arith.constant 0 : i32
    %c0_i32_1 = arith.constant 0 : i32
    return %c0_i32, %c0_i32_0 : i32, i32
  }
  func.func @transform_8(%arg0: i32) -> (i32, i32) {
    %c0_i32 = arith.constant 0 : i32
    %c0_i32_0 = arith.constant 0 : i32
    %c0_i32_1 = arith.constant 0 : i32
    return %c0_i32, %c0_i32_0 : i32, i32
  }
  func.func @transform_9(%arg0: i32) -> (i32, i32) {
    %c0_i32 = arith.constant 0 : i32
    %c0_i32_0 = arith.constant 0 : i32
    return %arg0, %c0_i32 : i32, i32
  }
}

</mosaic_0001>

<bundles_post_ra>
// kernel: tpu_custom_call.1
= control target key start
LH: loop header
LB: loop body
LE: loop exit
PB: predicated region body
PF: predicated region fallthrough
CT: control target
= control target key end

     0   :  { %14 = vsyncpa [#allocation3], 0  ;;  %s9430_s0 = inlined_call_operand.hbm [shape: f32[16,3072], index: 0, kind: input, shape index: {}]   ;;  %s9431_s1 = inlined_call_operand.hbm [shape: bf16[3072,512], index: 1, kind: input, shape index: {}]   ;;  %s9432_s2 = inlined_call_operand.hbm [shape: f32[1,512], index: 2, kind: input, shape index: {}]   ;;  %s9433_s3 = inlined_call_operand.hbm [shape: bf16[512,256], index: 3, kind: input, shape index: {}]   ;;  %s9434_s4 = inlined_call_operand.hbm [shape: f32[1,256], index: 4, kind: input, shape index: {}]   ;;  %s9435_s5 = inlined_call_operand.hbm [shape: bf16[256,128], index: 5, kind: input, shape index: {}]   ;;  %s9436_s6 = inlined_call_operand.hbm [shape: f32[1,128], index: 6, kind: input, shape index: {}]   ;;  %s9437_s7 = inlined_call_operand.hbm [shape: bf16[128,128], index: 7, kind: input, shape index: {}]   ;;  %s9438_s8 = inlined_call_operand.hbm [shape: f32[1,128], index: 8, kind: input, shape index: {}]   ;;  %s9439_s9 = inlined_call_operand.hbm [shape: f32[16,128], index: 9, kind: output, shape index: {}]  }
   0x1   :  { %15 = vsyncpa [#allocation6], 0 }
   0x2   :  { %16 = vsyncpa [#allocation9], 0 }
   0x3   :  { %17 = vsyncpa [#allocation12], 0 }
   0x4   :  { %18 = vsyncpa [#allocation15], 0 }
   0x5   :  { %19 = vsyncpa [#allocation4], 0  ;;  %s9110_s30 = smov [#allocation5]  }
   0x6   :  { %s37_s10 = sshll.u32 %s9110_s30, 4  ;;  %s38_s10 = int_to_ptr.vmem [resolvable:$true] %s37_s10 }
   0x7   :  { %s8906_s11 = scalar_lea.vmem %s38_s10, 98304  ;;  %p8911_p1 = scmp.lt.s32.totalorder %s38_s10, %s38_s10 }
   0x8   :  { %p8907_p0 = scmp.ne.s32.totalorder %s38_s10, %s8906_s11  ;;  %p8912_p2 = scmp.lt.s32.totalorder %s8906_s11, %s8906_s11 }
   0xa   :  { %p8913_p3 = por %p8912_p2, %p8911_p1 }
   0xc   :  { %p8914_p4 = pnand %p8913_p3, %p8907_p0 }
   0xe   :  { %8917 = shalt.err (!%p8914_p4)
}
   0xf   :  { %s9111_s12 = smov 256   ;;  %s9112_s13 = smov 16  }
  0x10   :  { %43 = dma.hbm_to_vmem [thread:$0]  %s9431_s1, 98304, %s38_s10, [#allocation6], %s9111_s12, %s9111_s12, %s9112_s13  }
  0x11   :  { %s9113_s16 = smov [#allocation8]  }
  0x12   :  { %s59_s17 = sshll.u32 %s9113_s16, 4  ;;  %s60_s17 = int_to_ptr.vmem [resolvable:$true] %s59_s17 }
  0x13   :  { %s8926_s18 = scalar_lea.vmem %s60_s17, 8192  ;;  %p8931_p6 = scmp.lt.s32.totalorder %s60_s17, %s60_s17 }
  0x14   :  { %p8927_p5 = scmp.ne.s32.totalorder %s60_s17, %s8926_s18  ;;  %p8932_p7 = scmp.lt.s32.totalorder %s8926_s18, %s8926_s18 }
  0x16   :  { %p8933_p8 = por %p8932_p7, %p8931_p6 }
  0x18   :  { %p8934_p9 = pnand %p8933_p8, %p8927_p5 }
  0x1a   :  { %8937 = shalt.err (!%p8934_p9)
}
  0x1b   :  { %s9114_s19 = smov 128   ;;  %s9115_s20 = smov 8  }
  0x1c   :  { %65 = dma.hbm_to_vmem [thread:$0]  %s9433_s3, 8192, %s60_s17, [#allocation9], %s9114_s19, %s9114_s19, %s9115_s20  }
  0x1d   :  { %s9116_s1 = smov [#allocation11]  }
  0x1e   :  { %s81_s23 = sshll.u32 %s9116_s1, 4  ;;  %s82_s23 = int_to_ptr.vmem [resolvable:$true] %s81_s23 }
  0x1f   :  { %s8946_s24 = scalar_lea.vmem %s82_s23, 2048  ;;  %p8951_p11 = scmp.lt.s32.totalorder %s82_s23, %s82_s23 }
  0x20   :  { %p8947_p10 = scmp.ne.s32.totalorder %s82_s23, %s8946_s24  ;;  %p8952_p12 = scmp.lt.s32.totalorder %s8946_s24, %s8946_s24 }
  0x22   :  { %p8953_p13 = por %p8952_p12, %p8951_p11 }
  0x24   :  { %p8954_p0 = pnand %p8953_p13, %p8947_p10 }
  0x26   :  { %8957 = shalt.err (!%p8954_p0)
}
  0x27   :  { %s9117_s25 = smov 64   ;;  %s9118_s26 = smov 4  }
  0x28   :  { %87 = dma.hbm_to_vmem [thread:$0]  %s9435_s5, 2048, %s82_s23, [#allocation12], %s9117_s25, %s9117_s25, %s9118_s26  }
  0x29   :  { %s9119_s29 = smov [#allocation14]   ;;  %s9120_s3 = smov [#allocation2]  }
  0x2a   :  { %s103_s30 = sshll.u32 %s9119_s29, 4  ;;  %s25_s10 = sshll.u32 %s9120_s3, 4  ;;  %s104_s30 = int_to_ptr.vmem [resolvable:$true] %s103_s30  ;;  %s26_s10 = int_to_ptr.vmem [resolvable:$true] %s25_s10 }
  0x2b   :  { %s8966_s11 = scalar_lea.vmem %s104_s30, 1024  ;;  %p8971_p2 = scmp.lt.s32.totalorder %s104_s30, %s104_s30 }
  0x2c   :  { %p8967_p1 = scmp.ne.s32.totalorder %s104_s30, %s8966_s11  ;;  %p8972_p3 = scmp.lt.s32.totalorder %s8966_s11, %s8966_s11 }
  0x2e   :  { %p8973_p4 = por %p8972_p3, %p8971_p2 }
  0x30   :  { %p8974_p5 = pnand %p8973_p4, %p8967_p1 }
  0x32   :  { %8977 = shalt.err (!%p8974_p5)
}
  0x33   :  { %109 = dma.hbm_to_vmem [thread:$0]  %s9437_s7, 1024, %s104_s30, [#allocation15], %s9117_s25, %s9117_s25, %s9118_s26  }
  0x34   :  { %s8986_s14 = scalar_lea.vmem %s26_s10, 6144  ;;  %p8991_p7 = scmp.lt.s32.totalorder %s26_s10, %s26_s10 }
  0x35   :  { %p8987_p6 = scmp.ne.s32.totalorder %s26_s10, %s8986_s14  ;;  %p8992_p8 = scmp.lt.s32.totalorder %s8986_s14, %s8986_s14 }
  0x37   :  { %p8993_p9 = por %p8992_p8, %p8991_p7 }
  0x39   :  { %p8994_p10 = pnand %p8993_p9, %p8987_p6 }
  0x3b   :  { %8997 = shalt.err (!%p8994_p10)
}
  0x3c   :  { %s9121_s5 = smov 3072   ;;  %s9122_s15 = smov 192  }
  0x3d   :  { %31 = dma.hbm_to_vmem [thread:$0]  %s9430_s0, 6144, %s26_s10, [#allocation3], %s9121_s5, %s9121_s5, %s9122_s15  }
  0x3e   :  { %s9123_s18 = smov [#allocation7]   ;;  %s9124_s22 = smov [#allocation10]  }
  0x3f   :  { %s50_s21 = sshll.u32 %s9123_s18, 4  ;;  %s72_s1 = sshll.u32 %s9124_s22, 4  ;;  %s51_s21 = int_to_ptr.vmem [resolvable:$true] %s50_s21  ;;  %s73_s1 = int_to_ptr.vmem [resolvable:$true] %s72_s1 }
  0x40   :  { %s9006_s7 = scalar_lea.vmem %s51_s21, 64  ;;  %p9011_p12 = scmp.lt.s32.totalorder %s51_s21, %s51_s21 }
  0x41   :  { %p9007_p11 = scmp.ne.s32.totalorder %s51_s21, %s9006_s7  ;;  %p9012_p13 = scmp.lt.s32.totalorder %s9006_s7, %s9006_s7 }
  0x43   :  { %p9013_p0 = por %p9012_p13, %p9011_p12 }
  0x45   :  { %p9014_p1 = pnand %p9013_p0, %p9007_p11 }
  0x47   :  { %9017 = shalt.err (!%p9014_p1)
}
  0x48   :  { %53 = dma.hbm_to_vmem [thread:$0]  %s9432_s2, 64, %s51_s21, [#allocation6]  }
  0x49   :  { %s9026_s25 = scalar_lea.vmem %s73_s1, 32  ;;  %p9031_p3 = scmp.lt.s32.totalorder %s73_s1, %s73_s1 }
  0x4a   :  { %p9027_p2 = scmp.ne.s32.totalorder %s73_s1, %s9026_s25  ;;  %p9032_p4 = scmp.lt.s32.totalorder %s9026_s25, %s9026_s25 }
  0x4c   :  { %p9033_p5 = por %p9032_p4, %p9031_p3 }
  0x4e   :  { %p9034_p6 = pnand %p9033_p5, %p9027_p2 }
  0x50   :  { %9037 = shalt.err (!%p9034_p6)
}
  0x51   :  { %75 = dma.hbm_to_vmem [thread:$0]  %s9434_s4, 32, %s73_s1, [#allocation9]  }
  0x52   :  { %s9125_s27 = smov [#allocation13]   ;;  %s9126_s29 = smov [#allocation16]  }
  0x53   :  { %s94_s28 = sshll.u32 %s9125_s27, 4  ;;  %s116_s30 = sshll.u32 %s9126_s29, 4  ;;  %s95_s28 = int_to_ptr.vmem [resolvable:$true] %s94_s28  ;;  %s117_s30 = int_to_ptr.vmem [resolvable:$true] %s116_s30 }
  0x54   :  { %s9046_s3 = scalar_lea.vmem %s95_s28, 16  ;;  %s9050_s2 = scalar_lea.vmem %s95_s28, 32 }
  0x55   :  { %p9047_p7 = scmp.ne.s32.totalorder %s95_s28, %s9046_s3  ;;  %p9051_p8 = scmp.lt.s32.totalorder %s95_s28, %s95_s28 }
  0x56   :  { %p9052_p9 = scmp.lt.s32.totalorder %s9050_s2, %s9046_s3 }
  0x58   :  { %p9053_p10 = por %p9052_p9, %p9051_p8 }
  0x5a   :  { %p9054_p11 = pnand %p9053_p10, %p9047_p7 }
  0x5c   :  { %9057 = shalt.err (!%p9054_p11)
}
  0x5d   :  { %97 = dma.hbm_to_vmem [thread:$0]  %s9436_s6, 16, %s95_s28, [#allocation12]  }
  0x5e   :  { %s9066_s12 = scalar_lea.vmem %s117_s30, 16  ;;  %s9070_s4 = scalar_lea.vmem %s117_s30, 32 }
  0x5f   :  { %p9067_p12 = scmp.ne.s32.totalorder %s117_s30, %s9066_s12  ;;  %p9071_p13 = scmp.lt.s32.totalorder %s117_s30, %s117_s30 }
  0x60   :  { %p9072_p0 = scmp.lt.s32.totalorder %s9070_s4, %s9066_s12 }
  0x62   :  { %p9073_p1 = por %p9072_p0, %p9071_p13 }
  0x64   :  { %p9074_p2 = pnand %p9073_p1, %p9067_p12 }
  0x66   :  { %9077 = shalt.err (!%p9074_p2)
}
  0x67   :  { %119 = dma.hbm_to_vmem [thread:$0]  %s9438_s8, 16, %s117_s30, [#allocation15]  }
  0x68   :  { %9098 = dma.done.wait [#allocation3], 6144  }
  0x69   :  { %9099 = vsyncadd [#allocation3], 4294961152 }
  0x6a   :  { %9100 = dma.done.wait [#allocation6], 98368  }
  0x6b   :  { %9101 = vsyncadd [#allocation6], 4294868928 }
  0x6c   :  { %9102 = dma.done.wait [#allocation9], 8224  }
  0x6d   :  { %9103 = vsyncadd [#allocation9], 4294959072 }
  0x6e   :  { %9104 = dma.done.wait [#allocation12], 2064  }
  0x6f   :  { %9105 = vsyncadd [#allocation12], 4294965232 }
  0x70   :  { %9106 = dma.done.wait [#allocation15], 1040  }
  0x71   :  { %9107 = vsyncadd [#allocation15], 4294966256  ;;  %v7625_v0 = vld [vmem:[#allocation5 + $0xe4] ss:$16 sps:$4 sm:$0xff]   ;;  %v7629_v2 = vld [vmem:[#allocation5 + $0xe0] ss:$16 sps:$4 sm:$0xff]  }
  0x72   :  { %v7627_v1 = vld [vmem:[#allocation5 + $0x2e4] ss:$16 sps:$4 sm:$0xff]   ;;  %4850 = vmatprep.subr.bf16.mxu0 %v7625_v0  ;;  %v7630_v3 = vld [vmem:[#allocation5 + $0x2e0] ss:$16 sps:$4 sm:$0xff]   ;;  %v149_v46 = vld [vmem:[#allocation2 + $0x8] sm:$0xff]  ;;  %vm9128_vm0 = vmmov 0  }
  0x73   :  { %4893 = vmatprep.subr.bf16.mxu1 %v7627_v1  ;;  %v7631_v4 = vld [vmem:[#allocation5 + $0xc4] ss:$16 sps:$4 sm:$0xff]   ;;  %4851 = vmatpush1.bf16.msra.mxu0 %v7629_v2  ;;  %v7635_v6 = vld [vmem:[#allocation5 + $0xc0] ss:$16 sps:$4 sm:$0xff]   ;;  %v173_v47 = vld [vmem:[#allocation2 + $0xc8] sm:$0xff]  ;;  %s9129_s6 = smov [#allocation17]  }
  0x74   :  { %4894 = vmatpush1.bf16.msra.mxu1 %v7630_v3  ;;  %v7633_v5 = vld [vmem:[#allocation5 + $0x2c4] ss:$16 sps:$4 sm:$0xff]   ;;  %4852 = vmatprep.subr.bf16.mxu0 %v7631_v4  ;;  %v7636_v7 = vld [vmem:[#allocation5 + $0x2c0] ss:$16 sps:$4 sm:$0xff]   ;;  %v151_v48 = vld [vmem:[#allocation2 + $0x18] sm:$0xff]  ;;  %v9210_v53 = vpack.c.bf16 %v173_v47, %v149_v46  ;;  %s6680_s8 = sshll.u32 %s9129_s6, 4  ;;  %s6681_s8 = int_to_ptr.vmem [resolvable:$true] %s6680_s8 }
  0x75   :  { %4895 = vmatprep.subr.bf16.mxu1 %v7633_v5  ;;  %v7637_v8 = vld [vmem:[#allocation5 + $0xa4] ss:$16 sps:$4 sm:$0xff]   ;;  %v7641_v10 = vld [vmem:[#allocation5 + $0xa0] ss:$16 sps:$4 sm:$0xff]   ;;  %v175_v49 = vld [vmem:[#allocation2 + $0xd8] sm:$0xff]  ;;  %s9078_s5 = scalar_lea.vmem %s6681_s8, 256  ;;  %p9083_p4 = scmp.lt.s32.totalorder %s6681_s8, %s6681_s8 }
  0x76   :  { %v7639_v9 = vld [vmem:[#allocation5 + $0x2a4] ss:$16 sps:$4 sm:$0xff]   ;;  %v7642_v11 = vld [vmem:[#allocation5 + $0x2a0] ss:$16 sps:$4 sm:$0xff]   ;;  %v9212_v54 = vpack.c.bf16 %v175_v49, %v151_v48  ;;  %4882 = vmatprep.mubr.bf16.mxu0 %v9210_v53  ;;  %v179_v46 = vld [vmem:[#allocation2 + $0xf8] sm:$0xff]  ;;  %p9079_p3 = scmp.ne.s32.totalorder %s6681_s8, %s9078_s5  ;;  %p9084_p5 = scmp.lt.s32.totalorder %s9078_s5, %s9078_s5 }
  0x77   :  { %4853 = vmatpush1.bf16.msra.mxu0 %v7635_v6  ;;  %v7643_v12 = vld [vmem:[#allocation5 + $0x84] ss:$16 sps:$4 sm:$0xff]   ;;  %v7647_v14 = vld [vmem:[#allocation5 + $0x80] ss:$16 sps:$4 sm:$0xff]  }
  0x78   :  { %4896 = vmatpush1.bf16.msra.mxu1 %v7636_v7  ;;  %4854 = vmatprep.subr.bf16.mxu0 %v7637_v8  ;;  %v7645_v13 = vld [vmem:[#allocation5 + $0x284] ss:$16 sps:$4 sm:$0xff]   ;;  %v7648_v15 = vld [vmem:[#allocation5 + $0x280] ss:$16 sps:$4 sm:$0xff]   ;;  %p9085_p6 = por %p9084_p5, %p9083_p4 }
  0x79   :  { %4897 = vmatprep.subr.bf16.mxu1 %v7639_v9  ;;  %v7649_v16 = vld [vmem:[#allocation5 + $0x64] ss:$16 sps:$4 sm:$0xff]   ;;  %v7653_v18 = vld [vmem:[#allocation5 + $0x60] ss:$16 sps:$4 sm:$0xff]   ;;  %4925 = vmatprep.mubr.bf16.mxu1 %v9212_v54 }
  0x7a   :  { %v7651_v17 = vld [vmem:[#allocation5 + $0x264] ss:$16 sps:$4 sm:$0xff]   ;;  %v7654_v19 = vld [vmem:[#allocation5 + $0x260] ss:$16 sps:$4 sm:$0xff]   ;;  %p9086_p7 = pnand %p9085_p6, %p9079_p3 }
  0x7b   :  { %4855 = vmatpush1.bf16.msra.mxu0 %v7641_v10  ;;  %v7655_v20 = vld [vmem:[#allocation5 + $0x44] ss:$16 sps:$4 sm:$0xff]   ;;  %v7659_v22 = vld [vmem:[#allocation5 + $0x40] ss:$16 sps:$4 sm:$0xff]  }
  0x7c   :  { %4898 = vmatpush1.bf16.msra.mxu1 %v7642_v11  ;;  %4856 = vmatprep.subr.bf16.mxu0 %v7643_v12  ;;  %v7657_v21 = vld [vmem:[#allocation5 + $0x244] ss:$16 sps:$4 sm:$0xff]   ;;  %v7660_v23 = vld [vmem:[#allocation5 + $0x240] ss:$16 sps:$4 sm:$0xff]  }
  0x7d   :  { %4899 = vmatprep.subr.bf16.mxu1 %v7645_v13  ;;  %v7661_v24 = vld [vmem:[#allocation5 + $0x24] ss:$16 sps:$4 sm:$0xff]   ;;  %v7665_v26 = vld [vmem:[#allocation5 + $0x20] ss:$16 sps:$4 sm:$0xff]  }
  0x7e   :  { %v7663_v25 = vld [vmem:[#allocation5 + $0x224] ss:$16 sps:$4 sm:$0xff]   ;;  %v7666_v27 = vld [vmem:[#allocation5 + $0x220] ss:$16 sps:$4 sm:$0xff]  }
  0x7f   :  { %4857 = vmatpush1.bf16.msra.mxu0 %v7647_v14  ;;  %v7667_v28 = vld [vmem:[#allocation5 + $0x4] ss:$16 sps:$4 sm:$0xff]   ;;  %v7671_v30 = vld [vmem:[#allocation5] ss:$16 sps:$4 sm:$0xff]  }
  0x80   :  { %4900 = vmatpush1.bf16.msra.mxu1 %v7648_v15  ;;  %4858 = vmatprep.subr.bf16.mxu0 %v7649_v16  ;;  %v7669_v29 = vld [vmem:[#allocation5 + $0x204] ss:$16 sps:$4 sm:$0xff]   ;;  %v7672_v31 = vld [vmem:[#allocation5 + $0x200] ss:$16 sps:$4 sm:$0xff]  }
  0x81   :  { %4901 = vmatprep.subr.bf16.mxu1 %v7651_v17  ;;  %v7673_v32 = vld [vmem:[#allocation5 + $0x1e4] ss:$16 sps:$4 sm:$0xff]   ;;  %v7677_v34 = vld [vmem:[#allocation5 + $0x1e0] ss:$16 sps:$4 sm:$0xff]  }
  0x82   :  { %v7675_v33 = vld [vmem:[#allocation5 + $0x3e4] ss:$16 sps:$4 sm:$0xff]   ;;  %v7678_v35 = vld [vmem:[#allocation5 + $0x3e0] ss:$16 sps:$4 sm:$0xff]  }
  0x83   :  { %4859 = vmatpush1.bf16.msra.mxu0 %v7653_v18  ;;  %v7679_v36 = vld [vmem:[#allocation5 + $0x1c4] ss:$16 sps:$4 sm:$0xff]   ;;  %v7683_v38 = vld [vmem:[#allocation5 + $0x1c0] ss:$16 sps:$4 sm:$0xff]  }
  0x84   :  { %4902 = vmatpush1.bf16.msra.mxu1 %v7654_v19  ;;  %4860 = vmatprep.subr.bf16.mxu0 %v7655_v20  ;;  %v7681_v37 = vld [vmem:[#allocation5 + $0x3c4] ss:$16 sps:$4 sm:$0xff]   ;;  %v7684_v39 = vld [vmem:[#allocation5 + $0x3c0] ss:$16 sps:$4 sm:$0xff]  }
  0x85   :  { %4903 = vmatprep.subr.bf16.mxu1 %v7657_v21  ;;  %v7685_v40 = vld [vmem:[#allocation5 + $0x1a4] ss:$16 sps:$4 sm:$0xff]   ;;  %v7689_v42 = vld [vmem:[#allocation5 + $0x1a0] ss:$16 sps:$4 sm:$0xff]  }
  0x86   :  { %v7687_v41 = vld [vmem:[#allocation5 + $0x3a4] ss:$16 sps:$4 sm:$0xff]   ;;  %v7690_v43 = vld [vmem:[#allocation5 + $0x3a0] ss:$16 sps:$4 sm:$0xff]  }
  0x87   :  { %4861 = vmatpush1.bf16.msra.mxu0 %v7659_v22  ;;  %v7691_v44 = vld [vmem:[#allocation5 + $0x184] ss:$16 sps:$4 sm:$0xff]   ;;  %v7695_v50 = vld [vmem:[#allocation5 + $0x180] ss:$16 sps:$4 sm:$0xff]  }
  0x88   :  { %4904 = vmatpush1.bf16.msra.mxu1 %v7660_v23  ;;  %4862 = vmatprep.subr.bf16.mxu0 %v7661_v24  ;;  %v7693_v45 = vld [vmem:[#allocation5 + $0x384] ss:$16 sps:$4 sm:$0xff]   ;;  %v7696_v51 = vld [vmem:[#allocation5 + $0x380] ss:$16 sps:$4 sm:$0xff]  }
  0x89   :  { %4905 = vmatprep.subr.bf16.mxu1 %v7663_v25  ;;  %v7697_v52 = vld [vmem:[#allocation5 + $0x164] ss:$16 sps:$4 sm:$0xff]   ;;  %v7701_v56 = vld [vmem:[#allocation5 + $0x160] ss:$16 sps:$4 sm:$0xff]  }
  0x8a   :  { %v7699_v55 = vld [vmem:[#allocation5 + $0x364] ss:$16 sps:$4 sm:$0xff]   ;;  %v7702_v57 = vld [vmem:[#allocation5 + $0x360] ss:$16 sps:$4 sm:$0xff]  }
  0x8b   :  { %4863 = vmatpush1.bf16.msra.mxu0 %v7665_v26  ;;  %v7703_v58 = vld [vmem:[#allocation5 + $0x144] ss:$16 sps:$4 sm:$0xff]   ;;  %v7707_v60 = vld [vmem:[#allocation5 + $0x140] ss:$16 sps:$4 sm:$0xff]  }
  0x8c   :  { %4906 = vmatpush1.bf16.msra.mxu1 %v7666_v27  ;;  %4864 = vmatprep.subr.bf16.mxu0 %v7667_v28  ;;  %v7705_v59 = vld [vmem:[#allocation5 + $0x344] ss:$16 sps:$4 sm:$0xff]   ;;  %v7708_v61 = vld [vmem:[#allocation5 + $0x340] ss:$16 sps:$4 sm:$0xff]  }
  0x8d   :  { %4907 = vmatprep.subr.bf16.mxu1 %v7669_v29  ;;  %v7709_v62 = vld [vmem:[#allocation5 + $0x124] ss:$16 sps:$4 sm:$0xff]   ;;  %v7713_v0 = vld [vmem:[#allocation5 + $0x120] ss:$16 sps:$4 sm:$0xff]  }
  0x8e   :  { %v7711_v63 = vld [vmem:[#allocation5 + $0x324] ss:$16 sps:$4 sm:$0xff]   ;;  %v7714_v1 = vld [vmem:[#allocation5 + $0x320] ss:$16 sps:$4 sm:$0xff]  }
  0x8f   :  { %4865 = vmatpush1.bf16.msra.mxu0 %v7671_v30  ;;  %v7715_v2 = vld [vmem:[#allocation5 + $0x104] ss:$16 sps:$4 sm:$0xff]   ;;  %v7719_v4 = vld [vmem:[#allocation5 + $0x100] ss:$16 sps:$4 sm:$0xff]  }
  0x90   :  { %4908 = vmatpush1.bf16.msra.mxu1 %v7672_v31  ;;  %4866 = vmatprep.subr.bf16.mxu0 %v7673_v32  ;;  %v7717_v3 = vld [vmem:[#allocation5 + $0x304] ss:$16 sps:$4 sm:$0xff]   ;;  %v7720_v5 = vld [vmem:[#allocation5 + $0x300] ss:$16 sps:$4 sm:$0xff]  }
  0x91   :  { %4909 = vmatprep.subr.bf16.mxu1 %v7675_v33  ;;  %v148_v6 = vld [vmem:[#allocation2] sm:$0xff]  ;;  %v150_v8 = vld [vmem:[#allocation2 + $0x10] sm:$0xff] }
  0x92   :  { %v172_v7 = vld [vmem:[#allocation2 + $0xc0] sm:$0xff]  ;;  %v174_v9 = vld [vmem:[#allocation2 + $0xd0] sm:$0xff] }
  0x93   :  { %4867 = vmatpush2.bf16.msra.mxu0 %v7677_v34  ;;  %v7723_v10 = vld [vmem:[#allocation5 + $0x4e4] ss:$16 sps:$4 sm:$0xff]   ;;  %v9216_v12 = vpack.c.bf16 %v172_v7, %v148_v6  ;;  %v9218_v13 = vpack.c.bf16 %v174_v9, %v150_v8  ;;  %v7721_v14 = vld [vmem:[#allocation5 + $0x4e0] ss:$16 sps:$4 sm:$0xff]  }
  0x94   :  { %4910 = vmatpush2.bf16.msra.mxu1 %v7678_v35  ;;  %4868 = vmatprep.subr.bf16.mxu0 %v7679_v36  ;;  %v7726_v11 = vld [vmem:[#allocation5 + $0x6e4] ss:$16 sps:$4 sm:$0xff]   ;;  %v7724_v15 = vld [vmem:[#allocation5 + $0x6e0] ss:$16 sps:$4 sm:$0xff]  }
  0x95   :  { %4911 = vmatprep.subr.bf16.mxu1 %v7681_v37  ;;  %v7729_v16 = vld [vmem:[#allocation5 + $0x4c4] ss:$16 sps:$4 sm:$0xff]   ;;  %v7727_v18 = vld [vmem:[#allocation5 + $0x4c0] ss:$16 sps:$4 sm:$0xff]  }
  0x96   :  { %v7732_v17 = vld [vmem:[#allocation5 + $0x6c4] ss:$16 sps:$4 sm:$0xff]   ;;  %v7730_v19 = vld [vmem:[#allocation5 + $0x6c0] ss:$16 sps:$4 sm:$0xff]  }
  0x97   :  { %4869 = vmatpush2.bf16.msra.mxu0 %v7683_v38  ;;  %v7735_v20 = vld [vmem:[#allocation5 + $0x4a4] ss:$16 sps:$4 sm:$0xff]   ;;  %v7733_v22 = vld [vmem:[#allocation5 + $0x4a0] ss:$16 sps:$4 sm:$0xff]  }
  0x98   :  { %4912 = vmatpush2.bf16.msra.mxu1 %v7684_v39  ;;  %4870 = vmatprep.subr.bf16.mxu0 %v7685_v40  ;;  %v7738_v21 = vld [vmem:[#allocation5 + $0x6a4] ss:$16 sps:$4 sm:$0xff]   ;;  %v7736_v23 = vld [vmem:[#allocation5 + $0x6a0] ss:$16 sps:$4 sm:$0xff]   ;;  %v153_v40 = vld [vmem:[#allocation2 + $0x28] sm:$0xff] }
  0x99   :  { %4913 = vmatprep.subr.bf16.mxu1 %v7687_v41  ;;  %v7741_v24 = vld [vmem:[#allocation5 + $0x484] ss:$16 sps:$4 sm:$0xff]   ;;  %v7739_v26 = vld [vmem:[#allocation5 + $0x480] ss:$16 sps:$4 sm:$0xff]   ;;  %v177_v41 = vld [vmem:[#allocation2 + $0xe8] sm:$0xff] }
  0x9a   :  { %v7744_v25 = vld [vmem:[#allocation5 + $0x684] ss:$16 sps:$4 sm:$0xff]   ;;  %v7742_v27 = vld [vmem:[#allocation5 + $0x680] ss:$16 sps:$4 sm:$0xff]  }
  0x9b   :  { %4871 = vmatpush2.bf16.msra.mxu0 %v7689_v42  ;;  %v7747_v28 = vld [vmem:[#allocation5 + $0x464] ss:$16 sps:$4 sm:$0xff]   ;;  %v7745_v30 = vld [vmem:[#allocation5 + $0x460] ss:$16 sps:$4 sm:$0xff]   ;;  %v155_v42 = vld [vmem:[#allocation2 + $0x38] sm:$0xff] }
  0x9c   :  { %4914 = vmatpush2.bf16.msra.mxu1 %v7690_v43  ;;  %4872 = vmatprep.subr.bf16.mxu0 %v7691_v44  ;;  %v7750_v29 = vld [vmem:[#allocation5 + $0x664] ss:$16 sps:$4 sm:$0xff]   ;;  %v7748_v31 = vld [vmem:[#allocation5 + $0x660] ss:$16 sps:$4 sm:$0xff]   ;;  %v9224_v47 = vpack.c.bf16 %v179_v46, %v155_v42  ;;  %v183_v42 = vld [vmem:[#allocation2 + $0x118] sm:$0xff] }
  0x9d   :  { %4915 = vmatprep.subr.bf16.mxu1 %v7693_v45  ;;  %v7753_v32 = vld [vmem:[#allocation5 + $0x444] ss:$16 sps:$4 sm:$0xff]   ;;  %v7751_v34 = vld [vmem:[#allocation5 + $0x440] ss:$16 sps:$4 sm:$0xff]   ;;  %v9222_v45 = vpack.c.bf16 %v177_v41, %v153_v40  ;;  %v159_v41 = vld [vmem:[#allocation2 + $0x58] sm:$0xff] }
  0x9e   :  { %v7756_v33 = vld [vmem:[#allocation5 + $0x644] ss:$16 sps:$4 sm:$0xff]   ;;  %v7754_v35 = vld [vmem:[#allocation5 + $0x640] ss:$16 sps:$4 sm:$0xff]   ;;  %v9236_v46 = vpack.c.bf16 %v183_v42, %v159_v41 }
  0x9f   :  { %4873 = vmatpush2.bf16.msra.mxu0 %v7695_v50  ;;  %v7759_v36 = vld [vmem:[#allocation5 + $0x424] ss:$16 sps:$4 sm:$0xff]   ;;  %v7757_v38 = vld [vmem:[#allocation5 + $0x420] ss:$16 sps:$4 sm:$0xff]  }
  0xa0   :  { %4916 = vmatpush2.bf16.msra.mxu1 %v7696_v51  ;;  %4874 = vmatprep.subr.bf16.mxu0 %v7697_v52  ;;  %v7762_v37 = vld [vmem:[#allocation5 + $0x624] ss:$16 sps:$4 sm:$0xff]   ;;  %v7760_v39 = vld [vmem:[#allocation5 + $0x620] ss:$16 sps:$4 sm:$0xff]  }
  0xa1   :  { %4917 = vmatprep.subr.bf16.mxu1 %v7699_v55  ;;  %v7765_v43 = vld [vmem:[#allocation5 + $0x404] ss:$16 sps:$4 sm:$0xff]   ;;  %v7763_v48 = vld [vmem:[#allocation5 + $0x400] ss:$16 sps:$4 sm:$0xff]  }
  0xa2   :  { %v7768_v44 = vld [vmem:[#allocation5 + $0x604] ss:$16 sps:$4 sm:$0xff]   ;;  %v7766_v49 = vld [vmem:[#allocation5 + $0x600] ss:$16 sps:$4 sm:$0xff]  }
  0xa3   :  { %4875 = vmatpush2.bf16.msra.mxu0 %v7701_v56  ;;  %v7771_v50 = vld [vmem:[#allocation5 + $0x5e4] ss:$16 sps:$4 sm:$0xff]   ;;  %v7769_v52 = vld [vmem:[#allocation5 + $0x5e0] ss:$16 sps:$4 sm:$0xff]  }
  0xa4   :  { %4918 = vmatpush2.bf16.msra.mxu1 %v7702_v57  ;;  %4876 = vmatprep.subr.bf16.mxu0 %v7703_v58  ;;  %v7774_v51 = vld [vmem:[#allocation5 + $0x7e4] ss:$16 sps:$4 sm:$0xff]   ;;  %v7772_v55 = vld [vmem:[#allocation5 + $0x7e0] ss:$16 sps:$4 sm:$0xff]  }
  0xa5   :  { %4919 = vmatprep.subr.bf16.mxu1 %v7705_v59  ;;  %v7777_v56 = vld [vmem:[#allocation5 + $0x5c4] ss:$16 sps:$4 sm:$0xff]   ;;  %v7775_v58 = vld [vmem:[#allocation5 + $0x5c0] ss:$16 sps:$4 sm:$0xff]  }
  0xa6   :  { %v7780_v57 = vld [vmem:[#allocation5 + $0x7c4] ss:$16 sps:$4 sm:$0xff]   ;;  %v7778_v59 = vld [vmem:[#allocation5 + $0x7c0] ss:$16 sps:$4 sm:$0xff]  }
  0xa7   :  { %4877 = vmatpush2.bf16.msra.mxu0 %v7707_v60  ;;  %v7783_v60 = vld [vmem:[#allocation5 + $0x5a4] ss:$16 sps:$4 sm:$0xff]   ;;  %v7793_v6 = vld [vmem:[#allocation5 + $0x560] ss:$16 sps:$4 sm:$0xff]  }
  0xa8   :  { %4920 = vmatpush2.bf16.msra.mxu1 %v7708_v61  ;;  %4878 = vmatprep.subr.bf16.mxu0 %v7709_v62  ;;  %v7786_v61 = vld [vmem:[#allocation5 + $0x7a4] ss:$16 sps:$4 sm:$0xff]   ;;  %v7781_v62 = vld [vmem:[#allocation5 + $0x5a0] ss:$16 sps:$4 sm:$0xff]  }
  0xa9   :  { %4921 = vmatprep.subr.bf16.mxu1 %v7711_v63  ;;  %v7784_v63 = vld [vmem:[#allocation5 + $0x7a0] ss:$16 sps:$4 sm:$0xff]   ;;  %v7801_v8 = vld [vmem:[#allocation5 + $0x544] ss:$16 sps:$4 sm:$0xff]  }
  0xaa   :  { %v7796_v7 = vld [vmem:[#allocation5 + $0x760] ss:$16 sps:$4 sm:$0xff]   ;;  %v7804_v9 = vld [vmem:[#allocation5 + $0x744] ss:$16 sps:$4 sm:$0xff]  }
  0xab   :  { %4879 = vmatpush2.bf16.msra.mxu0 %v7713_v0  ;;  %v7789_v0 = vld [vmem:[#allocation5 + $0x584] ss:$16 sps:$4 sm:$0xff]   ;;  %v7907_v41 = vld [vmem:[#allocation5 + $0x900] ss:$16 sps:$4 sm:$0xff]  }
  0xac   :  { %4922 = vmatpush2.bf16.msra.mxu1 %v7714_v1  ;;  %4880 = vmatprep.subr.bf16.mxu0 %v7715_v2  ;;  %v7792_v1 = vld [vmem:[#allocation5 + $0x784] ss:$16 sps:$4 sm:$0xff]   ;;  %v7787_v2 = vld [vmem:[#allocation5 + $0x580] ss:$16 sps:$4 sm:$0xff]  }
  0xad   :  { %4923 = vmatprep.subr.bf16.mxu1 %v7717_v3  ;;  %v7790_v3 = vld [vmem:[#allocation5 + $0x780] ss:$16 sps:$4 sm:$0xff]  }
  0xae   :  { %v7910_v42 = vld [vmem:[#allocation5 + $0xb00] ss:$16 sps:$4 sm:$0xff]  }
  0xaf   :  { %4881 = vmatpush2.bf16.msra.mxu0 %v7719_v4  ;;  %v7795_v4 = vld [vmem:[#allocation5 + $0x564] ss:$16 sps:$4 sm:$0xff]  }
  0xb0   :  { %4924 = vmatpush2.bf16.msra.mxu1 %v7720_v5  ;;  %4936 = vmatprep.subr.bf16.mxu0 %v7723_v10  ;;  %v7798_v5 = vld [vmem:[#allocation5 + $0x764] ss:$16 sps:$4 sm:$0xff]   ;;  %v7799_v10 = vld [vmem:[#allocation5 + $0x540] ss:$16 sps:$4 sm:$0xff]  }
  0xb1   :  { %4979 = vmatprep.subr.bf16.mxu1 %v7726_v11  ;;  %v7802_v11 = vld [vmem:[#allocation5 + $0x740] ss:$16 sps:$4 sm:$0xff]  }
  0xb2   :  { %4883 = vmatmul.mubr.bf16.vlgmr.msra.gmra.mxu0 %v9216_v12 }
  0xb3   :  { %4926 = vmatmul.mubr.bf16.vlgmr.msra.gmra.mxu1 %v9218_v13  ;;  %4937 = vmatpush1.bf16.msra.mxu0 %v7721_v14  ;;  %v7807_v14 = vld [vmem:[#allocation5 + $0x524] ss:$16 sps:$4 sm:$0xff]  }
  0xb4   :  { %4980 = vmatpush1.bf16.msra.mxu1 %v7724_v15  ;;  %4938 = vmatprep.subr.bf16.mxu0 %v7729_v16  ;;  %v7810_v15 = vld [vmem:[#allocation5 + $0x724] ss:$16 sps:$4 sm:$0xff]   ;;  %v7805_v16 = vld [vmem:[#allocation5 + $0x520] ss:$16 sps:$4 sm:$0xff]  }
  0xb5   :  { %4981 = vmatprep.subr.bf16.mxu1 %v7732_v17  ;;  %4968 = vmatprep.mubr.bf16.mxu0 %v9222_v45  ;;  %v7808_v17 = vld [vmem:[#allocation5 + $0x720] ss:$16 sps:$4 sm:$0xff]  }
  0xb6   :  { %5011 = vmatprep.mubr.bf16.mxu1 %v9224_v47 }
  0xb7   :  { %4939 = vmatpush1.bf16.msra.mxu0 %v7727_v18  ;;  %v7813_v18 = vld [vmem:[#allocation5 + $0x504] ss:$16 sps:$4 sm:$0xff]  }
  0xb8   :  { %4982 = vmatpush1.bf16.msra.mxu1 %v7730_v19  ;;  %4940 = vmatprep.subr.bf16.mxu0 %v7735_v20  ;;  %v7816_v19 = vld [vmem:[#allocation5 + $0x704] ss:$16 sps:$4 sm:$0xff]   ;;  %v7811_v20 = vld [vmem:[#allocation5 + $0x500] ss:$16 sps:$4 sm:$0xff]  }
  0xb9   :  { %4983 = vmatprep.subr.bf16.mxu1 %v7738_v21  ;;  %v7814_v21 = vld [vmem:[#allocation5 + $0x700] ss:$16 sps:$4 sm:$0xff]  }
  0xbb   :  { %4941 = vmatpush1.bf16.msra.mxu0 %v7733_v22  ;;  %v152_v22 = vld [vmem:[#allocation2 + $0x20] sm:$0xff] }
  0xbc   :  { %4984 = vmatpush1.bf16.msra.mxu1 %v7736_v23  ;;  %4942 = vmatprep.subr.bf16.mxu0 %v7741_v24  ;;  %v176_v23 = vld [vmem:[#allocation2 + $0xe0] sm:$0xff]  ;;  %v154_v24 = vld [vmem:[#allocation2 + $0x30] sm:$0xff] }
  0xbd   :  { %4985 = vmatprep.subr.bf16.mxu1 %v7744_v25  ;;  %v178_v25 = vld [vmem:[#allocation2 + $0xf0] sm:$0xff] }
  0xbf   :  { %4943 = vmatpush1.bf16.msra.mxu0 %v7739_v26  ;;  %v7819_v26 = vld [vmem:[#allocation5 + $0x8e4] ss:$16 sps:$4 sm:$0xff]  }
  0xc0   :  { %4986 = vmatpush1.bf16.msra.mxu1 %v7742_v27  ;;  %4944 = vmatprep.subr.bf16.mxu0 %v7747_v28  ;;  %v7822_v27 = vld [vmem:[#allocation5 + $0xae4] ss:$16 sps:$4 sm:$0xff]   ;;  %v9228_v28 = vpack.c.bf16 %v176_v23, %v152_v22  ;;  %v7883_v22 = vld [vmem:[#allocation5 + $0x980] ss:$16 sps:$4 sm:$0xff]  }
  0xc1   :  { %4987 = vmatprep.subr.bf16.mxu1 %v7750_v29  ;;  %v9230_v29 = vpack.c.bf16 %v178_v25, %v154_v24  ;;  %v7886_v23 = vld [vmem:[#allocation5 + $0xb80] ss:$16 sps:$4 sm:$0xff]   ;;  %v7891_v24 = vld [vmem:[#allocation5 + $0x964] ss:$16 sps:$4 sm:$0xff]  }
  0xc2   :  { %v7894_v25 = vld [vmem:[#allocation5 + $0xb64] ss:$16 sps:$4 sm:$0xff]  }
  0xc3   :  { %4945 = vmatpush1.bf16.msra.mxu0 %v7745_v30  ;;  %v7817_v30 = vld [vmem:[#allocation5 + $0x8e0] ss:$16 sps:$4 sm:$0xff]  }
  0xc4   :  { %4988 = vmatpush1.bf16.msra.mxu1 %v7748_v31  ;;  %4946 = vmatprep.subr.bf16.mxu0 %v7753_v32  ;;  %v7820_v31 = vld [vmem:[#allocation5 + $0xae0] ss:$16 sps:$4 sm:$0xff]   ;;  %v7825_v32 = vld [vmem:[#allocation5 + $0x8c4] ss:$16 sps:$4 sm:$0xff]  }
  0xc5   :  { %4989 = vmatprep.subr.bf16.mxu1 %v7756_v33  ;;  %v7828_v33 = vld [vmem:[#allocation5 + $0xac4] ss:$16 sps:$4 sm:$0xff]  }
  0xc7   :  { %4947 = vmatpush1.bf16.msra.mxu0 %v7751_v34  ;;  %v7823_v34 = vld [vmem:[#allocation5 + $0x8c0] ss:$16 sps:$4 sm:$0xff]  }
  0xc8   :  { %4990 = vmatpush1.bf16.msra.mxu1 %v7754_v35  ;;  %4948 = vmatprep.subr.bf16.mxu0 %v7759_v36  ;;  %v7826_v35 = vld [vmem:[#allocation5 + $0xac0] ss:$16 sps:$4 sm:$0xff]   ;;  %v7831_v36 = vld [vmem:[#allocation5 + $0x8a4] ss:$16 sps:$4 sm:$0xff]  }
  0xc9   :  { %4991 = vmatprep.subr.bf16.mxu1 %v7762_v37  ;;  %v7834_v37 = vld [vmem:[#allocation5 + $0xaa4] ss:$16 sps:$4 sm:$0xff]  }
  0xcb   :  { %4949 = vmatpush1.bf16.msra.mxu0 %v7757_v38  ;;  %v157_v38 = vld [vmem:[#allocation2 + $0x48] sm:$0xff] }
  0xcc   :  { %4992 = vmatpush1.bf16.msra.mxu1 %v7760_v39  ;;  %4950 = vmatprep.subr.bf16.mxu0 %v7765_v43  ;;  %v181_v39 = vld [vmem:[#allocation2 + $0x108] sm:$0xff]  ;;  %v7829_v43 = vld [vmem:[#allocation5 + $0x8a0] ss:$16 sps:$4 sm:$0xff]  }
  0xcd   :  { %4993 = vmatprep.subr.bf16.mxu1 %v7768_v44  ;;  %v9234_v40 = vpack.c.bf16 %v181_v39, %v157_v38  ;;  %v7832_v44 = vld [vmem:[#allocation5 + $0xaa0] ss:$16 sps:$4 sm:$0xff]   ;;  %v7909_v38 = vld [vmem:[#allocation5 + $0x904] ss:$16 sps:$4 sm:$0xff]  }
  0xce   :  { %v7912_v39 = vld [vmem:[#allocation5 + $0xb04] ss:$16 sps:$4 sm:$0xff]  }
  0xcf   :  { %4951 = vmatpush1.bf16.msra.mxu0 %v7763_v48  ;;  %v7837_v48 = vld [vmem:[#allocation5 + $0x884] ss:$16 sps:$4 sm:$0xff]  }
  0xd0   :  { %4994 = vmatpush1.bf16.msra.mxu1 %v7766_v49  ;;  %4952 = vmatprep.subr.bf16.mxu0 %v7771_v50  ;;  %v7840_v49 = vld [vmem:[#allocation5 + $0xa84] ss:$16 sps:$4 sm:$0xff]   ;;  %v7835_v50 = vld [vmem:[#allocation5 + $0x880] ss:$16 sps:$4 sm:$0xff]  }
  0xd1   :  { %4995 = vmatprep.subr.bf16.mxu1 %v7774_v51  ;;  %v7838_v51 = vld [vmem:[#allocation5 + $0xa80] ss:$16 sps:$4 sm:$0xff]  }
  0xd3   :  { %4953 = vmatpush2.bf16.msra.mxu0 %v7769_v52  ;;  %v7843_v52 = vld [vmem:[#allocation5 + $0x864] ss:$16 sps:$4 sm:$0xff]  }
  0xd4   :  { %4996 = vmatpush2.bf16.msra.mxu1 %v7772_v55  ;;  %4954 = vmatprep.subr.bf16.mxu0 %v7777_v56  ;;  %v7846_v55 = vld [vmem:[#allocation5 + $0xa64] ss:$16 sps:$4 sm:$0xff]   ;;  %v7841_v56 = vld [vmem:[#allocation5 + $0x860] ss:$16 sps:$4 sm:$0xff]  }
  0xd5   :  { %4997 = vmatprep.subr.bf16.mxu1 %v7780_v57  ;;  %v7844_v57 = vld [vmem:[#allocation5 + $0xa60] ss:$16 sps:$4 sm:$0xff]  }
  0xd7   :  { %4955 = vmatpush2.bf16.msra.mxu0 %v7775_v58  ;;  %v7849_v58 = vld [vmem:[#allocation5 + $0x844] ss:$16 sps:$4 sm:$0xff]  }
  0xd8   :  { %4998 = vmatpush2.bf16.msra.mxu1 %v7778_v59  ;;  %4956 = vmatprep.subr.bf16.mxu0 %v7783_v60  ;;  %v7852_v59 = vld [vmem:[#allocation5 + $0xa44] ss:$16 sps:$4 sm:$0xff]   ;;  %v7847_v60 = vld [vmem:[#allocation5 + $0x840] ss:$16 sps:$4 sm:$0xff]  }
  0xd9   :  { %4999 = vmatprep.subr.bf16.mxu1 %v7786_v61  ;;  %v7850_v61 = vld [vmem:[#allocation5 + $0xa40] ss:$16 sps:$4 sm:$0xff]  }
  0xdb   :  { %4957 = vmatpush2.bf16.msra.mxu0 %v7781_v62  ;;  %v7855_v62 = vld [vmem:[#allocation5 + $0x824] ss:$16 sps:$4 sm:$0xff]  }
  0xdc   :  { %5000 = vmatpush2.bf16.msra.mxu1 %v7784_v63  ;;  %4958 = vmatprep.subr.bf16.mxu0 %v7789_v0  ;;  %v7858_v63 = vld [vmem:[#allocation5 + $0xa24] ss:$16 sps:$4 sm:$0xff]   ;;  %v7853_v0 = vld [vmem:[#allocation5 + $0x820] ss:$16 sps:$4 sm:$0xff]  }
  0xdd   :  { %5001 = vmatprep.subr.bf16.mxu1 %v7792_v1  ;;  %v7856_v1 = vld [vmem:[#allocation5 + $0xa20] ss:$16 sps:$4 sm:$0xff]  }
  0xdf   :  { %4959 = vmatpush2.bf16.msra.mxu0 %v7787_v2  ;;  %v7861_v2 = vld [vmem:[#allocation5 + $0x804] ss:$16 sps:$4 sm:$0xff]  }
  0xe0   :  { %5002 = vmatpush2.bf16.msra.mxu1 %v7790_v3  ;;  %4960 = vmatprep.subr.bf16.mxu0 %v7795_v4  ;;  %v7864_v3 = vld [vmem:[#allocation5 + $0xa04] ss:$16 sps:$4 sm:$0xff]   ;;  %v7859_v4 = vld [vmem:[#allocation5 + $0x800] ss:$16 sps:$4 sm:$0xff]  }
  0xe1   :  { %5003 = vmatprep.subr.bf16.mxu1 %v7798_v5  ;;  %v7862_v5 = vld [vmem:[#allocation5 + $0xa00] ss:$16 sps:$4 sm:$0xff]  }
  0xe3   :  { %4961 = vmatpush2.bf16.msra.mxu0 %v7793_v6  ;;  %v7867_v6 = vld [vmem:[#allocation5 + $0x9e4] ss:$16 sps:$4 sm:$0xff]  }
  0xe4   :  { %5004 = vmatpush2.bf16.msra.mxu1 %v7796_v7  ;;  %4962 = vmatprep.subr.bf16.mxu0 %v7801_v8  ;;  %v7870_v7 = vld [vmem:[#allocation5 + $0xbe4] ss:$16 sps:$4 sm:$0xff]   ;;  %v7865_v8 = vld [vmem:[#allocation5 + $0x9e0] ss:$16 sps:$4 sm:$0xff]  }
  0xe5   :  { %5005 = vmatprep.subr.bf16.mxu1 %v7804_v9  ;;  %v7868_v9 = vld [vmem:[#allocation5 + $0xbe0] ss:$16 sps:$4 sm:$0xff]  }
  0xe7   :  { %4963 = vmatpush2.bf16.msra.mxu0 %v7799_v10  ;;  %v7873_v10 = vld [vmem:[#allocation5 + $0x9c4] ss:$16 sps:$4 sm:$0xff]  }
  0xe8   :  { %5006 = vmatpush2.bf16.msra.mxu1 %v7802_v11  ;;  %4964 = vmatprep.subr.bf16.mxu0 %v7807_v14  ;;  %v7876_v11 = vld [vmem:[#allocation5 + $0xbc4] ss:$16 sps:$4 sm:$0xff]   ;;  %v7871_v14 = vld [vmem:[#allocation5 + $0x9c0] ss:$16 sps:$4 sm:$0xff]  }
  0xe9   :  { %5007 = vmatprep.subr.bf16.mxu1 %v7810_v15  ;;  %v7874_v15 = vld [vmem:[#allocation5 + $0xbc0] ss:$16 sps:$4 sm:$0xff]  }
  0xeb   :  { %4965 = vmatpush2.bf16.msra.mxu0 %v7805_v16  ;;  %v7879_v16 = vld [vmem:[#allocation5 + $0x9a4] ss:$16 sps:$4 sm:$0xff]  }
  0xec   :  { %5008 = vmatpush2.bf16.msra.mxu1 %v7808_v17  ;;  %4966 = vmatprep.subr.bf16.mxu0 %v7813_v18  ;;  %v7882_v17 = vld [vmem:[#allocation5 + $0xba4] ss:$16 sps:$4 sm:$0xff]   ;;  %v7877_v18 = vld [vmem:[#allocation5 + $0x9a0] ss:$16 sps:$4 sm:$0xff]  }
  0xed   :  { %5009 = vmatprep.subr.bf16.mxu1 %v7816_v19  ;;  %v7880_v19 = vld [vmem:[#allocation5 + $0xba0] ss:$16 sps:$4 sm:$0xff]  }
  0xef   :  { %4967 = vmatpush2.bf16.msra.mxu0 %v7811_v20  ;;  %v7885_v20 = vld [vmem:[#allocation5 + $0x984] ss:$16 sps:$4 sm:$0xff]  }
  0xf0   :  { %5010 = vmatpush2.bf16.msra.mxu1 %v7814_v21  ;;  %5022 = vmatprep.subr.bf16.mxu0 %v7819_v26  ;;  %v7888_v21 = vld [vmem:[#allocation5 + $0xb84] ss:$16 sps:$4 sm:$0xff]   ;;  %v7889_v26 = vld [vmem:[#allocation5 + $0x960] ss:$16 sps:$4 sm:$0xff]  }
  0xf1   :  { %5065 = vmatprep.subr.bf16.mxu1 %v7822_v27  ;;  %v7892_v27 = vld [vmem:[#allocation5 + $0xb60] ss:$16 sps:$4 sm:$0xff]  }
  0xf2   :  { %4969 = vmatmul.mubr.bf16.vlgmr.msra.gmra.mxu0 %v9228_v28 }
  0xf3   :  { %5012 = vmatmul.mubr.bf16.vlgmr.msra.gmra.mxu1 %v9230_v29  ;;  %5023 = vmatpush1.bf16.msra.mxu0 %v7817_v30  ;;  %v7897_v30 = vld [vmem:[#allocation5 + $0x944] ss:$16 sps:$4 sm:$0xff]  }
  0xf4   :  { %5066 = vmatpush1.bf16.msra.mxu1 %v7820_v31  ;;  %5024 = vmatprep.subr.bf16.mxu0 %v7825_v32  ;;  %v7900_v31 = vld [vmem:[#allocation5 + $0xb44] ss:$16 sps:$4 sm:$0xff]   ;;  %v7895_v32 = vld [vmem:[#allocation5 + $0x940] ss:$16 sps:$4 sm:$0xff]  }
  0xf5   :  { %5067 = vmatprep.subr.bf16.mxu1 %v7828_v33  ;;  %5054 = vmatprep.mubr.bf16.mxu0 %v9234_v40  ;;  %v7898_v33 = vld [vmem:[#allocation5 + $0xb40] ss:$16 sps:$4 sm:$0xff]  }
  0xf6   :  { %5097 = vmatprep.mubr.bf16.mxu1 %v9236_v46 }
  0xf7   :  { %5025 = vmatpush1.bf16.msra.mxu0 %v7823_v34  ;;  %v7903_v34 = vld [vmem:[#allocation5 + $0x924] ss:$16 sps:$4 sm:$0xff]  }
  0xf8   :  { %5068 = vmatpush1.bf16.msra.mxu1 %v7826_v35  ;;  %5026 = vmatprep.subr.bf16.mxu0 %v7831_v36  ;;  %v7906_v35 = vld [vmem:[#allocation5 + $0xb24] ss:$16 sps:$4 sm:$0xff]   ;;  %v7901_v36 = vld [vmem:[#allocation5 + $0x920] ss:$16 sps:$4 sm:$0xff]  }
  0xf9   :  { %5069 = vmatprep.subr.bf16.mxu1 %v7834_v37  ;;  %v7904_v37 = vld [vmem:[#allocation5 + $0xb20] ss:$16 sps:$4 sm:$0xff]  }
  0xfb   :  { %5027 = vmatpush1.bf16.msra.mxu0 %v7829_v43  ;;  %v156_v43 = vld [vmem:[#allocation2 + $0x40] sm:$0xff] }
  0xfc   :  { %5070 = vmatpush1.bf16.msra.mxu1 %v7832_v44  ;;  %5028 = vmatprep.subr.bf16.mxu0 %v7837_v48  ;;  %v180_v44 = vld [vmem:[#allocation2 + $0x100] sm:$0xff]  ;;  %v158_v48 = vld [vmem:[#allocation2 + $0x50] sm:$0xff] }
  0xfd   :  { %5071 = vmatprep.subr.bf16.mxu1 %v7840_v49  ;;  %v182_v49 = vld [vmem:[#allocation2 + $0x110] sm:$0xff] }
  0xff   :  { %5029 = vmatpush1.bf16.msra.mxu0 %v7835_v50  ;;  %v7915_v50 = vld [vmem:[#allocation5 + $0xce4] ss:$16 sps:$4 sm:$0xff]  }
 0x100   :  { %5072 = vmatpush1.bf16.msra.mxu1 %v7838_v51  ;;  %5030 = vmatprep.subr.bf16.mxu0 %v7843_v52  ;;  %v7918_v51 = vld [vmem:[#allocation5 + $0xee4] ss:$16 sps:$4 sm:$0xff]   ;;  %v161_v52 = vld [vmem:[#allocation2 + $0x68] sm:$0xff] }
 0x101   :  { %5073 = vmatprep.subr.bf16.mxu1 %v7846_v55  ;;  %v7913_v55 = vld [vmem:[#allocation5 + $0xce0] ss:$16 sps:$4 sm:$0xff]  }
 0x103   :  { %5031 = vmatpush1.bf16.msra.mxu0 %v7841_v56  ;;  %v185_v56 = vld [vmem:[#allocation2 + $0x128] sm:$0xff] }
 0x104   :  { %5074 = vmatpush1.bf16.msra.mxu1 %v7844_v57  ;;  %5032 = vmatprep.subr.bf16.mxu0 %v7849_v58  ;;  %v163_v57 = vld [vmem:[#allocation2 + $0x78] sm:$0xff]  ;;  %v9240_v58 = vpack.c.bf16 %v180_v44, %v156_v43  ;;  %v7973_v43 = vld [vmem:[#allocation5 + $0xda0] ss:$16 sps:$4 sm:$0xff]  }
 0x105   :  { %5075 = vmatprep.subr.bf16.mxu1 %v7852_v59  ;;  %v9242_v59 = vpack.c.bf16 %v182_v49, %v158_v48  ;;  %v7976_v44 = vld [vmem:[#allocation5 + $0xfa0] ss:$16 sps:$4 sm:$0xff]   ;;  %v7981_v48 = vld [vmem:[#allocation5 + $0xd84] ss:$16 sps:$4 sm:$0xff]  }
 0x106   :  { %v7984_v49 = vld [vmem:[#allocation5 + $0xf84] ss:$16 sps:$4 sm:$0xff]  }
 0x107   :  { %5033 = vmatpush1.bf16.msra.mxu0 %v7847_v60  ;;  %v187_v60 = vld [vmem:[#allocation2 + $0x138] sm:$0xff] }
 0x108   :  { %5076 = vmatpush1.bf16.msra.mxu1 %v7850_v61  ;;  %5034 = vmatprep.subr.bf16.mxu0 %v7855_v62  ;;  %v7916_v61 = vld [vmem:[#allocation5 + $0xee0] ss:$16 sps:$4 sm:$0xff]   ;;  %v7921_v62 = vld [vmem:[#allocation5 + $0xcc4] ss:$16 sps:$4 sm:$0xff]  }
 0x109   :  { %5077 = vmatprep.subr.bf16.mxu1 %v7858_v63  ;;  %v7924_v63 = vld [vmem:[#allocation5 + $0xec4] ss:$16 sps:$4 sm:$0xff]  }
 0x10b   :  { %5035 = vmatpush1.bf16.msra.mxu0 %v7853_v0  ;;  %v9244_v0 = vpack.c.bf16 %v185_v56, %v161_v52  ;;  %v7987_v52 = vld [vmem:[#allocation5 + $0xd64] ss:$16 sps:$4 sm:$0xff]   ;;  %v7985_v56 = vld [vmem:[#allocation5 + $0xd60] ss:$16 sps:$4 sm:$0xff]  }
 0x10c   :  { %5078 = vmatpush1.bf16.msra.mxu1 %v7856_v1  ;;  %5036 = vmatprep.subr.bf16.mxu0 %v7861_v2  ;;  %v9246_v1 = vpack.c.bf16 %v187_v60, %v163_v57  ;;  %v7919_v2 = vld [vmem:[#allocation5 + $0xcc0] ss:$16 sps:$4 sm:$0xff]   ;;  %v7993_v60 = vld [vmem:[#allocation5 + $0xd44] ss:$16 sps:$4 sm:$0xff]  }
 0x10d   :  { %5079 = vmatprep.subr.bf16.mxu1 %v7864_v3  ;;  %v7922_v3 = vld [vmem:[#allocation5 + $0xec0] ss:$16 sps:$4 sm:$0xff]  }
 0x10e   :  { %v7988_v57 = vld [vmem:[#allocation5 + $0xf60] ss:$16 sps:$4 sm:$0xff]  }
 0x10f   :  { %5037 = vmatpush1.bf16.msra.mxu0 %v7859_v4  ;;  %v7927_v4 = vld [vmem:[#allocation5 + $0xca4] ss:$16 sps:$4 sm:$0xff]  }
 0x110   :  { %5080 = vmatpush1.bf16.msra.mxu1 %v7862_v5  ;;  %5038 = vmatprep.subr.bf16.mxu0 %v7867_v6  ;;  %v7930_v5 = vld [vmem:[#allocation5 + $0xea4] ss:$16 sps:$4 sm:$0xff]   ;;  %v7925_v6 = vld [vmem:[#allocation5 + $0xca0] ss:$16 sps:$4 sm:$0xff]  }
 0x111   :  { %5081 = vmatprep.subr.bf16.mxu1 %v7870_v7  ;;  %v7928_v7 = vld [vmem:[#allocation5 + $0xea0] ss:$16 sps:$4 sm:$0xff]  }
 0x113   :  { %5039 = vmatpush2.bf16.msra.mxu0 %v7865_v8  ;;  %v7933_v8 = vld [vmem:[#allocation5 + $0xc84] ss:$16 sps:$4 sm:$0xff]  }
 0x114   :  { %5082 = vmatpush2.bf16.msra.mxu1 %v7868_v9  ;;  %5040 = vmatprep.subr.bf16.mxu0 %v7873_v10  ;;  %v7936_v9 = vld [vmem:[#allocation5 + $0xe84] ss:$16 sps:$4 sm:$0xff]   ;;  %v7931_v10 = vld [vmem:[#allocation5 + $0xc80] ss:$16 sps:$4 sm:$0xff]  }
 0x115   :  { %5083 = vmatprep.subr.bf16.mxu1 %v7876_v11  ;;  %v7934_v11 = vld [vmem:[#allocation5 + $0xe80] ss:$16 sps:$4 sm:$0xff]  }
 0x117   :  { %5041 = vmatpush2.bf16.msra.mxu0 %v7871_v14  ;;  %v7939_v14 = vld [vmem:[#allocation5 + $0xc64] ss:$16 sps:$4 sm:$0xff]  }
 0x118   :  { %5084 = vmatpush2.bf16.msra.mxu1 %v7874_v15  ;;  %5042 = vmatprep.subr.bf16.mxu0 %v7879_v16  ;;  %v7942_v15 = vld [vmem:[#allocation5 + $0xe64] ss:$16 sps:$4 sm:$0xff]   ;;  %v7937_v16 = vld [vmem:[#allocation5 + $0xc60] ss:$16 sps:$4 sm:$0xff]  }
 0x119   :  { %5085 = vmatprep.subr.bf16.mxu1 %v7882_v17  ;;  %v7940_v17 = vld [vmem:[#allocation5 + $0xe60] ss:$16 sps:$4 sm:$0xff]  }
 0x11b   :  { %5043 = vmatpush2.bf16.msra.mxu0 %v7877_v18  ;;  %v7945_v18 = vld [vmem:[#allocation5 + $0xc44] ss:$16 sps:$4 sm:$0xff]  }
 0x11c   :  { %5086 = vmatpush2.bf16.msra.mxu1 %v7880_v19  ;;  %5044 = vmatprep.subr.bf16.mxu0 %v7885_v20  ;;  %v7948_v19 = vld [vmem:[#allocation5 + $0xe44] ss:$16 sps:$4 sm:$0xff]   ;;  %v7943_v20 = vld [vmem:[#allocation5 + $0xc40] ss:$16 sps:$4 sm:$0xff]  }
 0x11d   :  { %5087 = vmatprep.subr.bf16.mxu1 %v7888_v21  ;;  %v7946_v21 = vld [vmem:[#allocation5 + $0xe40] ss:$16 sps:$4 sm:$0xff]  }
 0x11f   :  { %5045 = vmatpush2.bf16.msra.mxu0 %v7883_v22  ;;  %v7951_v22 = vld [vmem:[#allocation5 + $0xc24] ss:$16 sps:$4 sm:$0xff]  }
 0x120   :  { %5088 = vmatpush2.bf16.msra.mxu1 %v7886_v23  ;;  %5046 = vmatprep.subr.bf16.mxu0 %v7891_v24  ;;  %v7954_v23 = vld [vmem:[#allocation5 + $0xe24] ss:$16 sps:$4 sm:$0xff]   ;;  %v7949_v24 = vld [vmem:[#allocation5 + $0xc20] ss:$16 sps:$4 sm:$0xff]  }
 0x121   :  { %5089 = vmatprep.subr.bf16.mxu1 %v7894_v25  ;;  %v7952_v25 = vld [vmem:[#allocation5 + $0xe20] ss:$16 sps:$4 sm:$0xff]  }
 0x123   :  { %5047 = vmatpush2.bf16.msra.mxu0 %v7889_v26  ;;  %v7957_v26 = vld [vmem:[#allocation5 + $0xc04] ss:$16 sps:$4 sm:$0xff]  }
 0x124   :  { %5090 = vmatpush2.bf16.msra.mxu1 %v7892_v27  ;;  %5048 = vmatprep.subr.bf16.mxu0 %v7897_v30  ;;  %v7960_v27 = vld [vmem:[#allocation5 + $0xe04] ss:$16 sps:$4 sm:$0xff]   ;;  %v7955_v30 = vld [vmem:[#allocation5 + $0xc00] ss:$16 sps:$4 sm:$0xff]  }
 0x125   :  { %5091 = vmatprep.subr.bf16.mxu1 %v7900_v31  ;;  %v7958_v31 = vld [vmem:[#allocation5 + $0xe00] ss:$16 sps:$4 sm:$0xff]  }
 0x127   :  { %5049 = vmatpush2.bf16.msra.mxu0 %v7895_v32  ;;  %v7963_v32 = vld [vmem:[#allocation5 + $0xde4] ss:$16 sps:$4 sm:$0xff]  }
 0x128   :  { %5092 = vmatpush2.bf16.msra.mxu1 %v7898_v33  ;;  %5050 = vmatprep.subr.bf16.mxu0 %v7903_v34  ;;  %v7966_v33 = vld [vmem:[#allocation5 + $0xfe4] ss:$16 sps:$4 sm:$0xff]   ;;  %v7961_v34 = vld [vmem:[#allocation5 + $0xde0] ss:$16 sps:$4 sm:$0xff]  }
 0x129   :  { %5093 = vmatprep.subr.bf16.mxu1 %v7906_v35  ;;  %v7964_v35 = vld [vmem:[#allocation5 + $0xfe0] ss:$16 sps:$4 sm:$0xff]  }
 0x12b   :  { %5051 = vmatpush2.bf16.msra.mxu0 %v7901_v36  ;;  %v7969_v36 = vld [vmem:[#allocation5 + $0xdc4] ss:$16 sps:$4 sm:$0xff]  }
 0x12c   :  { %5094 = vmatpush2.bf16.msra.mxu1 %v7904_v37  ;;  %5052 = vmatprep.subr.bf16.mxu0 %v7909_v38  ;;  %v7972_v37 = vld [vmem:[#allocation5 + $0xfc4] ss:$16 sps:$4 sm:$0xff]   ;;  %v7967_v38 = vld [vmem:[#allocation5 + $0xdc0] ss:$16 sps:$4 sm:$0xff]  }
 0x12d   :  { %5095 = vmatprep.subr.bf16.mxu1 %v7912_v39  ;;  %v7970_v39 = vld [vmem:[#allocation5 + $0xfc0] ss:$16 sps:$4 sm:$0xff]  }
 0x12f   :  { %5053 = vmatpush2.bf16.msra.mxu0 %v7907_v41  ;;  %v7975_v41 = vld [vmem:[#allocation5 + $0xda4] ss:$16 sps:$4 sm:$0xff]  }
 0x130   :  { %5096 = vmatpush2.bf16.msra.mxu1 %v7910_v42  ;;  %5108 = vmatprep.subr.bf16.mxu0 %v7915_v50  ;;  %v7978_v42 = vld [vmem:[#allocation5 + $0xfa4] ss:$16 sps:$4 sm:$0xff]   ;;  %v7979_v50 = vld [vmem:[#allocation5 + $0xd80] ss:$16 sps:$4 sm:$0xff]  }
 0x131   :  { %5151 = vmatprep.subr.bf16.mxu1 %v7918_v51  ;;  %v7982_v51 = vld [vmem:[#allocation5 + $0xf80] ss:$16 sps:$4 sm:$0xff]  }
 0x132   :  { %5055 = vmatmul.mubr.bf16.vlgmr.msra.gmra.mxu0 %v9240_v58 }
 0x133   :  { %5098 = vmatmul.mubr.bf16.vlgmr.msra.gmra.mxu1 %v9242_v59  ;;  %5109 = vmatpush1.bf16.msra.mxu0 %v7913_v55  ;;  %v7990_v55 = vld [vmem:[#allocation5 + $0xf64] ss:$16 sps:$4 sm:$0xff]  }
 0x134   :  { %5152 = vmatpush1.bf16.msra.mxu1 %v7916_v61  ;;  %5110 = vmatprep.subr.bf16.mxu0 %v7921_v62  ;;  %v7996_v61 = vld [vmem:[#allocation5 + $0xf44] ss:$16 sps:$4 sm:$0xff]   ;;  %v7991_v62 = vld [vmem:[#allocation5 + $0xd40] ss:$16 sps:$4 sm:$0xff]  }
 0x135   :  { %5153 = vmatprep.subr.bf16.mxu1 %v7924_v63  ;;  %5140 = vmatprep.mubr.bf16.mxu0 %v9244_v0  ;;  %v7994_v63 = vld [vmem:[#allocation5 + $0xf40] ss:$16 sps:$4 sm:$0xff]  }
 0x136   :  { %5183 = vmatprep.mubr.bf16.mxu1 %v9246_v1 }
 0x137   :  { %5111 = vmatpush1.bf16.msra.mxu0 %v7919_v2  ;;  %v990_v2 = vlaneseq }
 0x138   :  { %5154 = vmatpush1.bf16.msra.mxu1 %v7922_v3  ;;  %5112 = vmatprep.subr.bf16.mxu0 %v7927_v4  ;;  %v7999_v3 = vld [vmem:[#allocation5 + $0xd24] ss:$16 sps:$4 sm:$0xff]  }
 0x139   :  { %5155 = vmatprep.subr.bf16.mxu1 %v7930_v5  ;;  %v8002_v4 = vld [vmem:[#allocation5 + $0xf24] ss:$16 sps:$4 sm:$0xff]   ;;  %v7997_v5 = vld [vmem:[#allocation5 + $0xd20] ss:$16 sps:$4 sm:$0xff]  }
 0x13b   :  { %5113 = vmatpush1.bf16.msra.mxu0 %v7925_v6  ;;  %v8000_v6 = vld [vmem:[#allocation5 + $0xf20] ss:$16 sps:$4 sm:$0xff]  }
 0x13c   :  { %5156 = vmatpush1.bf16.msra.mxu1 %v7928_v7  ;;  %5114 = vmatprep.subr.bf16.mxu0 %v7933_v8  ;;  %v9252_v7 = vshrl.u32 %v990_v2, 7  ;;  %v8005_v8 = vld [vmem:[#allocation5 + $0xd04] ss:$16 sps:$4 sm:$0xff]   ;;  %v8030_v2 = vld [vmem:[#allocation5 + $0x1280] ss:$16 sps:$4 sm:$0xff]  }
 0x13d   :  { %5157 = vmatprep.subr.bf16.mxu1 %v7936_v9  ;;  %v8008_v9 = vld [vmem:[#allocation5 + $0xf04] ss:$16 sps:$4 sm:$0xff]  }
 0x13f   :  { %5115 = vmatpush1.bf16.msra.mxu0 %v7931_v10  ;;  %v8003_v10 = vld [vmem:[#allocation5 + $0xd00] ss:$16 sps:$4 sm:$0xff]  }
 0x140   :  { %5158 = vmatpush1.bf16.msra.mxu1 %v7934_v11  ;;  %5116 = vmatprep.subr.bf16.mxu0 %v7939_v14  ;;  %v8006_v11 = vld [vmem:[#allocation5 + $0xf00] ss:$16 sps:$4 sm:$0xff]  }
 0x141   :  { %5159 = vmatprep.subr.bf16.mxu1 %v7942_v15  ;;  %v160_v14 = vld [vmem:[#allocation2 + $0x60] sm:$0xff] }
 0x142   :  { %v184_v15 = vld [vmem:[#allocation2 + $0x120] sm:$0xff] }
 0x143   :  { %5117 = vmatpush1.bf16.msra.mxu0 %v7937_v16  ;;  %v162_v16 = vld [vmem:[#allocation2 + $0x70] sm:$0xff] }
 0x144   :  { %5160 = vmatpush1.bf16.msra.mxu1 %v7940_v17  ;;  %5118 = vmatprep.subr.bf16.mxu0 %v7945_v18  ;;  %v988_v17 = vld [vmem:[#allocation7] sm:$0xf]  ;;  %v186_v18 = vld [vmem:[#allocation2 + $0x130] sm:$0xff] }
 0x145   :  { %5161 = vmatprep.subr.bf16.mxu1 %v7948_v19  ;;  %v992_v19 = vsub.s32 0, %v9252_v7 }
 0x147   :  { %5119 = vmatpush1.bf16.msra.mxu0 %v7943_v20  ;;  %v8011_v20 = vld [vmem:[#allocation5 + $0x10e4] ss:$16 sps:$4 sm:$0xff]  }
 0x148   :  { %5162 = vmatpush1.bf16.msra.mxu1 %v7946_v21  ;;  %5120 = vmatprep.subr.bf16.mxu0 %v7951_v22  ;;  %v8014_v21 = vld [vmem:[#allocation5 + $0x12e4] ss:$16 sps:$4 sm:$0xff]   ;;  %v165_v22 = vld [vmem:[#allocation2 + $0x88] sm:$0xff] }
 0x149   :  { %5163 = vmatprep.subr.bf16.mxu1 %v7954_v23  ;;  %v8009_v23 = vld [vmem:[#allocation5 + $0x10e0] ss:$16 sps:$4 sm:$0xff]  }
 0x14b   :  { %5121 = vmatpush1.bf16.msra.mxu0 %v7949_v24  ;;  %v189_v24 = vld [vmem:[#allocation2 + $0x148] sm:$0xff] }
 0x14c   :  { %5164 = vmatpush1.bf16.msra.mxu1 %v7952_v25  ;;  %5122 = vmatprep.subr.bf16.mxu0 %v7957_v26  ;;  %v167_v25 = vld [vmem:[#allocation2 + $0x98] sm:$0xff]  ;;  %v9255_v26 = vpack.c.bf16 %v184_v15, %v160_v14  ;;  %v8047_v14 = vld [vmem:[#allocation5 + $0x1024] ss:$16 sps:$4 sm:$0xff]  }
 0x14d   :  { %5165 = vmatprep.subr.bf16.mxu1 %v7960_v27  ;;  %v9257_v27 = vpack.c.bf16 %v186_v18, %v162_v16  ;;  %v8050_v15 = vld [vmem:[#allocation5 + $0x1224] ss:$16 sps:$4 sm:$0xff]   ;;  %v8045_v16 = vld [vmem:[#allocation5 + $0x1020] ss:$16 sps:$4 sm:$0xff]  }
 0x14e   :  { %v8053_v18 = vld [vmem:[#allocation5 + $0x1004] ss:$16 sps:$4 sm:$0xff]  }
 0x14f   :  { %5123 = vmatpush1.bf16.msra.mxu0 %v7955_v30  ;;  %v191_v30 = vld [vmem:[#allocation2 + $0x158] sm:$0xff] }
 0x150   :  { %5166 = vmatpush1.bf16.msra.mxu1 %v7958_v31  ;;  %5124 = vmatprep.subr.bf16.mxu0 %v7963_v32  ;;  %v993_v31 = vrot.slane %v988_v17, %v992_v19  ;;  %v8012_v32 = vld [vmem:[#allocation5 + $0x12e0] ss:$16 sps:$4 sm:$0xff]  }
 0x151   :  { %5167 = vmatprep.subr.bf16.mxu1 %v7966_v33  ;;  %v8017_v33 = vld [vmem:[#allocation5 + $0x10c4] ss:$16 sps:$4 sm:$0xff]   ;;  %v8048_v17 = vld [vmem:[#allocation5 + $0x1220] ss:$16 sps:$4 sm:$0xff]  }
 0x153   :  { %5125 = vmatpush2.bf16.msra.mxu0 %v7961_v34  ;;  %v8020_v34 = vld [vmem:[#allocation5 + $0x12c4] ss:$16 sps:$4 sm:$0xff]  }
 0x154   :  { %5168 = vmatpush2.bf16.msra.mxu1 %v7964_v35  ;;  %5126 = vmatprep.subr.bf16.mxu0 %v7969_v36  ;;  %v9261_v35 = vpack.c.bf16 %v189_v24, %v165_v22  ;;  %v9263_v36 = vpack.c.bf16 %v191_v30, %v167_v25  ;;  %v8054_v22 = vld [vmem:[#allocation5 + $0x1200] ss:$16 sps:$4 sm:$0xff]   ;;  %v8062_v24 = vld [vmem:[#allocation5 + $0x13e4] ss:$16 sps:$4 sm:$0xff]  }
 0x155   :  { %5169 = vmatprep.subr.bf16.mxu1 %v7972_v37  ;;  %v8057_v25 = vld [vmem:[#allocation5 + $0x11e0] ss:$16 sps:$4 sm:$0xff]  }
 0x156   :  { %v8060_v30 = vld [vmem:[#allocation5 + $0x13e0] ss:$16 sps:$4 sm:$0xff]  }
 0x157   :  { %5127 = vmatpush2.bf16.msra.mxu0 %v7967_v38 }
 0x158   :  { %5170 = vmatpush2.bf16.msra.mxu1 %v7970_v39  ;;  %5128 = vmatprep.subr.bf16.mxu0 %v7975_v41  ;;  %v8015_v39 = vld [vmem:[#allocation5 + $0x10c0] ss:$16 sps:$4 sm:$0xff]  }
 0x159   :  { %5171 = vmatprep.subr.bf16.mxu1 %v7978_v42  ;;  %v8018_v42 = vld [vmem:[#allocation5 + $0x12c0] ss:$16 sps:$4 sm:$0xff]  }
 0x15b   :  { %5129 = vmatpush2.bf16.msra.mxu0 %v7973_v43 }
 0x15c   :  { %5172 = vmatpush2.bf16.msra.mxu1 %v7976_v44  ;;  %5130 = vmatprep.subr.bf16.mxu0 %v7981_v48  ;;  %v8023_v48 = vld [vmem:[#allocation5 + $0x10a4] ss:$16 sps:$4 sm:$0xff]  }
 0x15d   :  { %5173 = vmatprep.subr.bf16.mxu1 %v7984_v49  ;;  %v8026_v49 = vld [vmem:[#allocation5 + $0x12a4] ss:$16 sps:$4 sm:$0xff]  }
 0x15f   :  { %5131 = vmatpush2.bf16.msra.mxu0 %v7979_v50 }
 0x160   :  { %5174 = vmatpush2.bf16.msra.mxu1 %v7982_v51  ;;  %5132 = vmatprep.subr.bf16.mxu0 %v7987_v52  ;;  %v8021_v52 = vld [vmem:[#allocation5 + $0x10a0] ss:$16 sps:$4 sm:$0xff]  }
 0x161   :  { %5175 = vmatprep.subr.bf16.mxu1 %v7990_v55 }
 0x163   :  { %5133 = vmatpush2.bf16.msra.mxu0 %v7985_v56  ;;  %v8024_v56 = vld [vmem:[#allocation5 + $0x12a0] ss:$16 sps:$4 sm:$0xff]  }
 0x164   :  { %5176 = vmatpush2.bf16.msra.mxu1 %v7988_v57  ;;  %5134 = vmatprep.subr.bf16.mxu0 %v7993_v60  ;;  %v8029_v60 = vld [vmem:[#allocation5 + $0x1084] ss:$16 sps:$4 sm:$0xff]  }
 0x165   :  { %5177 = vmatprep.subr.bf16.mxu1 %v7996_v61  ;;  %v8032_v61 = vld [vmem:[#allocation5 + $0x1284] ss:$16 sps:$4 sm:$0xff]  }
 0x167   :  { %5135 = vmatpush2.bf16.msra.mxu0 %v7991_v62 }
 0x168   :  { %5178 = vmatpush2.bf16.msra.mxu1 %v7994_v63  ;;  %5136 = vmatprep.subr.bf16.mxu0 %v7999_v3  ;;  %v8027_v63 = vld [vmem:[#allocation5 + $0x1080] ss:$16 sps:$4 sm:$0xff]   ;;  %v8035_v3 = vld [vmem:[#allocation5 + $0x1064] ss:$16 sps:$4 sm:$0xff]  }
 0x169   :  { %5179 = vmatprep.subr.bf16.mxu1 %v8002_v4  ;;  %v8038_v4 = vld [vmem:[#allocation5 + $0x1264] ss:$16 sps:$4 sm:$0xff]  }
 0x16b   :  { %5137 = vmatpush2.bf16.msra.mxu0 %v7997_v5  ;;  %v8033_v5 = vld [vmem:[#allocation5 + $0x1060] ss:$16 sps:$4 sm:$0xff]  }
 0x16c   :  { %5180 = vmatpush2.bf16.msra.mxu1 %v8000_v6  ;;  %5138 = vmatprep.subr.bf16.mxu0 %v8005_v8  ;;  %v8036_v6 = vld [vmem:[#allocation5 + $0x1260] ss:$16 sps:$4 sm:$0xff]   ;;  %v8041_v8 = vld [vmem:[#allocation5 + $0x1044] ss:$16 sps:$4 sm:$0xff]  }
 0x16d   :  { %5181 = vmatprep.subr.bf16.mxu1 %v8008_v9  ;;  %v8044_v9 = vld [vmem:[#allocation5 + $0x1244] ss:$16 sps:$4 sm:$0xff]  }
 0x16f   :  { %5139 = vmatpush2.bf16.msra.mxu0 %v8003_v10  ;;  %v8039_v10 = vld [vmem:[#allocation5 + $0x1040] ss:$16 sps:$4 sm:$0xff]  }
 0x170   :  { %5182 = vmatpush2.bf16.msra.mxu1 %v8006_v11  ;;  %5194 = vmatprep.subr.bf16.mxu0 %v8011_v20  ;;  %v8042_v11 = vld [vmem:[#allocation5 + $0x1240] ss:$16 sps:$4 sm:$0xff]   ;;  %v8056_v20 = vld [vmem:[#allocation5 + $0x1204] ss:$16 sps:$4 sm:$0xff]  }
 0x171   :  { %5237 = vmatprep.subr.bf16.mxu1 %v8014_v21  ;;  %v8051_v21 = vld [vmem:[#allocation5 + $0x1000] ss:$16 sps:$4 sm:$0xff]  }
 0x172   :  { %v4884_v37 = vpop.f32.mrf.mxu0  ;;  %5141 = vmatmul.mubr.bf16.vlgmr.msra.gmra.mxu0 %v9255_v26 }
 0x173   :  { %v4927_v38 = vpop.f32.mrf.mxu1  ;;  %5184 = vmatmul.mubr.bf16.vlgmr.msra.gmra.mxu1 %v9257_v27  ;;  %v4885_v41 = vadd.f32 %v4884_v37, %v993_v31  ;;  %5195 = vmatpush1.bf16.msra.mxu0 %v8009_v23  ;;  %v8059_v23 = vld [vmem:[#allocation5 + $0x11e4] ss:$16 sps:$4 sm:$0xff]  }
 0x174   :  { %5238 = vmatpush1.bf16.msra.mxu1 %v8012_v32  ;;  %v9267_v43 = vpop.f32.mrf.mxu0  ;;  %5196 = vmatprep.subr.bf16.mxu0 %v8017_v33  ;;  %v8068_v32 = vld [vmem:[#allocation5 + $0x13c4] ss:$16 sps:$4 sm:$0xff]   ;;  %v8063_v33 = vld [vmem:[#allocation5 + $0x11c0] ss:$16 sps:$4 sm:$0xff]  }
 0x175   :  { %v9269_v44 = vpop.f32.mrf.mxu1  ;;  %5239 = vmatprep.subr.bf16.mxu1 %v8020_v34  ;;  %v9271_v50 = vadd.f32 %v4927_v38, %v4885_v41  ;;  %5226 = vmatprep.mubr.bf16.mxu0 %v9261_v35  ;;  %v8066_v34 = vld [vmem:[#allocation5 + $0x13c0] ss:$16 sps:$4 sm:$0xff]   ;;  %v8071_v37 = vld [vmem:[#allocation5 + $0x11a4] ss:$16 sps:$4 sm:$0xff]  }
 0x176   :  { %5269 = vmatprep.mubr.bf16.mxu1 %v9263_v36  ;;  %v4888_v51 = vpop.f32.mrf.mxu0  ;;  %v8074_v38 = vld [vmem:[#allocation5 + $0x13a4] ss:$16 sps:$4 sm:$0xff]   ;;  %v8072_v41 = vld [vmem:[#allocation5 + $0x13a0] ss:$16 sps:$4 sm:$0xff]  }
 0x177   :  { %v4889_v55 = vadd.f32 %v4888_v51, %v993_v31  ;;  %5197 = vmatpush1.bf16.msra.mxu0 %v8015_v39  ;;  %v4931_v57 = vpop.f32.mrf.mxu1  ;;  %v8065_v31 = vld [vmem:[#allocation5 + $0x11c4] ss:$16 sps:$4 sm:$0xff]   ;;  %v8069_v39 = vld [vmem:[#allocation5 + $0x11a0] ss:$16 sps:$4 sm:$0xff]  }
 0x178   :  { %5240 = vmatpush1.bf16.msra.mxu1 %v8018_v42  ;;  %5198 = vmatprep.subr.bf16.mxu0 %v8023_v48  ;;  %v8077_v42 = vld [vmem:[#allocation5 + $0x1184] ss:$16 sps:$4 sm:$0xff]   ;;  %v8078_v51 = vld [vmem:[#allocation5 + $0x1380] ss:$16 sps:$4 sm:$0xff]  }
 0x179   :  { %5241 = vmatprep.subr.bf16.mxu1 %v8026_v49  ;;  %v9275_v62 = vadd.f32 %v4931_v57, %v4889_v55  ;;  %v8080_v48 = vld [vmem:[#allocation5 + $0x1384] ss:$16 sps:$4 sm:$0xff]   ;;  %v8075_v49 = vld [vmem:[#allocation5 + $0x1180] ss:$16 sps:$4 sm:$0xff]  }
 0x17a   :  { %v8086_v55 = vld [vmem:[#allocation5 + $0x1364] ss:$16 sps:$4 sm:$0xff]   ;;  %v8084_v57 = vld [vmem:[#allocation5 + $0x1360] ss:$16 sps:$4 sm:$0xff]  }
 0x17b   :  { %5199 = vmatpush1.bf16.msra.mxu0 %v8021_v52  ;;  %v8083_v52 = vld [vmem:[#allocation5 + $0x1164] ss:$16 sps:$4 sm:$0xff]  }
 0x17c   :  { %5242 = vmatpush1.bf16.msra.mxu1 %v8024_v56  ;;  %5200 = vmatprep.subr.bf16.mxu0 %v8029_v60  ;;  %v8081_v56 = vld [vmem:[#allocation5 + $0x1160] ss:$16 sps:$4 sm:$0xff]   ;;  %v8089_v60 = vld [vmem:[#allocation5 + $0x1144] ss:$16 sps:$4 sm:$0xff]  }
 0x17d   :  { %5243 = vmatprep.subr.bf16.mxu1 %v8032_v61  ;;  %v8092_v61 = vld [vmem:[#allocation5 + $0x1344] ss:$16 sps:$4 sm:$0xff]  }
 0x17f   :  { %5201 = vmatpush1.bf16.msra.mxu0 %v8027_v63  ;;  %v8087_v63 = vld [vmem:[#allocation5 + $0x1140] ss:$16 sps:$4 sm:$0xff]  }
 0x180   :  { %5244 = vmatpush1.bf16.msra.mxu1 %v8030_v2  ;;  %5202 = vmatprep.subr.bf16.mxu0 %v8035_v3  ;;  %v8090_v2 = vld [vmem:[#allocation5 + $0x1340] ss:$16 sps:$4 sm:$0xff]   ;;  %v8095_v3 = vld [vmem:[#allocation5 + $0x1124] ss:$16 sps:$4 sm:$0xff]  }
 0x181   :  { %5245 = vmatprep.subr.bf16.mxu1 %v8038_v4  ;;  %v8098_v4 = vld [vmem:[#allocation5 + $0x1324] ss:$16 sps:$4 sm:$0xff]  }
 0x183   :  { %5203 = vmatpush1.bf16.msra.mxu0 %v8033_v5  ;;  %v8093_v5 = vld [vmem:[#allocation5 + $0x1120] ss:$16 sps:$4 sm:$0xff]  }
 0x184   :  { %5246 = vmatpush1.bf16.msra.mxu1 %v8036_v6  ;;  %5204 = vmatprep.subr.bf16.mxu0 %v8041_v8  ;;  %v8096_v6 = vld [vmem:[#allocation5 + $0x1320] ss:$16 sps:$4 sm:$0xff]   ;;  %v8101_v8 = vld [vmem:[#allocation5 + $0x1104] ss:$16 sps:$4 sm:$0xff]  }
 0x185   :  { %5247 = vmatprep.subr.bf16.mxu1 %v8044_v9  ;;  %v8104_v9 = vld [vmem:[#allocation5 + $0x1304] ss:$16 sps:$4 sm:$0xff]  }
 0x187   :  { %5205 = vmatpush1.bf16.msra.mxu0 %v8039_v10  ;;  %v8099_v10 = vld [vmem:[#allocation5 + $0x1100] ss:$16 sps:$4 sm:$0xff]  }
 0x188   :  { %5248 = vmatpush1.bf16.msra.mxu1 %v8042_v11  ;;  %5206 = vmatprep.subr.bf16.mxu0 %v8047_v14  ;;  %v8102_v11 = vld [vmem:[#allocation5 + $0x1300] ss:$16 sps:$4 sm:$0xff]  }
 0x189   :  { %5249 = vmatprep.subr.bf16.mxu1 %v8050_v15  ;;  %v164_v14 = vld [vmem:[#allocation2 + $0x80] sm:$0xff] }
 0x18a   :  { %v188_v15 = vld [vmem:[#allocation2 + $0x140] sm:$0xff] }
 0x18b   :  { %5207 = vmatpush1.bf16.msra.mxu0 %v8045_v16  ;;  %v166_v16 = vld [vmem:[#allocation2 + $0x90] sm:$0xff] }
 0x18c   :  { %5250 = vmatpush1.bf16.msra.mxu1 %v8048_v17  ;;  %5208 = vmatprep.subr.bf16.mxu0 %v8053_v18  ;;  %v190_v17 = vld [vmem:[#allocation2 + $0x150] sm:$0xff] }
 0x18d   :  { %5251 = vmatprep.subr.bf16.mxu1 %v8056_v20  ;;  %v8107_v18 = vld [vmem:[#allocation5 + $0x14e4] ss:$16 sps:$4 sm:$0xff]  }
 0x18e   :  { %v8110_v20 = vld [vmem:[#allocation5 + $0x16e4] ss:$16 sps:$4 sm:$0xff]  }
 0x18f   :  { %5209 = vmatpush1.bf16.msra.mxu0 %v8051_v21  ;;  %v169_v21 = vld [vmem:[#allocation2 + $0xa8] sm:$0xff] }
 0x190   :  { %5252 = vmatpush1.bf16.msra.mxu1 %v8054_v22  ;;  %5210 = vmatprep.subr.bf16.mxu0 %v8059_v23  ;;  %v193_v22 = vld [vmem:[#allocation2 + $0x168] sm:$0xff]  ;;  %v171_v23 = vld [vmem:[#allocation2 + $0xb8] sm:$0xff] }
 0x191   :  { %5253 = vmatprep.subr.bf16.mxu1 %v8062_v24  ;;  %v195_v24 = vld [vmem:[#allocation2 + $0x178] sm:$0xff] }
 0x193   :  { %5211 = vmatpush2.bf16.msra.mxu0 %v8057_v25  ;;  %v8105_v25 = vld [vmem:[#allocation5 + $0x14e0] ss:$16 sps:$4 sm:$0xff]  }
 0x194   :  { %5254 = vmatpush2.bf16.msra.mxu1 %v8060_v30  ;;  %5212 = vmatprep.subr.bf16.mxu0 %v8065_v31  ;;  %v8108_v30 = vld [vmem:[#allocation5 + $0x16e0] ss:$16 sps:$4 sm:$0xff]   ;;  %v9277_v31 = vpack.c.bf16 %v188_v15, %v164_v14  ;;  %v8134_v14 = vld [vmem:[#allocation5 + $0x1664] ss:$16 sps:$4 sm:$0xff]  }
 0x195   :  { %5255 = vmatprep.subr.bf16.mxu1 %v8068_v32  ;;  %v9279_v32 = vpack.c.bf16 %v190_v17, %v166_v16  ;;  %v8132_v15 = vld [vmem:[#allocation5 + $0x1660] ss:$16 sps:$4 sm:$0xff]   ;;  %v8137_v16 = vld [vmem:[#allocation5 + $0x1444] ss:$16 sps:$4 sm:$0xff]  }
 0x196   :  { %v8140_v17 = vld [vmem:[#allocation5 + $0x1644] ss:$16 sps:$4 sm:$0xff]  }
 0x197   :  { %5213 = vmatpush2.bf16.msra.mxu0 %v8063_v33  ;;  %v9281_v33 = vpop.f32.mrf.mxu0 }
 0x198   :  { %5256 = vmatpush2.bf16.msra.mxu1 %v8066_v34  ;;  %5214 = vmatprep.subr.bf16.mxu0 %v8071_v37  ;;  %v9283_v34 = vpop.f32.mrf.mxu1  ;;  %v8113_v37 = vld [vmem:[#allocation5 + $0x14c4] ss:$16 sps:$4 sm:$0xff]  }
 0x199   :  { %5257 = vmatprep.subr.bf16.mxu1 %v8074_v38  ;;  %v8116_v38 = vld [vmem:[#allocation5 + $0x16c4] ss:$16 sps:$4 sm:$0xff]  }
 0x19b   :  { %5215 = vmatpush2.bf16.msra.mxu0 %v8069_v39  ;;  %v8111_v39 = vld [vmem:[#allocation5 + $0x14c0] ss:$16 sps:$4 sm:$0xff]  }
 0x19c   :  { %5258 = vmatpush2.bf16.msra.mxu1 %v8072_v41  ;;  %5216 = vmatprep.subr.bf16.mxu0 %v8077_v42  ;;  %v8114_v41 = vld [vmem:[#allocation5 + $0x16c0] ss:$16 sps:$4 sm:$0xff]   ;;  %v9285_v42 = vpack.c.bf16 %v193_v22, %v169_v21  ;;  %v8143_v21 = vld [vmem:[#allocation5 + $0x1424] ss:$16 sps:$4 sm:$0xff]  }
 0x19d   :  { %5259 = vmatprep.subr.bf16.mxu1 %v8080_v48  ;;  %v9287_v48 = vpack.c.bf16 %v195_v24, %v171_v23  ;;  %v8146_v22 = vld [vmem:[#allocation5 + $0x1624] ss:$16 sps:$4 sm:$0xff]   ;;  %v8141_v23 = vld [vmem:[#allocation5 + $0x1420] ss:$16 sps:$4 sm:$0xff]  }
 0x19e   :  { %v8144_v24 = vld [vmem:[#allocation5 + $0x1620] ss:$16 sps:$4 sm:$0xff]  }
 0x19f   :  { %5217 = vmatpush2.bf16.msra.mxu0 %v8075_v49 }
 0x1a0   :  { %5260 = vmatpush2.bf16.msra.mxu1 %v8078_v51  ;;  %5218 = vmatprep.subr.bf16.mxu0 %v8083_v52 }
 0x1a1   :  { %5261 = vmatprep.subr.bf16.mxu1 %v8086_v55 }
 0x1a3   :  { %5219 = vmatpush2.bf16.msra.mxu0 %v8081_v56 }
 0x1a4   :  { %5262 = vmatpush2.bf16.msra.mxu1 %v8084_v57  ;;  %5220 = vmatprep.subr.bf16.mxu0 %v8089_v60  ;;  %v8119_v57 = vld [vmem:[#allocation5 + $0x14a4] ss:$16 sps:$4 sm:$0xff]  }
 0x1a5   :  { %5263 = vmatprep.subr.bf16.mxu1 %v8092_v61  ;;  %v8122_v60 = vld [vmem:[#allocation5 + $0x16a4] ss:$16 sps:$4 sm:$0xff]  }
 0x1a7   :  { %5221 = vmatpush2.bf16.msra.mxu0 %v8087_v63  ;;  %v8117_v63 = vld [vmem:[#allocation5 + $0x14a0] ss:$16 sps:$4 sm:$0xff]  }
 0x1a8   :  { %5264 = vmatpush2.bf16.msra.mxu1 %v8090_v2  ;;  %5222 = vmatprep.subr.bf16.mxu0 %v8095_v3  ;;  %v8120_v2 = vld [vmem:[#allocation5 + $0x16a0] ss:$16 sps:$4 sm:$0xff]  }
 0x1a9   :  { %5265 = vmatprep.subr.bf16.mxu1 %v8098_v4 }
 0x1ab   :  { %5223 = vmatpush2.bf16.msra.mxu0 %v8093_v5  ;;  %v8125_v5 = vld [vmem:[#allocation5 + $0x1484] ss:$16 sps:$4 sm:$0xff]  }
 0x1ac   :  { %5266 = vmatpush2.bf16.msra.mxu1 %v8096_v6  ;;  %5224 = vmatprep.subr.bf16.mxu0 %v8101_v8  ;;  %v8128_v6 = vld [vmem:[#allocation5 + $0x1684] ss:$16 sps:$4 sm:$0xff]  }
 0x1ad   :  { %5267 = vmatprep.subr.bf16.mxu1 %v8104_v9  ;;  %v8123_v9 = vld [vmem:[#allocation5 + $0x1480] ss:$16 sps:$4 sm:$0xff]  }
 0x1af   :  { %5225 = vmatpush2.bf16.msra.mxu0 %v8099_v10  ;;  %v8126_v10 = vld [vmem:[#allocation5 + $0x1680] ss:$16 sps:$4 sm:$0xff]  }
 0x1b0   :  { %5268 = vmatpush2.bf16.msra.mxu1 %v8102_v11  ;;  %5280 = vmatprep.subr.bf16.mxu0 %v8107_v18  ;;  %v8131_v11 = vld [vmem:[#allocation5 + $0x1464] ss:$16 sps:$4 sm:$0xff]   ;;  %v8135_v18 = vld [vmem:[#allocation5 + $0x1440] ss:$16 sps:$4 sm:$0xff]  }
 0x1b1   :  { %5323 = vmatprep.subr.bf16.mxu1 %v8110_v20  ;;  %v8138_v20 = vld [vmem:[#allocation5 + $0x1640] ss:$16 sps:$4 sm:$0xff]  }
 0x1b2   :  { %v4970_v49 = vpop.f32.mrf.mxu0  ;;  %5227 = vmatmul.mubr.bf16.vlgmr.msra.gmra.mxu0 %v9277_v31 }
 0x1b3   :  { %v5013_v51 = vpop.f32.mrf.mxu1  ;;  %5270 = vmatmul.mubr.bf16.vlgmr.msra.gmra.mxu1 %v9279_v32  ;;  %v4971_v52 = vadd.f32 %v4970_v49, %v9271_v50  ;;  %5281 = vmatpush1.bf16.msra.mxu0 %v8105_v25  ;;  %v8149_v25 = vld [vmem:[#allocation5 + $0x1404] ss:$16 sps:$4 sm:$0xff]   ;;  %v8153_v49 = vld [vmem:[#allocation5 + $0x15e0] ss:$16 sps:$4 sm:$0xff]  }
 0x1b4   :  { %5324 = vmatpush1.bf16.msra.mxu1 %v8108_v30  ;;  %v9292_v55 = vpop.f32.mrf.mxu0  ;;  %5282 = vmatprep.subr.bf16.mxu0 %v8113_v37  ;;  %v8152_v30 = vld [vmem:[#allocation5 + $0x1604] ss:$16 sps:$4 sm:$0xff]   ;;  %v8147_v37 = vld [vmem:[#allocation5 + $0x1400] ss:$16 sps:$4 sm:$0xff]  }
 0x1b5   :  { %v9294_v56 = vpop.f32.mrf.mxu1  ;;  %5325 = vmatprep.subr.bf16.mxu1 %v8116_v38  ;;  %v9296_v61 = vadd.f32 %v5013_v51, %v4971_v52  ;;  %5312 = vmatprep.mubr.bf16.mxu0 %v9285_v42  ;;  %v8150_v38 = vld [vmem:[#allocation5 + $0x1600] ss:$16 sps:$4 sm:$0xff]   ;;  %v8161_v52 = vld [vmem:[#allocation5 + $0x15c4] ss:$16 sps:$4 sm:$0xff]  }
 0x1b6   :  { %5355 = vmatprep.mubr.bf16.mxu1 %v9287_v48  ;;  %v4974_v3 = vpop.f32.mrf.mxu0  ;;  %v8156_v51 = vld [vmem:[#allocation5 + $0x17e0] ss:$16 sps:$4 sm:$0xff]  }
 0x1b7   :  { %v4975_v50 = vadd.f32 %v4974_v3, %v9275_v62  ;;  %5283 = vmatpush1.bf16.msra.mxu0 %v8111_v39  ;;  %v5017_v4 = vpop.f32.mrf.mxu1  ;;  %v8129_v62 = vld [vmem:[#allocation5 + $0x1460] ss:$16 sps:$4 sm:$0xff]   ;;  %v8155_v39 = vld [vmem:[#allocation5 + $0x15e4] ss:$16 sps:$4 sm:$0xff]  }
 0x1b8   :  { %5326 = vmatpush1.bf16.msra.mxu1 %v8114_v41  ;;  %5284 = vmatprep.subr.bf16.mxu0 %v8119_v57  ;;  %v8158_v41 = vld [vmem:[#allocation5 + $0x17e4] ss:$16 sps:$4 sm:$0xff]  }
 0x1b9   :  { %5327 = vmatprep.subr.bf16.mxu1 %v8122_v60  ;;  %v9301_v8 = vadd.f32 %v5017_v4, %v4975_v50  ;;  %v8164_v57 = vld [vmem:[#allocation5 + $0x17c4] ss:$16 sps:$4 sm:$0xff]   ;;  %v8159_v60 = vld [vmem:[#allocation5 + $0x15c0] ss:$16 sps:$4 sm:$0xff]  }
 0x1ba   :  { %v8170_v3 = vld [vmem:[#allocation5 + $0x17a4] ss:$16 sps:$4 sm:$0xff]   ;;  %v8165_v50 = vld [vmem:[#allocation5 + $0x15a0] ss:$16 sps:$4 sm:$0xff]  }
 0x1bb   :  { %5285 = vmatpush1.bf16.msra.mxu0 %v8117_v63  ;;  %v8162_v63 = vld [vmem:[#allocation5 + $0x17c0] ss:$16 sps:$4 sm:$0xff]  }
 0x1bc   :  { %5328 = vmatpush1.bf16.msra.mxu1 %v8120_v2  ;;  %5286 = vmatprep.subr.bf16.mxu0 %v8125_v5  ;;  %v8167_v2 = vld [vmem:[#allocation5 + $0x15a4] ss:$16 sps:$4 sm:$0xff]   ;;  %v8168_v4 = vld [vmem:[#allocation5 + $0x17a0] ss:$16 sps:$4 sm:$0xff]  }
 0x1bd   :  { %5329 = vmatprep.subr.bf16.mxu1 %v8128_v6  ;;  %v8173_v5 = vld [vmem:[#allocation5 + $0x1584] ss:$16 sps:$4 sm:$0xff]  }
 0x1be   :  { %v8176_v6 = vld [vmem:[#allocation5 + $0x1784] ss:$16 sps:$4 sm:$0xff]  }
 0x1bf   :  { %5287 = vmatpush1.bf16.msra.mxu0 %v8123_v9  ;;  %v8171_v9 = vld [vmem:[#allocation5 + $0x1580] ss:$16 sps:$4 sm:$0xff]  }
 0x1c0   :  { %5330 = vmatpush1.bf16.msra.mxu1 %v8126_v10  ;;  %5288 = vmatprep.subr.bf16.mxu0 %v8131_v11  ;;  %v8174_v10 = vld [vmem:[#allocation5 + $0x1780] ss:$16 sps:$4 sm:$0xff]   ;;  %v8179_v11 = vld [vmem:[#allocation5 + $0x1564] ss:$16 sps:$4 sm:$0xff]  }
 0x1c1   :  { %5331 = vmatprep.subr.bf16.mxu1 %v8134_v14  ;;  %v8182_v14 = vld [vmem:[#allocation5 + $0x1764] ss:$16 sps:$4 sm:$0xff]  }
 0x1c3   :  { %5289 = vmatpush1.bf16.msra.mxu0 %v8129_v62  ;;  %v8177_v62 = vld [vmem:[#allocation5 + $0x1560] ss:$16 sps:$4 sm:$0xff]  }
 0x1c4   :  { %5332 = vmatpush1.bf16.msra.mxu1 %v8132_v15  ;;  %5290 = vmatprep.subr.bf16.mxu0 %v8137_v16  ;;  %v8180_v15 = vld [vmem:[#allocation5 + $0x1760] ss:$16 sps:$4 sm:$0xff]   ;;  %v8185_v16 = vld [vmem:[#allocation5 + $0x1544] ss:$16 sps:$4 sm:$0xff]  }
 0x1c5   :  { %5333 = vmatprep.subr.bf16.mxu1 %v8140_v17  ;;  %v8188_v17 = vld [vmem:[#allocation5 + $0x1744] ss:$16 sps:$4 sm:$0xff]  }
 0x1c7   :  { %5291 = vmatpush1.bf16.msra.mxu0 %v8135_v18  ;;  %v8183_v18 = vld [vmem:[#allocation5 + $0x1540] ss:$16 sps:$4 sm:$0xff]  }
 0x1c8   :  { %5334 = vmatpush1.bf16.msra.mxu1 %v8138_v20  ;;  %5292 = vmatprep.subr.bf16.mxu0 %v8143_v21  ;;  %v8186_v20 = vld [vmem:[#allocation5 + $0x1740] ss:$16 sps:$4 sm:$0xff]   ;;  %v8191_v21 = vld [vmem:[#allocation5 + $0x1524] ss:$16 sps:$4 sm:$0xff]  }
 0x1c9   :  { %5335 = vmatprep.subr.bf16.mxu1 %v8146_v22  ;;  %v8194_v22 = vld [vmem:[#allocation5 + $0x1724] ss:$16 sps:$4 sm:$0xff]  }
 0x1cb   :  { %5293 = vmatpush1.bf16.msra.mxu0 %v8141_v23  ;;  %v8189_v23 = vld [vmem:[#allocation5 + $0x1520] ss:$16 sps:$4 sm:$0xff]  }
 0x1cc   :  { %5336 = vmatpush1.bf16.msra.mxu1 %v8144_v24  ;;  %5294 = vmatprep.subr.bf16.mxu0 %v8149_v25  ;;  %v8192_v24 = vld [vmem:[#allocation5 + $0x1720] ss:$16 sps:$4 sm:$0xff]   ;;  %v8197_v25 = vld [vmem:[#allocation5 + $0x1504] ss:$16 sps:$4 sm:$0xff]  }
 0x1cd   :  { %5337 = vmatprep.subr.bf16.mxu1 %v8152_v30  ;;  %v8200_v30 = vld [vmem:[#allocation5 + $0x1704] ss:$16 sps:$4 sm:$0xff]  }
 0x1cf   :  { %5295 = vmatpush1.bf16.msra.mxu0 %v8147_v37  ;;  %v8195_v37 = vld [vmem:[#allocation5 + $0x1500] ss:$16 sps:$4 sm:$0xff]  }
 0x1d0   :  { %5338 = vmatpush1.bf16.msra.mxu1 %v8150_v38  ;;  %5296 = vmatprep.subr.bf16.mxu0 %v8155_v39  ;;  %v8198_v38 = vld [vmem:[#allocation5 + $0x1700] ss:$16 sps:$4 sm:$0xff]  }
 0x1d1   :  { %5339 = vmatprep.subr.bf16.mxu1 %v8158_v41  ;;  %v168_v39 = vld [vmem:[#allocation2 + $0xa0] sm:$0xff] }
 0x1d2   :  { %v192_v41 = vld [vmem:[#allocation2 + $0x160] sm:$0xff] }
 0x1d3   :  { %5297 = vmatpush2.bf16.msra.mxu0 %v8153_v49  ;;  %v170_v49 = vld [vmem:[#allocation2 + $0xb0] sm:$0xff] }
 0x1d4   :  { %5340 = vmatpush2.bf16.msra.mxu1 %v8156_v51  ;;  %5298 = vmatprep.subr.bf16.mxu0 %v8161_v52  ;;  %v194_v51 = vld [vmem:[#allocation2 + $0x170] sm:$0xff]  ;;  %v8203_v52 = vld [vmem:[#allocation5 + $0xec] ss:$16 sps:$4 sm:$0xff]  }
 0x1d5   :  { %5341 = vmatprep.subr.bf16.mxu1 %v8164_v57  ;;  %v8206_v57 = vld [vmem:[#allocation5 + $0x2ec] ss:$16 sps:$4 sm:$0xff]  }
 0x1d7   :  { %5299 = vmatpush2.bf16.msra.mxu0 %v8159_v60  ;;  %v8201_v60 = vld [vmem:[#allocation5 + $0xe8] ss:$16 sps:$4 sm:$0xff]  }
 0x1d8   :  { %5342 = vmatpush2.bf16.msra.mxu1 %v8162_v63  ;;  %5300 = vmatprep.subr.bf16.mxu0 %v8167_v2  ;;  %v8204_v63 = vld [vmem:[#allocation5 + $0x2e8] ss:$16 sps:$4 sm:$0xff]   ;;  %v9303_v2 = vpack.c.bf16 %v192_v41, %v168_v39 }
 0x1d9   :  { %5343 = vmatprep.subr.bf16.mxu1 %v8170_v3  ;;  %v9305_v3 = vpack.c.bf16 %v194_v51, %v170_v49  ;;  %v8222_v39 = vld [vmem:[#allocation5 + $0x288] ss:$16 sps:$4 sm:$0xff]   ;;  %v8233_v49 = vld [vmem:[#allocation5 + $0x4c] ss:$16 sps:$4 sm:$0xff]  }
 0x1da   :  { %v8228_v41 = vld [vmem:[#allocation5 + $0x268] ss:$16 sps:$4 sm:$0xff]   ;;  %v8236_v51 = vld [vmem:[#allocation5 + $0x24c] ss:$16 sps:$4 sm:$0xff]  }
 0x1db   :  { %5301 = vmatpush2.bf16.msra.mxu0 %v8165_v50  ;;  %v9307_v50 = vpop.f32.mrf.mxu0 }
 0x1dc   :  { %5344 = vmatpush2.bf16.msra.mxu1 %v8168_v4  ;;  %5302 = vmatprep.subr.bf16.mxu0 %v8173_v5  ;;  %v9309_v4 = vpop.f32.mrf.mxu1  ;;  %v8209_v5 = vld [vmem:[#allocation5 + $0xcc] ss:$16 sps:$4 sm:$0xff]  }
 0x1dd   :  { %5345 = vmatprep.subr.bf16.mxu1 %v8176_v6  ;;  %v8212_v6 = vld [vmem:[#allocation5 + $0x2cc] ss:$16 sps:$4 sm:$0xff]  }
 0x1df   :  { %5303 = vmatpush2.bf16.msra.mxu0 %v8171_v9  ;;  %v8207_v9 = vld [vmem:[#allocation5 + $0xc8] ss:$16 sps:$4 sm:$0xff]  }
 0x1e0   :  { %5346 = vmatpush2.bf16.msra.mxu1 %v8174_v10  ;;  %5304 = vmatprep.subr.bf16.mxu0 %v8179_v11  ;;  %v8210_v10 = vld [vmem:[#allocation5 + $0x2c8] ss:$16 sps:$4 sm:$0xff]  }
 0x1e1   :  { %5347 = vmatprep.subr.bf16.mxu1 %v8182_v14 }
 0x1e3   :  { %5305 = vmatpush2.bf16.msra.mxu0 %v8177_v62 }
 0x1e4   :  { %5348 = vmatpush2.bf16.msra.mxu1 %v8180_v15  ;;  %5306 = vmatprep.subr.bf16.mxu0 %v8185_v16 }
 0x1e5   :  { %5349 = vmatprep.subr.bf16.mxu1 %v8188_v17  ;;  %v8215_v17 = vld [vmem:[#allocation5 + $0xac] ss:$16 sps:$4 sm:$0xff]  }
 0x1e7   :  { %5307 = vmatpush2.bf16.msra.mxu0 %v8183_v18  ;;  %v8218_v18 = vld [vmem:[#allocation5 + $0x2ac] ss:$16 sps:$4 sm:$0xff]  }
 0x1e8   :  { %5350 = vmatpush2.bf16.msra.mxu1 %v8186_v20  ;;  %5308 = vmatprep.subr.bf16.mxu0 %v8191_v21  ;;  %v8213_v21 = vld [vmem:[#allocation5 + $0xa8] ss:$16 sps:$4 sm:$0xff]  }
 0x1e9   :  { %5351 = vmatprep.subr.bf16.mxu1 %v8194_v22  ;;  %v8216_v22 = vld [vmem:[#allocation5 + $0x2a8] ss:$16 sps:$4 sm:$0xff]  }
 0x1eb   :  { %5309 = vmatpush2.bf16.msra.mxu0 %v8189_v23 }
 0x1ec   :  { %5352 = vmatpush2.bf16.msra.mxu1 %v8192_v24  ;;  %5310 = vmatprep.subr.bf16.mxu0 %v8197_v25  ;;  %v8221_v25 = vld [vmem:[#allocation5 + $0x8c] ss:$16 sps:$4 sm:$0xff]  }
 0x1ed   :  { %5353 = vmatprep.subr.bf16.mxu1 %v8200_v30  ;;  %v8224_v30 = vld [vmem:[#allocation5 + $0x28c] ss:$16 sps:$4 sm:$0xff]  }
 0x1ef   :  { %5311 = vmatpush2.bf16.msra.mxu0 %v8195_v37 }
 0x1f0   :  { %5354 = vmatpush2.bf16.msra.mxu1 %v8198_v38  ;;  %5366 = vmatprep.subr.bf16.mxu0 %v8203_v52  ;;  %v8219_v38 = vld [vmem:[#allocation5 + $0x88] ss:$16 sps:$4 sm:$0xff]  }
 0x1f1   :  { %5409 = vmatprep.subr.bf16.mxu1 %v8206_v57  ;;  %v8231_v52 = vld [vmem:[#allocation5 + $0x48] ss:$16 sps:$4 sm:$0xff]  }
 0x1f2   :  { %v5056_v11 = vpop.f32.mrf.mxu0  ;;  %5313 = vmatmul.mubr.bf16.vlgmr.msra.gmra.mxu0 %v9303_v2  ;;  %v8234_v57 = vld [vmem:[#allocation5 + $0x248] ss:$16 sps:$4 sm:$0xff]  }
 0x1f3   :  { %v5099_v14 = vpop.f32.mrf.mxu1  ;;  %5356 = vmatmul.mubr.bf16.vlgmr.msra.gmra.mxu1 %v9305_v3  ;;  %v5057_v62 = vadd.f32 %v5056_v11, %v9296_v61  ;;  %5367 = vmatpush1.bf16.msra.mxu0 %v8201_v60  ;;  %v8239_v60 = vld [vmem:[#allocation5 + $0x2c] ss:$16 sps:$4 sm:$0xff]   ;;  %v8243_v11 = vld [vmem:[#allocation5 + $0x8] ss:$16 sps:$4 sm:$0xff]  }
 0x1f4   :  { %5410 = vmatpush1.bf16.msra.mxu1 %v8204_v63  ;;  %v9314_v15 = vpop.f32.mrf.mxu0  ;;  %5368 = vmatprep.subr.bf16.mxu0 %v8209_v5  ;;  %v8242_v63 = vld [vmem:[#allocation5 + $0x22c] ss:$16 sps:$4 sm:$0xff]   ;;  %v8237_v5 = vld [vmem:[#allocation5 + $0x28] ss:$16 sps:$4 sm:$0xff]  }
 0x1f5   :  { %v9316_v16 = vpop.f32.mrf.mxu1  ;;  %5411 = vmatprep.subr.bf16.mxu1 %v8212_v6  ;;  %v9318_v20 = vadd.f32 %v5099_v14, %v5057_v62  ;;  %5398 = vmatprep.mubr.bf16.mxu0 %v9210_v53  ;;  %v8227_v53 = vld [vmem:[#allocation5 + $0x6c] ss:$16 sps:$4 sm:$0xff]   ;;  %v8240_v6 = vld [vmem:[#allocation5 + $0x228] ss:$16 sps:$4 sm:$0xff]  }
 0x1f6   :  { %5441 = vmatprep.mubr.bf16.mxu1 %v9212_v54  ;;  %v5060_v23 = vpop.f32.mrf.mxu0  ;;  %v8230_v54 = vld [vmem:[#allocation5 + $0x26c] ss:$16 sps:$4 sm:$0xff]   ;;  %v8246_v14 = vld [vmem:[#allocation5 + $0x208] ss:$16 sps:$4 sm:$0xff]  }
 0x1f7   :  { %v5061_v61 = vadd.f32 %v5060_v23, %v9301_v8  ;;  %5369 = vmatpush1.bf16.msra.mxu0 %v8207_v9  ;;  %v5103_v24 = vpop.f32.mrf.mxu1  ;;  %v8225_v8 = vld [vmem:[#allocation5 + $0x68] ss:$16 sps:$4 sm:$0xff]   ;;  %v8245_v9 = vld [vmem:[#allocation5 + $0xc] ss:$16 sps:$4 sm:$0xff]  }
 0x1f8   :  { %5412 = vmatpush1.bf16.msra.mxu1 %v8210_v10  ;;  %5370 = vmatprep.subr.bf16.mxu0 %v8215_v17  ;;  %v8248_v10 = vld [vmem:[#allocation5 + $0x20c] ss:$16 sps:$4 sm:$0xff]  }
 0x1f9   :  { %5413 = vmatprep.subr.bf16.mxu1 %v8218_v18  ;;  %v9323_v37 = vadd.f32 %v5103_v24, %v5061_v61  ;;  %v8251_v62 = vld [vmem:[#allocation5 + $0x1ec] ss:$16 sps:$4 sm:$0xff]   ;;  %v8249_v18 = vld [vmem:[#allocation5 + $0x1e8] ss:$16 sps:$4 sm:$0xff]  }
 0x1fa   :  { %v8254_v17 = vld [vmem:[#allocation5 + $0x3ec] ss:$16 sps:$4 sm:$0xff]   ;;  %v8255_v61 = vld [vmem:[#allocation5 + $0x1c8] ss:$16 sps:$4 sm:$0xff]  }
 0x1fb   :  { %5371 = vmatpush1.bf16.msra.mxu0 %v8213_v21  ;;  %v8252_v21 = vld [vmem:[#allocation5 + $0x3e8] ss:$16 sps:$4 sm:$0xff]   ;;  %v8260_v23 = vld [vmem:[#allocation5 + $0x3cc] ss:$16 sps:$4 sm:$0xff]  }
 0x1fc   :  { %5414 = vmatpush1.bf16.msra.mxu1 %v8216_v22  ;;  %5372 = vmatprep.subr.bf16.mxu0 %v8221_v25  ;;  %v8257_v22 = vld [vmem:[#allocation5 + $0x1cc] ss:$16 sps:$4 sm:$0xff]   ;;  %v8258_v24 = vld [vmem:[#allocation5 + $0x3c8] ss:$16 sps:$4 sm:$0xff]  }
 0x1fd   :  { %5415 = vmatprep.subr.bf16.mxu1 %v8224_v30  ;;  %v8263_v25 = vld [vmem:[#allocation5 + $0x1ac] ss:$16 sps:$4 sm:$0xff]  }
 0x1fe   :  { %v8266_v30 = vld [vmem:[#allocation5 + $0x3ac] ss:$16 sps:$4 sm:$0xff]  }
 0x1ff   :  { %5373 = vmatpush1.bf16.msra.mxu0 %v8219_v38  ;;  %v8261_v38 = vld [vmem:[#allocation5 + $0x1a8] ss:$16 sps:$4 sm:$0xff]  }
 0x200   :  { %5416 = vmatpush1.bf16.msra.mxu1 %v8222_v39  ;;  %5374 = vmatprep.subr.bf16.mxu0 %v8227_v53  ;;  %v8264_v39 = vld [vmem:[#allocation5 + $0x3a8] ss:$16 sps:$4 sm:$0xff]   ;;  %v8269_v53 = vld [vmem:[#allocation5 + $0x18c] ss:$16 sps:$4 sm:$0xff]  }
 0x201   :  { %5417 = vmatprep.subr.bf16.mxu1 %v8230_v54  ;;  %v8272_v54 = vld [vmem:[#allocation5 + $0x38c] ss:$16 sps:$4 sm:$0xff]  }
 0x203   :  { %5375 = vmatpush1.bf16.msra.mxu0 %v8225_v8  ;;  %v8267_v8 = vld [vmem:[#allocation5 + $0x188] ss:$16 sps:$4 sm:$0xff]  }
 0x204   :  { %5418 = vmatpush1.bf16.msra.mxu1 %v8228_v41  ;;  %5376 = vmatprep.subr.bf16.mxu0 %v8233_v49  ;;  %v8270_v41 = vld [vmem:[#allocation5 + $0x388] ss:$16 sps:$4 sm:$0xff]   ;;  %v8275_v49 = vld [vmem:[#allocation5 + $0x16c] ss:$16 sps:$4 sm:$0xff]  }
 0x205   :  { %5419 = vmatprep.subr.bf16.mxu1 %v8236_v51  ;;  %v8278_v51 = vld [vmem:[#allocation5 + $0x36c] ss:$16 sps:$4 sm:$0xff]  }
 0x207   :  { %5377 = vmatpush1.bf16.msra.mxu0 %v8231_v52  ;;  %v8273_v52 = vld [vmem:[#allocation5 + $0x168] ss:$16 sps:$4 sm:$0xff]  }
 0x208   :  { %5420 = vmatpush1.bf16.msra.mxu1 %v8234_v57  ;;  %5378 = vmatprep.subr.bf16.mxu0 %v8239_v60  ;;  %v8276_v57 = vld [vmem:[#allocation5 + $0x368] ss:$16 sps:$4 sm:$0xff]   ;;  %v8281_v60 = vld [vmem:[#allocation5 + $0x14c] ss:$16 sps:$4 sm:$0xff]  }
 0x209   :  { %5421 = vmatprep.subr.bf16.mxu1 %v8242_v63  ;;  %v8284_v63 = vld [vmem:[#allocation5 + $0x34c] ss:$16 sps:$4 sm:$0xff]  }
 0x20b   :  { %5379 = vmatpush1.bf16.msra.mxu0 %v8237_v5  ;;  %v8279_v5 = vld [vmem:[#allocation5 + $0x148] ss:$16 sps:$4 sm:$0xff]  }
 0x20c   :  { %5422 = vmatpush1.bf16.msra.mxu1 %v8240_v6  ;;  %5380 = vmatprep.subr.bf16.mxu0 %v8245_v9  ;;  %v8282_v6 = vld [vmem:[#allocation5 + $0x348] ss:$16 sps:$4 sm:$0xff]   ;;  %v8287_v9 = vld [vmem:[#allocation5 + $0x12c] ss:$16 sps:$4 sm:$0xff]  }
 0x20d   :  { %5423 = vmatprep.subr.bf16.mxu1 %v8248_v10  ;;  %v8290_v10 = vld [vmem:[#allocation5 + $0x32c] ss:$16 sps:$4 sm:$0xff]  }
 0x20f   :  { %5381 = vmatpush1.bf16.msra.mxu0 %v8243_v11  ;;  %v8285_v11 = vld [vmem:[#allocation5 + $0x128] ss:$16 sps:$4 sm:$0xff]  }
 0x210   :  { %5424 = vmatpush1.bf16.msra.mxu1 %v8246_v14  ;;  %5382 = vmatprep.subr.bf16.mxu0 %v8251_v62  ;;  %v8288_v14 = vld [vmem:[#allocation5 + $0x328] ss:$16 sps:$4 sm:$0xff]   ;;  %v8293_v62 = vld [vmem:[#allocation5 + $0x10c] ss:$16 sps:$4 sm:$0xff]  }
 0x211   :  { %5425 = vmatprep.subr.bf16.mxu1 %v8254_v17  ;;  %v8296_v17 = vld [vmem:[#allocation5 + $0x30c] ss:$16 sps:$4 sm:$0xff]  }
 0x213   :  { %5383 = vmatpush2.bf16.msra.mxu0 %v8249_v18  ;;  %v8291_v18 = vld [vmem:[#allocation5 + $0x108] ss:$16 sps:$4 sm:$0xff]  }
 0x214   :  { %5426 = vmatpush2.bf16.msra.mxu1 %v8252_v21  ;;  %5384 = vmatprep.subr.bf16.mxu0 %v8257_v22  ;;  %v8294_v21 = vld [vmem:[#allocation5 + $0x308] ss:$16 sps:$4 sm:$0xff]   ;;  %v8299_v22 = vld [vmem:[#allocation5 + $0x4ec] ss:$16 sps:$4 sm:$0xff]  }
 0x215   :  { %5427 = vmatprep.subr.bf16.mxu1 %v8260_v23  ;;  %v8302_v23 = vld [vmem:[#allocation5 + $0x6ec] ss:$16 sps:$4 sm:$0xff]  }
 0x217   :  { %5385 = vmatpush2.bf16.msra.mxu0 %v8255_v61  ;;  %v8297_v61 = vld [vmem:[#allocation5 + $0x4e8] ss:$16 sps:$4 sm:$0xff]  }
 0x218   :  { %5428 = vmatpush2.bf16.msra.mxu1 %v8258_v24  ;;  %5386 = vmatprep.subr.bf16.mxu0 %v8263_v25  ;;  %v8300_v24 = vld [vmem:[#allocation5 + $0x6e8] ss:$16 sps:$4 sm:$0xff]   ;;  %v9325_v25 = vpop.f32.mrf.mxu0 }
 0x219   :  { %5429 = vmatprep.subr.bf16.mxu1 %v8266_v30  ;;  %v9327_v30 = vpop.f32.mrf.mxu1 }
 0x21b   :  { %5387 = vmatpush2.bf16.msra.mxu0 %v8261_v38  ;;  %v8305_v38 = vld [vmem:[#allocation5 + $0x4cc] ss:$16 sps:$4 sm:$0xff]  }
 0x21c   :  { %5430 = vmatpush2.bf16.msra.mxu1 %v8264_v39  ;;  %5388 = vmatprep.subr.bf16.mxu0 %v8269_v53  ;;  %v8308_v39 = vld [vmem:[#allocation5 + $0x6cc] ss:$16 sps:$4 sm:$0xff]   ;;  %v8303_v53 = vld [vmem:[#allocation5 + $0x4c8] ss:$16 sps:$4 sm:$0xff]  }
 0x21d   :  { %5431 = vmatprep.subr.bf16.mxu1 %v8272_v54  ;;  %v8306_v54 = vld [vmem:[#allocation5 + $0x6c8] ss:$16 sps:$4 sm:$0xff]  }
 0x21f   :  { %5389 = vmatpush2.bf16.msra.mxu0 %v8267_v8 }
 0x220   :  { %5432 = vmatpush2.bf16.msra.mxu1 %v8270_v41  ;;  %5390 = vmatprep.subr.bf16.mxu0 %v8275_v49 }
 0x221   :  { %5433 = vmatprep.subr.bf16.mxu1 %v8278_v51 }
 0x223   :  { %5391 = vmatpush2.bf16.msra.mxu0 %v8273_v52 }
 0x224   :  { %5434 = vmatpush2.bf16.msra.mxu1 %v8276_v57  ;;  %5392 = vmatprep.subr.bf16.mxu0 %v8281_v60  ;;  %v8311_v57 = vld [vmem:[#allocation5 + $0x4ac] ss:$16 sps:$4 sm:$0xff]  }
 0x225   :  { %5435 = vmatprep.subr.bf16.mxu1 %v8284_v63  ;;  %v8314_v60 = vld [vmem:[#allocation5 + $0x6ac] ss:$16 sps:$4 sm:$0xff]  }
 0x227   :  { %5393 = vmatpush2.bf16.msra.mxu0 %v8279_v5  ;;  %v8309_v5 = vld [vmem:[#allocation5 + $0x4a8] ss:$16 sps:$4 sm:$0xff]  }
 0x228   :  { %5436 = vmatpush2.bf16.msra.mxu1 %v8282_v6  ;;  %5394 = vmatprep.subr.bf16.mxu0 %v8287_v9  ;;  %v8312_v6 = vld [vmem:[#allocation5 + $0x6a8] ss:$16 sps:$4 sm:$0xff]   ;;  %v8317_v9 = vld [vmem:[#allocation5 + $0x48c] ss:$16 sps:$4 sm:$0xff]  }
 0x229   :  { %5437 = vmatprep.subr.bf16.mxu1 %v8290_v10  ;;  %v8320_v10 = vld [vmem:[#allocation5 + $0x68c] ss:$16 sps:$4 sm:$0xff]  }
 0x22b   :  { %5395 = vmatpush2.bf16.msra.mxu0 %v8285_v11 }
 0x22c   :  { %5438 = vmatpush2.bf16.msra.mxu1 %v8288_v14  ;;  %5396 = vmatprep.subr.bf16.mxu0 %v8293_v62  ;;  %v8315_v14 = vld [vmem:[#allocation5 + $0x488] ss:$16 sps:$4 sm:$0xff]  }
 0x22d   :  { %5439 = vmatprep.subr.bf16.mxu1 %v8296_v17  ;;  %v8318_v62 = vld [vmem:[#allocation5 + $0x688] ss:$16 sps:$4 sm:$0xff]  }
 0x22e   :  { %v8324_v17 = vld [vmem:[#allocation5 + $0x668] ss:$16 sps:$4 sm:$0xff]  }
 0x22f   :  { %5397 = vmatpush2.bf16.msra.mxu0 %v8291_v18  ;;  %v8329_v18 = vld [vmem:[#allocation5 + $0x44c] ss:$16 sps:$4 sm:$0xff]  }
 0x230   :  { %5440 = vmatpush2.bf16.msra.mxu1 %v8294_v21  ;;  %5452 = vmatprep.subr.bf16.mxu0 %v8299_v22  ;;  %v8332_v21 = vld [vmem:[#allocation5 + $0x64c] ss:$16 sps:$4 sm:$0xff]   ;;  %v8327_v22 = vld [vmem:[#allocation5 + $0x448] ss:$16 sps:$4 sm:$0xff]  }
 0x231   :  { %5495 = vmatprep.subr.bf16.mxu1 %v8302_v23  ;;  %v8330_v23 = vld [vmem:[#allocation5 + $0x648] ss:$16 sps:$4 sm:$0xff]  }
 0x232   :  { %v5142_v8 = vpop.f32.mrf.mxu0  ;;  %5399 = vmatmul.mubr.bf16.vlgmr.msra.gmra.mxu0 %v9216_v12 }
 0x233   :  { %v5185_v41 = vpop.f32.mrf.mxu1  ;;  %5442 = vmatmul.mubr.bf16.vlgmr.msra.gmra.mxu1 %v9218_v13  ;;  %v5143_v49 = vadd.f32 %v5142_v8, %v9318_v20  ;;  %5453 = vmatpush1.bf16.msra.mxu0 %v8297_v61  ;;  %v8335_v61 = vld [vmem:[#allocation5 + $0x42c] ss:$16 sps:$4 sm:$0xff]   ;;  %v8339_v8 = vld [vmem:[#allocation5 + $0x408] ss:$16 sps:$4 sm:$0xff]  }
 0x234   :  { %5496 = vmatpush1.bf16.msra.mxu1 %v8300_v24  ;;  %v9332_v51 = vpop.f32.mrf.mxu0  ;;  %5454 = vmatprep.subr.bf16.mxu0 %v8305_v38  ;;  %v8338_v24 = vld [vmem:[#allocation5 + $0x62c] ss:$16 sps:$4 sm:$0xff]   ;;  %v8333_v38 = vld [vmem:[#allocation5 + $0x428] ss:$16 sps:$4 sm:$0xff]  }
 0x235   :  { %v9334_v52 = vpop.f32.mrf.mxu1  ;;  %5497 = vmatprep.subr.bf16.mxu1 %v8308_v39  ;;  %v9336_v63 = vadd.f32 %v5185_v41, %v5143_v49  ;;  %5484 = vmatprep.mubr.bf16.mxu0 %v9222_v45  ;;  %v8323_v45 = vld [vmem:[#allocation5 + $0x46c] ss:$16 sps:$4 sm:$0xff]   ;;  %v8336_v39 = vld [vmem:[#allocation5 + $0x628] ss:$16 sps:$4 sm:$0xff]  }
 0x236   :  { %5527 = vmatprep.mubr.bf16.mxu1 %v9224_v47  ;;  %v5146_v12 = vpop.f32.mrf.mxu0  ;;  %v8326_v47 = vld [vmem:[#allocation5 + $0x66c] ss:$16 sps:$4 sm:$0xff]   ;;  %v8342_v41 = vld [vmem:[#allocation5 + $0x608] ss:$16 sps:$4 sm:$0xff]  }
 0x237   :  { %v5147_v13 = vadd.f32 %v5146_v12, %v9323_v37  ;;  %5455 = vmatpush1.bf16.msra.mxu0 %v8303_v53  ;;  %v5189_v20 = vpop.f32.mrf.mxu1  ;;  %v8321_v37 = vld [vmem:[#allocation5 + $0x468] ss:$16 sps:$4 sm:$0xff]   ;;  %v8341_v53 = vld [vmem:[#allocation5 + $0x40c] ss:$16 sps:$4 sm:$0xff]  }
 0x238   :  { %5498 = vmatpush1.bf16.msra.mxu1 %v8306_v54  ;;  %5456 = vmatprep.subr.bf16.mxu0 %v8311_v57  ;;  %v8344_v54 = vld [vmem:[#allocation5 + $0x60c] ss:$16 sps:$4 sm:$0xff]  }
 0x239   :  { %5499 = vmatprep.subr.bf16.mxu1 %v8314_v60  ;;  %v9341_v11 = vadd.f32 %v5189_v20, %v5147_v13  ;;  %v8347_v49 = vld [vmem:[#allocation5 + $0x5ec] ss:$16 sps:$4 sm:$0xff]   ;;  %v8345_v60 = vld [vmem:[#allocation5 + $0x5e8] ss:$16 sps:$4 sm:$0xff]  }
 0x23a   :  { %v8350_v57 = vld [vmem:[#allocation5 + $0x7ec] ss:$16 sps:$4 sm:$0xff]   ;;  %v8351_v13 = vld [vmem:[#allocation5 + $0x5c8] ss:$16 sps:$4 sm:$0xff]  }
 0x23b   :  { %5457 = vmatpush1.bf16.msra.mxu0 %v8309_v5  ;;  %v8348_v5 = vld [vmem:[#allocation5 + $0x7e8] ss:$16 sps:$4 sm:$0xff]   ;;  %v8356_v12 = vld [vmem:[#allocation5 + $0x7cc] ss:$16 sps:$4 sm:$0xff]  }
 0x23c   :  { %5500 = vmatpush1.bf16.msra.mxu1 %v8312_v6  ;;  %5458 = vmatprep.subr.bf16.mxu0 %v8317_v9  ;;  %v8353_v6 = vld [vmem:[#allocation5 + $0x5cc] ss:$16 sps:$4 sm:$0xff]   ;;  %v8354_v20 = vld [vmem:[#allocation5 + $0x7c8] ss:$16 sps:$4 sm:$0xff]  }
 0x23d   :  { %5501 = vmatprep.subr.bf16.mxu1 %v8320_v10  ;;  %v8359_v9 = vld [vmem:[#allocation5 + $0x5ac] ss:$16 sps:$4 sm:$0xff]  }
 0x23e   :  { %v8362_v10 = vld [vmem:[#allocation5 + $0x7ac] ss:$16 sps:$4 sm:$0xff]  }
 0x23f   :  { %5459 = vmatpush1.bf16.msra.mxu0 %v8315_v14  ;;  %v8357_v14 = vld [vmem:[#allocation5 + $0x5a8] ss:$16 sps:$4 sm:$0xff]  }
 0x240   :  { %5502 = vmatpush1.bf16.msra.mxu1 %v8318_v62  ;;  %5460 = vmatprep.subr.bf16.mxu0 %v8323_v45  ;;  %v8360_v62 = vld [vmem:[#allocation5 + $0x7a8] ss:$16 sps:$4 sm:$0xff]   ;;  %v8365_v45 = vld [vmem:[#allocation5 + $0x58c] ss:$16 sps:$4 sm:$0xff]  }
 0x241   :  { %5503 = vmatprep.subr.bf16.mxu1 %v8326_v47  ;;  %v8368_v47 = vld [vmem:[#allocation5 + $0x78c] ss:$16 sps:$4 sm:$0xff]  }
 0x243   :  { %5461 = vmatpush1.bf16.msra.mxu0 %v8321_v37  ;;  %v8363_v37 = vld [vmem:[#allocation5 + $0x588] ss:$16 sps:$4 sm:$0xff]  }
 0x244   :  { %5504 = vmatpush1.bf16.msra.mxu1 %v8324_v17  ;;  %5462 = vmatprep.subr.bf16.mxu0 %v8329_v18  ;;  %v8366_v17 = vld [vmem:[#allocation5 + $0x788] ss:$16 sps:$4 sm:$0xff]   ;;  %v8371_v18 = vld [vmem:[#allocation5 + $0x56c] ss:$16 sps:$4 sm:$0xff]  }
 0x245   :  { %5505 = vmatprep.subr.bf16.mxu1 %v8332_v21  ;;  %v8374_v21 = vld [vmem:[#allocation5 + $0x76c] ss:$16 sps:$4 sm:$0xff]  }
 0x247   :  { %5463 = vmatpush1.bf16.msra.mxu0 %v8327_v22  ;;  %v8369_v22 = vld [vmem:[#allocation5 + $0x568] ss:$16 sps:$4 sm:$0xff]  }
 0x248   :  { %5506 = vmatpush1.bf16.msra.mxu1 %v8330_v23  ;;  %5464 = vmatprep.subr.bf16.mxu0 %v8335_v61  ;;  %v8372_v23 = vld [vmem:[#allocation5 + $0x768] ss:$16 sps:$4 sm:$0xff]   ;;  %v8377_v61 = vld [vmem:[#allocation5 + $0x54c] ss:$16 sps:$4 sm:$0xff]  }
 0x249   :  { %5507 = vmatprep.subr.bf16.mxu1 %v8338_v24  ;;  %v8380_v24 = vld [vmem:[#allocation5 + $0x74c] ss:$16 sps:$4 sm:$0xff]  }
 0x24b   :  { %5465 = vmatpush1.bf16.msra.mxu0 %v8333_v38  ;;  %v8375_v38 = vld [vmem:[#allocation5 + $0x548] ss:$16 sps:$4 sm:$0xff]  }
 0x24c   :  { %5508 = vmatpush1.bf16.msra.mxu1 %v8336_v39  ;;  %5466 = vmatprep.subr.bf16.mxu0 %v8341_v53  ;;  %v8378_v39 = vld [vmem:[#allocation5 + $0x748] ss:$16 sps:$4 sm:$0xff]   ;;  %v8383_v53 = vld [vmem:[#allocation5 + $0x52c] ss:$16 sps:$4 sm:$0xff]  }
 0x24d   :  { %5509 = vmatprep.subr.bf16.mxu1 %v8344_v54  ;;  %v8386_v54 = vld [vmem:[#allocation5 + $0x72c] ss:$16 sps:$4 sm:$0xff]  }
 0x24f   :  { %5467 = vmatpush1.bf16.msra.mxu0 %v8339_v8  ;;  %v8381_v8 = vld [vmem:[#allocation5 + $0x528] ss:$16 sps:$4 sm:$0xff]  }
 0x250   :  { %5510 = vmatpush1.bf16.msra.mxu1 %v8342_v41  ;;  %5468 = vmatprep.subr.bf16.mxu0 %v8347_v49  ;;  %v8384_v41 = vld [vmem:[#allocation5 + $0x728] ss:$16 sps:$4 sm:$0xff]   ;;  %v8389_v49 = vld [vmem:[#allocation5 + $0x50c] ss:$16 sps:$4 sm:$0xff]  }
 0x251   :  { %5511 = vmatprep.subr.bf16.mxu1 %v8350_v57  ;;  %v8392_v57 = vld [vmem:[#allocation5 + $0x70c] ss:$16 sps:$4 sm:$0xff]  }
 0x253   :  { %5469 = vmatpush2.bf16.msra.mxu0 %v8345_v60  ;;  %v8387_v60 = vld [vmem:[#allocation5 + $0x508] ss:$16 sps:$4 sm:$0xff]  }
 0x254   :  { %5512 = vmatpush2.bf16.msra.mxu1 %v8348_v5  ;;  %5470 = vmatprep.subr.bf16.mxu0 %v8353_v6  ;;  %v8390_v5 = vld [vmem:[#allocation5 + $0x708] ss:$16 sps:$4 sm:$0xff]   ;;  %v8395_v6 = vld [vmem:[#allocation5 + $0x8ec] ss:$16 sps:$4 sm:$0xff]  }
 0x255   :  { %5513 = vmatprep.subr.bf16.mxu1 %v8356_v12  ;;  %v8398_v12 = vld [vmem:[#allocation5 + $0xaec] ss:$16 sps:$4 sm:$0xff]  }
 0x257   :  { %5471 = vmatpush2.bf16.msra.mxu0 %v8351_v13  ;;  %v8393_v13 = vld [vmem:[#allocation5 + $0x8e8] ss:$16 sps:$4 sm:$0xff]  }
 0x258   :  { %5514 = vmatpush2.bf16.msra.mxu1 %v8354_v20  ;;  %5472 = vmatprep.subr.bf16.mxu0 %v8359_v9  ;;  %v8396_v20 = vld [vmem:[#allocation5 + $0xae8] ss:$16 sps:$4 sm:$0xff]   ;;  %v9343_v9 = vpop.f32.mrf.mxu0 }
 0x259   :  { %5515 = vmatprep.subr.bf16.mxu1 %v8362_v10  ;;  %v9345_v10 = vpop.f32.mrf.mxu1 }
 0x25b   :  { %5473 = vmatpush2.bf16.msra.mxu0 %v8357_v14  ;;  %v8401_v14 = vld [vmem:[#allocation5 + $0x8cc] ss:$16 sps:$4 sm:$0xff]  }
 0x25c   :  { %5516 = vmatpush2.bf16.msra.mxu1 %v8360_v62  ;;  %5474 = vmatprep.subr.bf16.mxu0 %v8365_v45  ;;  %v8404_v62 = vld [vmem:[#allocation5 + $0xacc] ss:$16 sps:$4 sm:$0xff]   ;;  %v8399_v45 = vld [vmem:[#allocation5 + $0x8c8] ss:$16 sps:$4 sm:$0xff]  }
 0x25d   :  { %5517 = vmatprep.subr.bf16.mxu1 %v8368_v47  ;;  %v8402_v47 = vld [vmem:[#allocation5 + $0xac8] ss:$16 sps:$4 sm:$0xff]  }
 0x25f   :  { %5475 = vmatpush2.bf16.msra.mxu0 %v8363_v37 }
 0x260   :  { %5518 = vmatpush2.bf16.msra.mxu1 %v8366_v17  ;;  %5476 = vmatprep.subr.bf16.mxu0 %v8371_v18 }
 0x261   :  { %5519 = vmatprep.subr.bf16.mxu1 %v8374_v21 }
 0x263   :  { %5477 = vmatpush2.bf16.msra.mxu0 %v8369_v22 }
 0x264   :  { %5520 = vmatpush2.bf16.msra.mxu1 %v8372_v23  ;;  %5478 = vmatprep.subr.bf16.mxu0 %v8377_v61  ;;  %v8407_v23 = vld [vmem:[#allocation5 + $0x8ac] ss:$16 sps:$4 sm:$0xff]  }
 0x265   :  { %5521 = vmatprep.subr.bf16.mxu1 %v8380_v24  ;;  %v8410_v61 = vld [vmem:[#allocation5 + $0xaac] ss:$16 sps:$4 sm:$0xff]  }
 0x267   :  { %5479 = vmatpush2.bf16.msra.mxu0 %v8375_v38  ;;  %v8405_v38 = vld [vmem:[#allocation5 + $0x8a8] ss:$16 sps:$4 sm:$0xff]  }
 0x268   :  { %5522 = vmatpush2.bf16.msra.mxu1 %v8378_v39  ;;  %5480 = vmatprep.subr.bf16.mxu0 %v8383_v53  ;;  %v8408_v39 = vld [vmem:[#allocation5 + $0xaa8] ss:$16 sps:$4 sm:$0xff]   ;;  %v8413_v53 = vld [vmem:[#allocation5 + $0x88c] ss:$16 sps:$4 sm:$0xff]  }
 0x269   :  { %5523 = vmatprep.subr.bf16.mxu1 %v8386_v54  ;;  %v8416_v54 = vld [vmem:[#allocation5 + $0xa8c] ss:$16 sps:$4 sm:$0xff]  }
 0x26b   :  { %5481 = vmatpush2.bf16.msra.mxu0 %v8381_v8 }
 0x26c   :  { %5524 = vmatpush2.bf16.msra.mxu1 %v8384_v41  ;;  %5482 = vmatprep.subr.bf16.mxu0 %v8389_v49  ;;  %v8411_v41 = vld [vmem:[#allocation5 + $0x888] ss:$16 sps:$4 sm:$0xff]  }
 0x26d   :  { %5525 = vmatprep.subr.bf16.mxu1 %v8392_v57  ;;  %v8414_v49 = vld [vmem:[#allocation5 + $0xa88] ss:$16 sps:$4 sm:$0xff]  }
 0x26e   :  { %v8420_v57 = vld [vmem:[#allocation5 + $0xa68] ss:$16 sps:$4 sm:$0xff]  }
 0x26f   :  { %5483 = vmatpush2.bf16.msra.mxu0 %v8387_v60  ;;  %v8425_v60 = vld [vmem:[#allocation5 + $0x84c] ss:$16 sps:$4 sm:$0xff]  }
 0x270   :  { %5526 = vmatpush2.bf16.msra.mxu1 %v8390_v5  ;;  %5538 = vmatprep.subr.bf16.mxu0 %v8395_v6  ;;  %v8428_v5 = vld [vmem:[#allocation5 + $0xa4c] ss:$16 sps:$4 sm:$0xff]   ;;  %v8423_v6 = vld [vmem:[#allocation5 + $0x848] ss:$16 sps:$4 sm:$0xff]  }
 0x271   :  { %5581 = vmatprep.subr.bf16.mxu1 %v8398_v12  ;;  %v8426_v12 = vld [vmem:[#allocation5 + $0xa48] ss:$16 sps:$4 sm:$0xff]  }
 0x272   :  { %v5228_v37 = vpop.f32.mrf.mxu0  ;;  %5485 = vmatmul.mubr.bf16.vlgmr.msra.gmra.mxu0 %v9228_v28 }
 0x273   :  { %v5271_v17 = vpop.f32.mrf.mxu1  ;;  %5528 = vmatmul.mubr.bf16.vlgmr.msra.gmra.mxu1 %v9230_v29  ;;  %v5229_v18 = vadd.f32 %v5228_v37, %v9336_v63  ;;  %5539 = vmatpush1.bf16.msra.mxu0 %v8393_v13  ;;  %v8431_v13 = vld [vmem:[#allocation5 + $0x82c] ss:$16 sps:$4 sm:$0xff]   ;;  %v8435_v37 = vld [vmem:[#allocation5 + $0x808] ss:$16 sps:$4 sm:$0xff]  }
 0x274   :  { %5582 = vmatpush1.bf16.msra.mxu1 %v8396_v20  ;;  %v9350_v21 = vpop.f32.mrf.mxu0  ;;  %5540 = vmatprep.subr.bf16.mxu0 %v8401_v14  ;;  %v8434_v20 = vld [vmem:[#allocation5 + $0xa2c] ss:$16 sps:$4 sm:$0xff]   ;;  %v8429_v14 = vld [vmem:[#allocation5 + $0x828] ss:$16 sps:$4 sm:$0xff]  }
 0x275   :  { %v9352_v22 = vpop.f32.mrf.mxu1  ;;  %5583 = vmatprep.subr.bf16.mxu1 %v8404_v62  ;;  %v9354_v24 = vadd.f32 %v5271_v17, %v5229_v18  ;;  %5570 = vmatprep.mubr.bf16.mxu0 %v9234_v40  ;;  %v8419_v40 = vld [vmem:[#allocation5 + $0x86c] ss:$16 sps:$4 sm:$0xff]   ;;  %v8432_v62 = vld [vmem:[#allocation5 + $0xa28] ss:$16 sps:$4 sm:$0xff]  }
 0x276   :  { %5613 = vmatprep.mubr.bf16.mxu1 %v9236_v46  ;;  %v5232_v28 = vpop.f32.mrf.mxu0  ;;  %v8422_v46 = vld [vmem:[#allocation5 + $0xa6c] ss:$16 sps:$4 sm:$0xff]   ;;  %v8438_v17 = vld [vmem:[#allocation5 + $0xa08] ss:$16 sps:$4 sm:$0xff]  }
 0x277   :  { %v5233_v29 = vadd.f32 %v5232_v28, %v9341_v11  ;;  %5541 = vmatpush1.bf16.msra.mxu0 %v8399_v45  ;;  %v5275_v63 = vpop.f32.mrf.mxu1  ;;  %v8417_v11 = vld [vmem:[#allocation5 + $0x868] ss:$16 sps:$4 sm:$0xff]   ;;  %v8437_v45 = vld [vmem:[#allocation5 + $0x80c] ss:$16 sps:$4 sm:$0xff]  }
 0x278   :  { %5584 = vmatpush1.bf16.msra.mxu1 %v8402_v47  ;;  %5542 = vmatprep.subr.bf16.mxu0 %v8407_v23  ;;  %v8440_v47 = vld [vmem:[#allocation5 + $0xa0c] ss:$16 sps:$4 sm:$0xff]  }
 0x279   :  { %5585 = vmatprep.subr.bf16.mxu1 %v8410_v61  ;;  %v9359_v8 = vadd.f32 %v5275_v63, %v5233_v29  ;;  %v8443_v18 = vld [vmem:[#allocation5 + $0x9ec] ss:$16 sps:$4 sm:$0xff]   ;;  %v8441_v61 = vld [vmem:[#allocation5 + $0x9e8] ss:$16 sps:$4 sm:$0xff]  }
 0x27a   :  { %v8446_v23 = vld [vmem:[#allocation5 + $0xbec] ss:$16 sps:$4 sm:$0xff]   ;;  %v8447_v29 = vld [vmem:[#allocation5 + $0x9c8] ss:$16 sps:$4 sm:$0xff]  }
 0x27b   :  { %5543 = vmatpush1.bf16.msra.mxu0 %v8405_v38  ;;  %v8444_v38 = vld [vmem:[#allocation5 + $0xbe8] ss:$16 sps:$4 sm:$0xff]   ;;  %v8452_v28 = vld [vmem:[#allocation5 + $0xbcc] ss:$16 sps:$4 sm:$0xff]  }
 0x27c   :  { %5586 = vmatpush1.bf16.msra.mxu1 %v8408_v39  ;;  %5544 = vmatprep.subr.bf16.mxu0 %v8413_v53  ;;  %v8449_v39 = vld [vmem:[#allocation5 + $0x9cc] ss:$16 sps:$4 sm:$0xff]   ;;  %v8450_v63 = vld [vmem:[#allocation5 + $0xbc8] ss:$16 sps:$4 sm:$0xff]  }
 0x27d   :  { %5587 = vmatprep.subr.bf16.mxu1 %v8416_v54  ;;  %v8455_v53 = vld [vmem:[#allocation5 + $0x9ac] ss:$16 sps:$4 sm:$0xff]  }
 0x27e   :  { %v8458_v54 = vld [vmem:[#allocation5 + $0xbac] ss:$16 sps:$4 sm:$0xff]  }
 0x27f   :  { %5545 = vmatpush1.bf16.msra.mxu0 %v8411_v41  ;;  %v8453_v41 = vld [vmem:[#allocation5 + $0x9a8] ss:$16 sps:$4 sm:$0xff]  }
 0x280   :  { %5588 = vmatpush1.bf16.msra.mxu1 %v8414_v49  ;;  %5546 = vmatprep.subr.bf16.mxu0 %v8419_v40  ;;  %v8456_v49 = vld [vmem:[#allocation5 + $0xba8] ss:$16 sps:$4 sm:$0xff]   ;;  %v8461_v40 = vld [vmem:[#allocation5 + $0x98c] ss:$16 sps:$4 sm:$0xff]  }
 0x281   :  { %5589 = vmatprep.subr.bf16.mxu1 %v8422_v46  ;;  %v8464_v46 = vld [vmem:[#allocation5 + $0xb8c] ss:$16 sps:$4 sm:$0xff]  }
 0x283   :  { %5547 = vmatpush1.bf16.msra.mxu0 %v8417_v11  ;;  %v8459_v11 = vld [vmem:[#allocation5 + $0x988] ss:$16 sps:$4 sm:$0xff]  }
 0x284   :  { %5590 = vmatpush1.bf16.msra.mxu1 %v8420_v57  ;;  %5548 = vmatprep.subr.bf16.mxu0 %v8425_v60  ;;  %v8462_v57 = vld [vmem:[#allocation5 + $0xb88] ss:$16 sps:$4 sm:$0xff]   ;;  %v8467_v60 = vld [vmem:[#allocation5 + $0x96c] ss:$16 sps:$4 sm:$0xff]  }
 0x285   :  { %5591 = vmatprep.subr.bf16.mxu1 %v8428_v5  ;;  %v8470_v5 = vld [vmem:[#allocation5 + $0xb6c] ss:$16 sps:$4 sm:$0xff]  }
 0x287   :  { %5549 = vmatpush1.bf16.msra.mxu0 %v8423_v6  ;;  %v8465_v6 = vld [vmem:[#allocation5 + $0x968] ss:$16 sps:$4 sm:$0xff]  }
 0x288   :  { %5592 = vmatpush1.bf16.msra.mxu1 %v8426_v12  ;;  %5550 = vmatprep.subr.bf16.mxu0 %v8431_v13  ;;  %v8468_v12 = vld [vmem:[#allocation5 + $0xb68] ss:$16 sps:$4 sm:$0xff]   ;;  %v8473_v13 = vld [vmem:[#allocation5 + $0x94c] ss:$16 sps:$4 sm:$0xff]  }
 0x289   :  { %5593 = vmatprep.subr.bf16.mxu1 %v8434_v20  ;;  %v8476_v20 = vld [vmem:[#allocation5 + $0xb4c] ss:$16 sps:$4 sm:$0xff]  }
 0x28b   :  { %5551 = vmatpush1.bf16.msra.mxu0 %v8429_v14  ;;  %v8471_v14 = vld [vmem:[#allocation5 + $0x948] ss:$16 sps:$4 sm:$0xff]  }
 0x28c   :  { %5594 = vmatpush1.bf16.msra.mxu1 %v8432_v62  ;;  %5552 = vmatprep.subr.bf16.mxu0 %v8437_v45  ;;  %v8474_v62 = vld [vmem:[#allocation5 + $0xb48] ss:$16 sps:$4 sm:$0xff]   ;;  %v8479_v45 = vld [vmem:[#allocation5 + $0x92c] ss:$16 sps:$4 sm:$0xff]  }
 0x28d   :  { %5595 = vmatprep.subr.bf16.mxu1 %v8440_v47  ;;  %v8482_v47 = vld [vmem:[#allocation5 + $0xb2c] ss:$16 sps:$4 sm:$0xff]  }
 0x28f   :  { %5553 = vmatpush1.bf16.msra.mxu0 %v8435_v37  ;;  %v8477_v37 = vld [vmem:[#allocation5 + $0x928] ss:$16 sps:$4 sm:$0xff]  }
 0x290   :  { %5596 = vmatpush1.bf16.msra.mxu1 %v8438_v17  ;;  %5554 = vmatprep.subr.bf16.mxu0 %v8443_v18  ;;  %v8480_v17 = vld [vmem:[#allocation5 + $0xb28] ss:$16 sps:$4 sm:$0xff]   ;;  %v8485_v18 = vld [vmem:[#allocation5 + $0x90c] ss:$16 sps:$4 sm:$0xff]  }
 0x291   :  { %5597 = vmatprep.subr.bf16.mxu1 %v8446_v23  ;;  %v8488_v23 = vld [vmem:[#allocation5 + $0xb0c] ss:$16 sps:$4 sm:$0xff]  }
 0x293   :  { %5555 = vmatpush2.bf16.msra.mxu0 %v8441_v61  ;;  %v8483_v61 = vld [vmem:[#allocation5 + $0x908] ss:$16 sps:$4 sm:$0xff]  }
 0x294   :  { %5598 = vmatpush2.bf16.msra.mxu1 %v8444_v38  ;;  %5556 = vmatprep.subr.bf16.mxu0 %v8449_v39  ;;  %v8486_v38 = vld [vmem:[#allocation5 + $0xb08] ss:$16 sps:$4 sm:$0xff]   ;;  %v8491_v39 = vld [vmem:[#allocation5 + $0xcec] ss:$16 sps:$4 sm:$0xff]  }
 0x295   :  { %5599 = vmatprep.subr.bf16.mxu1 %v8452_v28  ;;  %v8494_v28 = vld [vmem:[#allocation5 + $0xeec] ss:$16 sps:$4 sm:$0xff]  }
 0x297   :  { %5557 = vmatpush2.bf16.msra.mxu0 %v8447_v29  ;;  %v8489_v29 = vld [vmem:[#allocation5 + $0xce8] ss:$16 sps:$4 sm:$0xff]  }
 0x298   :  { %5600 = vmatpush2.bf16.msra.mxu1 %v8450_v63  ;;  %5558 = vmatprep.subr.bf16.mxu0 %v8455_v53  ;;  %v8492_v63 = vld [vmem:[#allocation5 + $0xee8] ss:$16 sps:$4 sm:$0xff]   ;;  %v9361_v53 = vpop.f32.mrf.mxu0 }
 0x299   :  { %5601 = vmatprep.subr.bf16.mxu1 %v8458_v54  ;;  %v9363_v54 = vpop.f32.mrf.mxu1 }
 0x29b   :  { %5559 = vmatpush2.bf16.msra.mxu0 %v8453_v41  ;;  %v8497_v41 = vld [vmem:[#allocation5 + $0xccc] ss:$16 sps:$4 sm:$0xff]  }
 0x29c   :  { %5602 = vmatpush2.bf16.msra.mxu1 %v8456_v49  ;;  %5560 = vmatprep.subr.bf16.mxu0 %v8461_v40  ;;  %v8500_v49 = vld [vmem:[#allocation5 + $0xecc] ss:$16 sps:$4 sm:$0xff]  }
 0x29d   :  { %5603 = vmatprep.subr.bf16.mxu1 %v8464_v46 }
 0x29f   :  { %5561 = vmatpush2.bf16.msra.mxu0 %v8459_v11 }
 0x2a0   :  { %5604 = vmatpush2.bf16.msra.mxu1 %v8462_v57  ;;  %5562 = vmatprep.subr.bf16.mxu0 %v8467_v60  ;;  %v8495_v57 = vld [vmem:[#allocation5 + $0xcc8] ss:$16 sps:$4 sm:$0xff]  }
 0x2a1   :  { %5605 = vmatprep.subr.bf16.mxu1 %v8470_v5  ;;  %v8498_v60 = vld [vmem:[#allocation5 + $0xec8] ss:$16 sps:$4 sm:$0xff]  }
 0x2a3   :  { %5563 = vmatpush2.bf16.msra.mxu0 %v8465_v6 }
 0x2a4   :  { %5606 = vmatpush2.bf16.msra.mxu1 %v8468_v12  ;;  %5564 = vmatprep.subr.bf16.mxu0 %v8473_v13  ;;  %v8503_v12 = vld [vmem:[#allocation5 + $0xcac] ss:$16 sps:$4 sm:$0xff]  }
 0x2a5   :  { %5607 = vmatprep.subr.bf16.mxu1 %v8476_v20  ;;  %v8506_v13 = vld [vmem:[#allocation5 + $0xeac] ss:$16 sps:$4 sm:$0xff]  }
 0x2a7   :  { %5565 = vmatpush2.bf16.msra.mxu0 %v8471_v14  ;;  %v8504_v14 = vld [vmem:[#allocation5 + $0xea8] ss:$16 sps:$4 sm:$0xff]  }
 0x2a8   :  { %5608 = vmatpush2.bf16.msra.mxu1 %v8474_v62  ;;  %5566 = vmatprep.subr.bf16.mxu0 %v8479_v45  ;;  %v8509_v45 = vld [vmem:[#allocation5 + $0xc8c] ss:$16 sps:$4 sm:$0xff]  }
 0x2a9   :  { %5609 = vmatprep.subr.bf16.mxu1 %v8482_v47  ;;  %v8512_v47 = vld [vmem:[#allocation5 + $0xe8c] ss:$16 sps:$4 sm:$0xff]  }
 0x2ab   :  { %5567 = vmatpush2.bf16.msra.mxu0 %v8477_v37 }
 0x2ac   :  { %5610 = vmatpush2.bf16.msra.mxu1 %v8480_v17  ;;  %5568 = vmatprep.subr.bf16.mxu0 %v8485_v18 }
 0x2ad   :  { %5611 = vmatprep.subr.bf16.mxu1 %v8488_v23  ;;  %v8510_v23 = vld [vmem:[#allocation5 + $0xe88] ss:$16 sps:$4 sm:$0xff]  }
 0x2af   :  { %5569 = vmatpush2.bf16.msra.mxu0 %v8483_v61 }
 0x2b0   :  { %5612 = vmatpush2.bf16.msra.mxu1 %v8486_v38  ;;  %5624 = vmatprep.subr.bf16.mxu0 %v8491_v39  ;;  %v8513_v38 = vld [vmem:[#allocation5 + $0xc68] ss:$16 sps:$4 sm:$0xff]  }
 0x2b1   :  { %5667 = vmatprep.subr.bf16.mxu1 %v8494_v28  ;;  %v8516_v39 = vld [vmem:[#allocation5 + $0xe68] ss:$16 sps:$4 sm:$0xff]   ;;  %v8521_v28 = vld [vmem:[#allocation5 + $0xc4c] ss:$16 sps:$4 sm:$0xff]  }
 0x2b2   :  { %v5314_v40 = vpop.f32.mrf.mxu0  ;;  %5571 = vmatmul.mubr.bf16.vlgmr.msra.gmra.mxu0 %v9240_v58 }
 0x2b3   :  { %v5357_v46 = vpop.f32.mrf.mxu1  ;;  %5614 = vmatmul.mubr.bf16.vlgmr.msra.gmra.mxu1 %v9242_v59  ;;  %v5315_v11 = vadd.f32 %v5314_v40, %v9354_v24  ;;  %5625 = vmatpush1.bf16.msra.mxu0 %v8489_v29  ;;  %v8501_v24 = vld [vmem:[#allocation5 + $0xca8] ss:$16 sps:$4 sm:$0xff]   ;;  %v8524_v29 = vld [vmem:[#allocation5 + $0xe4c] ss:$16 sps:$4 sm:$0xff]  }
 0x2b4   :  { %5668 = vmatpush1.bf16.msra.mxu1 %v8492_v63  ;;  %v9368_v5 = vpop.f32.mrf.mxu0  ;;  %5626 = vmatprep.subr.bf16.mxu0 %v8497_v41  ;;  %v8519_v63 = vld [vmem:[#allocation5 + $0xc48] ss:$16 sps:$4 sm:$0xff]   ;;  %v8530_v40 = vld [vmem:[#allocation5 + $0xe2c] ss:$16 sps:$4 sm:$0xff]  }
 0x2b5   :  { %v9370_v6 = vpop.f32.mrf.mxu1  ;;  %5669 = vmatprep.subr.bf16.mxu1 %v8500_v49  ;;  %v5358_v20 = vadd.f32 %v5357_v46, %v5315_v11  ;;  %5656 = vmatprep.mubr.bf16.mxu0 %v9244_v0  ;;  %v8507_v0 = vld [vmem:[#allocation5 + $0xc88] ss:$16 sps:$4 sm:$0xff]   ;;  %v8527_v49 = vld [vmem:[#allocation5 + $0xc2c] ss:$16 sps:$4 sm:$0xff]  }
 0x2b6   :  { %5699 = vmatprep.mubr.bf16.mxu1 %v9246_v1  ;;  %v5318_v58 = vpop.f32.mrf.mxu0  ;;  %v8515_v1 = vld [vmem:[#allocation5 + $0xc6c] ss:$16 sps:$4 sm:$0xff]   ;;  %v8522_v41 = vld [vmem:[#allocation5 + $0xe48] ss:$16 sps:$4 sm:$0xff]  }
 0x2b7   :  { %v5319_v59 = vadd.f32 %v5318_v58, %v9359_v8  ;;  %5627 = vmatpush1.bf16.msra.mxu0 %v8495_v57  ;;  %v5361_v62 = vpop.f32.mrf.mxu1  ;;  %v5882_v17 = vmax.f32 %v5358_v20, 0.0  ;;  %v8518_v8 = vld [vmem:[#allocation5 + $0xe6c] ss:$16 sps:$4 sm:$0xff]   ;;  %v8525_v46 = vld [vmem:[#allocation5 + $0xc28] ss:$16 sps:$4 sm:$0xff]  }
 0x2b8   :  { %5670 = vmatpush1.bf16.msra.mxu1 %v8498_v60  ;;  %5628 = vmatprep.subr.bf16.mxu0 %v8503_v12  ;;  %v8528_v11 = vld [vmem:[#allocation5 + $0xe28] ss:$16 sps:$4 sm:$0xff]   ;;  %v8533_v57 = vld [vmem:[#allocation5 + $0xc0c] ss:$16 sps:$4 sm:$0xff]  }
 0x2b9   :  { %5671 = vmatprep.subr.bf16.mxu1 %v8506_v13  ;;  %v5362_v37 = vadd.f32 %v5361_v62, %v5319_v59  ;;  %v8536_v60 = vld [vmem:[#allocation5 + $0xe0c] ss:$16 sps:$4 sm:$0xff]   ;;  %v8531_v12 = vld [vmem:[#allocation5 + $0xc08] ss:$16 sps:$4 sm:$0xff]  }
 0x2ba   :  { %v8534_v13 = vld [vmem:[#allocation5 + $0xe08] ss:$16 sps:$4 sm:$0xff]   ;;  %v8539_v20 = vld [vmem:[#allocation5 + $0xdec] ss:$16 sps:$4 sm:$0xff]  }
 0x2bb   :  { %v5886_v18 = vmax.f32 %v5362_v37, 0.0  ;;  %5629 = vmatpush1.bf16.msra.mxu0 %v8501_v24  ;;  %v8542_v58 = vld [vmem:[#allocation5 + $0xfec] ss:$16 sps:$4 sm:$0xff]   ;;  %v8537_v59 = vld [vmem:[#allocation5 + $0xde8] ss:$16 sps:$4 sm:$0xff]  }
 0x2bc   :  { %5672 = vmatpush1.bf16.msra.mxu1 %v8504_v14  ;;  %5630 = vmatprep.subr.bf16.mxu0 %v8509_v45  ;;  %v8540_v24 = vld [vmem:[#allocation5 + $0xfe8] ss:$16 sps:$4 sm:$0xff]   ;;  %v8545_v14 = vld [vmem:[#allocation5 + $0xdcc] ss:$16 sps:$4 sm:$0xff]  }
 0x2bd   :  { %5673 = vmatprep.subr.bf16.mxu1 %v8512_v47  ;;  %v9375_v61 = vpack.c.bf16 %v5886_v18, %v5882_v17  ;;  %v8548_v62 = vld [vmem:[#allocation5 + $0xfcc] ss:$16 sps:$4 sm:$0xff]   ;;  %v8543_v45 = vld [vmem:[#allocation5 + $0xdc8] ss:$16 sps:$4 sm:$0xff]  }
 0x2be   :  { %v8546_v47 = vld [vmem:[#allocation5 + $0xfc8] ss:$16 sps:$4 sm:$0xff]   ;;  %v8551_v37 = vld [vmem:[#allocation5 + $0xdac] ss:$16 sps:$4 sm:$0xff]  }
 0x2bf   :  { %5631 = vmatpush1.bf16.msra.mxu0 %v8507_v0  ;;  %v8554_v17 = vld [vmem:[#allocation5 + $0xfac] ss:$16 sps:$4 sm:$0xff]   ;;  %v8549_v18 = vld [vmem:[#allocation5 + $0xda8] ss:$16 sps:$4 sm:$0xff]  }
 0x2c0   :  { %5674 = vmatpush1.bf16.msra.mxu1 %v8510_v23  ;;  %5632 = vmatprep.subr.bf16.mxu0 %v8515_v1  ;;  %v8552_v0 = vld [vmem:[#allocation5 + $0xfa8] ss:$16 sps:$4 sm:$0xff]   ;;  %v8557_v23 = vld [vmem:[#allocation5 + $0xd8c] ss:$16 sps:$4 sm:$0xff]  }
 0x2c1   :  { %5675 = vmatprep.subr.bf16.mxu1 %v8518_v8  ;;  %v8560_v1 = vld [vmem:[#allocation5 + $0xf8c] ss:$16 sps:$4 sm:$0xff]   ;;  %v8555_v8 = vld [vmem:[#allocation5 + $0xd88] ss:$16 sps:$4 sm:$0xff]  }
 0x2c3   :  { %5633 = vmatpush1.bf16.msra.mxu0 %v8513_v38  ;;  %v8558_v38 = vld [vmem:[#allocation5 + $0xf88] ss:$16 sps:$4 sm:$0xff]  }
 0x2c4   :  { %5676 = vmatpush1.bf16.msra.mxu1 %v8516_v39  ;;  %5634 = vmatprep.subr.bf16.mxu0 %v8521_v28  ;;  %v8563_v39 = vld [vmem:[#allocation5 + $0xd6c] ss:$16 sps:$4 sm:$0xff]  }
 0x2c5   :  { %5677 = vmatprep.subr.bf16.mxu1 %v8524_v29  ;;  %v8566_v28 = vld [vmem:[#allocation5 + $0xf6c] ss:$16 sps:$4 sm:$0xff]   ;;  %v8561_v29 = vld [vmem:[#allocation5 + $0xd68] ss:$16 sps:$4 sm:$0xff]  }
 0x2c7   :  { %5635 = vmatpush1.bf16.msra.mxu0 %v8519_v63  ;;  %v8564_v63 = vld [vmem:[#allocation5 + $0xf68] ss:$16 sps:$4 sm:$0xff]  }
 0x2c8   :  { %5678 = vmatpush1.bf16.msra.mxu1 %v8522_v41  ;;  %5636 = vmatprep.subr.bf16.mxu0 %v8527_v49  ;;  %v8569_v41 = vld [vmem:[#allocation5 + $0xd4c] ss:$16 sps:$4 sm:$0xff]  }
 0x2c9   :  { %5679 = vmatprep.subr.bf16.mxu1 %v8530_v40  ;;  %v8572_v49 = vld [vmem:[#allocation5 + $0xf4c] ss:$16 sps:$4 sm:$0xff]   ;;  %v8567_v40 = vld [vmem:[#allocation5 + $0xd48] ss:$16 sps:$4 sm:$0xff]  }
 0x2cb   :  { %5637 = vmatpush1.bf16.msra.mxu0 %v8525_v46  ;;  %v8570_v46 = vld [vmem:[#allocation5 + $0xf48] ss:$16 sps:$4 sm:$0xff]  }
 0x2cc   :  { %5680 = vmatpush1.bf16.msra.mxu1 %v8528_v11  ;;  %5638 = vmatprep.subr.bf16.mxu0 %v8533_v57  ;;  %v8575_v11 = vld [vmem:[#allocation5 + $0xd2c] ss:$16 sps:$4 sm:$0xff]  }
 0x2cd   :  { %5681 = vmatprep.subr.bf16.mxu1 %v8536_v60  ;;  %v8578_v57 = vld [vmem:[#allocation5 + $0xf2c] ss:$16 sps:$4 sm:$0xff]   ;;  %v8573_v60 = vld [vmem:[#allocation5 + $0xd28] ss:$16 sps:$4 sm:$0xff]  }
 0x2cf   :  { %5639 = vmatpush1.bf16.msra.mxu0 %v8531_v12  ;;  %v8576_v12 = vld [vmem:[#allocation5 + $0xf28] ss:$16 sps:$4 sm:$0xff]  }
 0x2d0   :  { %5682 = vmatpush1.bf16.msra.mxu1 %v8534_v13  ;;  %5640 = vmatprep.subr.bf16.mxu0 %v8539_v20  ;;  %v8581_v13 = vld [vmem:[#allocation5 + $0xd0c] ss:$16 sps:$4 sm:$0xff]  }
 0x2d1   :  { %5683 = vmatprep.subr.bf16.mxu1 %v8542_v58  ;;  %v8584_v20 = vld [vmem:[#allocation5 + $0xf0c] ss:$16 sps:$4 sm:$0xff]   ;;  %v8579_v58 = vld [vmem:[#allocation5 + $0xd08] ss:$16 sps:$4 sm:$0xff]  }
 0x2d3   :  { %5641 = vmatpush2.bf16.msra.mxu0 %v8537_v59  ;;  %v8582_v59 = vld [vmem:[#allocation5 + $0xf08] ss:$16 sps:$4 sm:$0xff]  }
 0x2d4   :  { %5684 = vmatpush2.bf16.msra.mxu1 %v8540_v24  ;;  %5642 = vmatprep.subr.bf16.mxu0 %v8545_v14  ;;  %v8587_v24 = vld [vmem:[#allocation5 + $0x10ec] ss:$16 sps:$4 sm:$0xff]  }
 0x2d5   :  { %5685 = vmatprep.subr.bf16.mxu1 %v8548_v62  ;;  %v8590_v14 = vld [vmem:[#allocation5 + $0x12ec] ss:$16 sps:$4 sm:$0xff]   ;;  %v8585_v62 = vld [vmem:[#allocation5 + $0x10e8] ss:$16 sps:$4 sm:$0xff]  }
 0x2d7   :  { %5643 = vmatpush2.bf16.msra.mxu0 %v8543_v45  ;;  %v8588_v45 = vld [vmem:[#allocation5 + $0x12e8] ss:$16 sps:$4 sm:$0xff]  }
 0x2d8   :  { %5686 = vmatpush2.bf16.msra.mxu1 %v8546_v47  ;;  %5644 = vmatprep.subr.bf16.mxu0 %v8551_v37  ;;  %v8593_v47 = vld [vmem:[#allocation5 + $0x10cc] ss:$16 sps:$4 sm:$0xff]  }
 0x2d9   :  { %5687 = vmatprep.subr.bf16.mxu1 %v8554_v17  ;;  %v8596_v37 = vld [vmem:[#allocation5 + $0x12cc] ss:$16 sps:$4 sm:$0xff]   ;;  %v8591_v17 = vld [vmem:[#allocation5 + $0x10c8] ss:$16 sps:$4 sm:$0xff]  }
 0x2db   :  { %5645 = vmatpush2.bf16.msra.mxu0 %v8549_v18  ;;  %v8594_v18 = vld [vmem:[#allocation5 + $0x12c8] ss:$16 sps:$4 sm:$0xff]  }
 0x2dc   :  { %5688 = vmatpush2.bf16.msra.mxu1 %v8552_v0  ;;  %5646 = vmatprep.subr.bf16.mxu0 %v8557_v23  ;;  %v8599_v0 = vld [vmem:[#allocation5 + $0x10ac] ss:$16 sps:$4 sm:$0xff]  }
 0x2dd   :  { %5689 = vmatprep.subr.bf16.mxu1 %v8560_v1  ;;  %v8602_v23 = vld [vmem:[#allocation5 + $0x12ac] ss:$16 sps:$4 sm:$0xff]   ;;  %v8597_v1 = vld [vmem:[#allocation5 + $0x10a8] ss:$16 sps:$4 sm:$0xff]  }
 0x2df   :  { %5647 = vmatpush2.bf16.msra.mxu0 %v8555_v8  ;;  %v8600_v8 = vld [vmem:[#allocation5 + $0x12a8] ss:$16 sps:$4 sm:$0xff]  }
 0x2e0   :  { %5690 = vmatpush2.bf16.msra.mxu1 %v8558_v38  ;;  %5648 = vmatprep.subr.bf16.mxu0 %v8563_v39  ;;  %v8603_v38 = vld [vmem:[#allocation5 + $0x1088] ss:$16 sps:$4 sm:$0xff]  }
 0x2e1   :  { %5691 = vmatprep.subr.bf16.mxu1 %v8566_v28  ;;  %v8606_v39 = vld [vmem:[#allocation5 + $0x1288] ss:$16 sps:$4 sm:$0xff]   ;;  %v8611_v28 = vld [vmem:[#allocation5 + $0x106c] ss:$16 sps:$4 sm:$0xff]  }
 0x2e3   :  { %5649 = vmatpush2.bf16.msra.mxu0 %v8561_v29  ;;  %v8614_v29 = vld [vmem:[#allocation5 + $0x126c] ss:$16 sps:$4 sm:$0xff]  }
 0x2e4   :  { %5692 = vmatpush2.bf16.msra.mxu1 %v8564_v63  ;;  %5650 = vmatprep.subr.bf16.mxu0 %v8569_v41  ;;  %v8617_v63 = vld [vmem:[#allocation5 + $0x104c] ss:$16 sps:$4 sm:$0xff]  }
 0x2e5   :  { %5693 = vmatprep.subr.bf16.mxu1 %v8572_v49  ;;  %v8620_v41 = vld [vmem:[#allocation5 + $0x124c] ss:$16 sps:$4 sm:$0xff]   ;;  %v8615_v49 = vld [vmem:[#allocation5 + $0x1048] ss:$16 sps:$4 sm:$0xff]  }
 0x2e7   :  { %5651 = vmatpush2.bf16.msra.mxu0 %v8567_v40  ;;  %v8618_v40 = vld [vmem:[#allocation5 + $0x1248] ss:$16 sps:$4 sm:$0xff]  }
 0x2e8   :  { %5694 = vmatpush2.bf16.msra.mxu1 %v8570_v46  ;;  %5652 = vmatprep.subr.bf16.mxu0 %v8575_v11  ;;  %v8623_v46 = vld [vmem:[#allocation5 + $0x102c] ss:$16 sps:$4 sm:$0xff]  }
 0x2e9   :  { %5695 = vmatprep.subr.bf16.mxu1 %v8578_v57  ;;  %v8626_v11 = vld [vmem:[#allocation5 + $0x122c] ss:$16 sps:$4 sm:$0xff]   ;;  %v8621_v57 = vld [vmem:[#allocation5 + $0x1028] ss:$16 sps:$4 sm:$0xff]  }
 0x2eb   :  { %5653 = vmatpush2.bf16.msra.mxu0 %v8573_v60  ;;  %v8624_v60 = vld [vmem:[#allocation5 + $0x1228] ss:$16 sps:$4 sm:$0xff]  }
 0x2ec   :  { %5696 = vmatpush2.bf16.msra.mxu1 %v8576_v12  ;;  %5654 = vmatprep.subr.bf16.mxu0 %v8581_v13  ;;  %v8629_v12 = vld [vmem:[#allocation5 + $0x100c] ss:$16 sps:$4 sm:$0xff]  }
 0x2ed   :  { %5697 = vmatprep.subr.bf16.mxu1 %v8584_v20  ;;  %v8632_v13 = vld [vmem:[#allocation5 + $0x120c] ss:$16 sps:$4 sm:$0xff]   ;;  %v8627_v20 = vld [vmem:[#allocation5 + $0x1008] ss:$16 sps:$4 sm:$0xff]  }
 0x2ef   :  { %5655 = vmatpush2.bf16.msra.mxu0 %v8579_v58  ;;  %v8630_v58 = vld [vmem:[#allocation5 + $0x1208] ss:$16 sps:$4 sm:$0xff]  }
 0x2f0   :  { %5698 = vmatpush2.bf16.msra.mxu1 %v8582_v59  ;;  %5710 = vmatprep.subr.bf16.mxu0 %v8587_v24  ;;  %v8635_v59 = vld [vmem:[#allocation5 + $0x11ec] ss:$16 sps:$4 sm:$0xff]  }
 0x2f1   :  { %5753 = vmatprep.subr.bf16.mxu1 %v8590_v14  ;;  %v8638_v24 = vld [vmem:[#allocation5 + $0x13ec] ss:$16 sps:$4 sm:$0xff]   ;;  %v8633_v14 = vld [vmem:[#allocation5 + $0x11e8] ss:$16 sps:$4 sm:$0xff]  }
 0x2f2   :  { %5657 = vmatmul.mubr.bf16.vlgmr.msra.gmra.mxu0 %v9255_v26  ;;  %v8605_v26 = vld [vmem:[#allocation5 + $0x108c] ss:$16 sps:$4 sm:$0xff]  }
 0x2f3   :  { %5700 = vmatmul.mubr.bf16.vlgmr.msra.gmra.mxu1 %v9257_v27  ;;  %5711 = vmatpush1.bf16.msra.mxu0 %v8585_v62  ;;  %v8608_v27 = vld [vmem:[#allocation5 + $0x128c] ss:$16 sps:$4 sm:$0xff]   ;;  %v8636_v62 = vld [vmem:[#allocation5 + $0x13e8] ss:$16 sps:$4 sm:$0xff]  }
 0x2f4   :  { %5754 = vmatpush1.bf16.msra.mxu1 %v8588_v45  ;;  %5712 = vmatprep.subr.bf16.mxu0 %v8593_v47  ;;  %v8641_v45 = vld [vmem:[#allocation5 + $0x11cc] ss:$16 sps:$4 sm:$0xff]  }
 0x2f5   :  { %5755 = vmatprep.subr.bf16.mxu1 %v8596_v37  ;;  %5742 = vmatprep.mubr.bf16.mxu0 %v9261_v35  ;;  %v8609_v35 = vld [vmem:[#allocation5 + $0x1068] ss:$16 sps:$4 sm:$0xff]   ;;  %v8644_v47 = vld [vmem:[#allocation5 + $0x13cc] ss:$16 sps:$4 sm:$0xff]  }
 0x2f6   :  { %5785 = vmatprep.mubr.bf16.mxu1 %v9263_v36  ;;  %v8612_v36 = vld [vmem:[#allocation5 + $0x1268] ss:$16 sps:$4 sm:$0xff]  }
 0x2f7   :  { %5713 = vmatpush1.bf16.msra.mxu0 %v8591_v17  ;;  %v8639_v37 = vld [vmem:[#allocation5 + $0x11c8] ss:$16 sps:$4 sm:$0xff]  }
 0x2f8   :  { %5756 = vmatpush1.bf16.msra.mxu1 %v8594_v18  ;;  %5714 = vmatprep.subr.bf16.mxu0 %v8599_v0  ;;  %v8642_v17 = vld [vmem:[#allocation5 + $0x13c8] ss:$16 sps:$4 sm:$0xff]   ;;  %v8647_v18 = vld [vmem:[#allocation5 + $0x11ac] ss:$16 sps:$4 sm:$0xff]  }
 0x2f9   :  { %5757 = vmatprep.subr.bf16.mxu1 %v8602_v23  ;;  %v8650_v0 = vld [vmem:[#allocation5 + $0x13ac] ss:$16 sps:$4 sm:$0xff]   ;;  %v8645_v23 = vld [vmem:[#allocation5 + $0x11a8] ss:$16 sps:$4 sm:$0xff]  }
 0x2fb   :  { %5715 = vmatpush1.bf16.msra.mxu0 %v8597_v1  ;;  %v8648_v1 = vld [vmem:[#allocation5 + $0x13a8] ss:$16 sps:$4 sm:$0xff]  }
 0x2fc   :  { %5758 = vmatpush1.bf16.msra.mxu1 %v8600_v8  ;;  %5716 = vmatprep.subr.bf16.mxu0 %v8605_v26  ;;  %v8653_v8 = vld [vmem:[#allocation5 + $0x118c] ss:$16 sps:$4 sm:$0xff]  }
 0x2fd   :  { %5759 = vmatprep.subr.bf16.mxu1 %v8608_v27  ;;  %v8656_v26 = vld [vmem:[#allocation5 + $0x138c] ss:$16 sps:$4 sm:$0xff]   ;;  %v8651_v27 = vld [vmem:[#allocation5 + $0x1188] ss:$16 sps:$4 sm:$0xff]  }
 0x2ff   :  { %5717 = vmatpush1.bf16.msra.mxu0 %v8603_v38  ;;  %v8654_v38 = vld [vmem:[#allocation5 + $0x1388] ss:$16 sps:$4 sm:$0xff]  }
 0x300   :  { %5760 = vmatpush1.bf16.msra.mxu1 %v8606_v39  ;;  %5718 = vmatprep.subr.bf16.mxu0 %v8611_v28  ;;  %v8659_v39 = vld [vmem:[#allocation5 + $0x116c] ss:$16 sps:$4 sm:$0xff]  }
 0x301   :  { %5761 = vmatprep.subr.bf16.mxu1 %v8614_v29  ;;  %v8662_v28 = vld [vmem:[#allocation5 + $0x136c] ss:$16 sps:$4 sm:$0xff]   ;;  %v8657_v29 = vld [vmem:[#allocation5 + $0x1168] ss:$16 sps:$4 sm:$0xff]  }
 0x303   :  { %5719 = vmatpush1.bf16.msra.mxu0 %v8609_v35  ;;  %v8660_v35 = vld [vmem:[#allocation5 + $0x1368] ss:$16 sps:$4 sm:$0xff]  }
 0x304   :  { %5762 = vmatpush1.bf16.msra.mxu1 %v8612_v36  ;;  %5720 = vmatprep.subr.bf16.mxu0 %v8617_v63  ;;  %v8665_v36 = vld [vmem:[#allocation5 + $0x114c] ss:$16 sps:$4 sm:$0xff]  }
 0x305   :  { %5763 = vmatprep.subr.bf16.mxu1 %v8620_v41  ;;  %v8668_v63 = vld [vmem:[#allocation5 + $0x134c] ss:$16 sps:$4 sm:$0xff]   ;;  %v8663_v41 = vld [vmem:[#allocation5 + $0x1148] ss:$16 sps:$4 sm:$0xff]  }
 0x307   :  { %5721 = vmatpush1.bf16.msra.mxu0 %v8615_v49  ;;  %v8666_v49 = vld [vmem:[#allocation5 + $0x1348] ss:$16 sps:$4 sm:$0xff]  }
 0x308   :  { %5764 = vmatpush1.bf16.msra.mxu1 %v8618_v40  ;;  %5722 = vmatprep.subr.bf16.mxu0 %v8623_v46  ;;  %v8671_v40 = vld [vmem:[#allocation5 + $0x112c] ss:$16 sps:$4 sm:$0xff]  }
 0x309   :  { %5765 = vmatprep.subr.bf16.mxu1 %v8626_v11  ;;  %v8674_v46 = vld [vmem:[#allocation5 + $0x132c] ss:$16 sps:$4 sm:$0xff]   ;;  %v8669_v11 = vld [vmem:[#allocation5 + $0x1128] ss:$16 sps:$4 sm:$0xff]  }
 0x30b   :  { %5723 = vmatpush1.bf16.msra.mxu0 %v8621_v57  ;;  %v8672_v57 = vld [vmem:[#allocation5 + $0x1328] ss:$16 sps:$4 sm:$0xff]  }
 0x30c   :  { %5766 = vmatpush1.bf16.msra.mxu1 %v8624_v60  ;;  %5724 = vmatprep.subr.bf16.mxu0 %v8629_v12  ;;  %v8677_v60 = vld [vmem:[#allocation5 + $0x110c] ss:$16 sps:$4 sm:$0xff]  }
 0x30d   :  { %5767 = vmatprep.subr.bf16.mxu1 %v8632_v13  ;;  %v8680_v12 = vld [vmem:[#allocation5 + $0x130c] ss:$16 sps:$4 sm:$0xff]   ;;  %v8675_v13 = vld [vmem:[#allocation5 + $0x1108] ss:$16 sps:$4 sm:$0xff]  }
 0x30f   :  { %5725 = vmatpush1.bf16.msra.mxu0 %v8627_v20  ;;  %v8678_v20 = vld [vmem:[#allocation5 + $0x1308] ss:$16 sps:$4 sm:$0xff]  }
 0x310   :  { %5768 = vmatpush1.bf16.msra.mxu1 %v8630_v58  ;;  %5726 = vmatprep.subr.bf16.mxu0 %v8635_v59  ;;  %v8683_v58 = vld [vmem:[#allocation5 + $0x14ec] ss:$16 sps:$4 sm:$0xff]  }
 0x311   :  { %5769 = vmatprep.subr.bf16.mxu1 %v8638_v24  ;;  %v8686_v59 = vld [vmem:[#allocation5 + $0x16ec] ss:$16 sps:$4 sm:$0xff]   ;;  %v8681_v24 = vld [vmem:[#allocation5 + $0x14e8] ss:$16 sps:$4 sm:$0xff]  }
 0x313   :  { %5727 = vmatpush2.bf16.msra.mxu0 %v8633_v14  ;;  %v8684_v14 = vld [vmem:[#allocation5 + $0x16e8] ss:$16 sps:$4 sm:$0xff]  }
 0x314   :  { %5770 = vmatpush2.bf16.msra.mxu1 %v8636_v62  ;;  %5728 = vmatprep.subr.bf16.mxu0 %v8641_v45  ;;  %v8689_v62 = vld [vmem:[#allocation5 + $0x14cc] ss:$16 sps:$4 sm:$0xff]  }
 0x315   :  { %5771 = vmatprep.subr.bf16.mxu1 %v8644_v47  ;;  %v8692_v45 = vld [vmem:[#allocation5 + $0x16cc] ss:$16 sps:$4 sm:$0xff]   ;;  %v8687_v47 = vld [vmem:[#allocation5 + $0x14c8] ss:$16 sps:$4 sm:$0xff]  }
 0x317   :  { %5729 = vmatpush2.bf16.msra.mxu0 %v8639_v37  ;;  %v8690_v37 = vld [vmem:[#allocation5 + $0x16c8] ss:$16 sps:$4 sm:$0xff]  }
 0x318   :  { %5772 = vmatpush2.bf16.msra.mxu1 %v8642_v17  ;;  %5730 = vmatprep.subr.bf16.mxu0 %v8647_v18  ;;  %v8695_v17 = vld [vmem:[#allocation5 + $0x14ac] ss:$16 sps:$4 sm:$0xff]  }
 0x319   :  { %5773 = vmatprep.subr.bf16.mxu1 %v8650_v0  ;;  %v8698_v18 = vld [vmem:[#allocation5 + $0x16ac] ss:$16 sps:$4 sm:$0xff]   ;;  %v8693_v0 = vld [vmem:[#allocation5 + $0x14a8] ss:$16 sps:$4 sm:$0xff]  }
 0x31b   :  { %5731 = vmatpush2.bf16.msra.mxu0 %v8645_v23  ;;  %v8696_v23 = vld [vmem:[#allocation5 + $0x16a8] ss:$16 sps:$4 sm:$0xff]  }
 0x31c   :  { %5774 = vmatpush2.bf16.msra.mxu1 %v8648_v1  ;;  %5732 = vmatprep.subr.bf16.mxu0 %v8653_v8  ;;  %v8699_v1 = vld [vmem:[#allocation5 + $0x1488] ss:$16 sps:$4 sm:$0xff]  }
 0x31d   :  { %5775 = vmatprep.subr.bf16.mxu1 %v8656_v26  ;;  %v8702_v8 = vld [vmem:[#allocation5 + $0x1688] ss:$16 sps:$4 sm:$0xff]   ;;  %v8707_v26 = vld [vmem:[#allocation5 + $0x146c] ss:$16 sps:$4 sm:$0xff]  }
 0x31f   :  { %5733 = vmatpush2.bf16.msra.mxu0 %v8651_v27  ;;  %v8710_v27 = vld [vmem:[#allocation5 + $0x166c] ss:$16 sps:$4 sm:$0xff]  }
 0x320   :  { %5776 = vmatpush2.bf16.msra.mxu1 %v8654_v38  ;;  %5734 = vmatprep.subr.bf16.mxu0 %v8659_v39  ;;  %v8713_v38 = vld [vmem:[#allocation5 + $0x144c] ss:$16 sps:$4 sm:$0xff]  }
 0x321   :  { %5777 = vmatprep.subr.bf16.mxu1 %v8662_v28  ;;  %v8716_v39 = vld [vmem:[#allocation5 + $0x164c] ss:$16 sps:$4 sm:$0xff]   ;;  %v996_v28 = vsub.s32 1, %v9252_v7 }
 0x323   :  { %5735 = vmatpush2.bf16.msra.mxu0 %v8657_v29  ;;  %v8711_v29 = vld [vmem:[#allocation5 + $0x1448] ss:$16 sps:$4 sm:$0xff]  }
 0x324   :  { %5778 = vmatpush2.bf16.msra.mxu1 %v8660_v35  ;;  %5736 = vmatprep.subr.bf16.mxu0 %v8665_v36  ;;  %v8714_v35 = vld [vmem:[#allocation5 + $0x1648] ss:$16 sps:$4 sm:$0xff]   ;;  %v8719_v36 = vld [vmem:[#allocation5 + $0x142c] ss:$16 sps:$4 sm:$0xff]  }
 0x325   :  { %5779 = vmatprep.subr.bf16.mxu1 %v8668_v63  ;;  %v8722_v63 = vld [vmem:[#allocation5 + $0x162c] ss:$16 sps:$4 sm:$0xff]  }
 0x327   :  { %5737 = vmatpush2.bf16.msra.mxu0 %v8663_v41  ;;  %v9386_v41 = vld [vmem:[#allocation7] sm:$0xf] }
 0x328   :  { %5780 = vmatpush2.bf16.msra.mxu1 %v8666_v49  ;;  %5738 = vmatprep.subr.bf16.mxu0 %v8671_v40  ;;  %v997_v49 = vrot.slane %v9386_v41, %v996_v28 }
 0x329   :  { %5781 = vmatprep.subr.bf16.mxu1 %v8674_v46  ;;  %v8717_v46 = vld [vmem:[#allocation5 + $0x1428] ss:$16 sps:$4 sm:$0xff]  }
 0x32a   :  { %v4891_v40 = vadd.f32 %v9281_v33, %v997_v49  ;;  %v8734_v33 = vld [vmem:[#allocation5 + $0x17ec] ss:$16 sps:$4 sm:$0xff]  }
 0x32b   :  { %5739 = vmatpush2.bf16.msra.mxu0 %v8669_v11  ;;  %v8720_v11 = vld [vmem:[#allocation5 + $0x1628] ss:$16 sps:$4 sm:$0xff]  }
 0x32c   :  { %5782 = vmatpush2.bf16.msra.mxu1 %v8672_v57  ;;  %5740 = vmatprep.subr.bf16.mxu0 %v8677_v60  ;;  %v8725_v57 = vld [vmem:[#allocation5 + $0x140c] ss:$16 sps:$4 sm:$0xff]  }
 0x32d   :  { %5783 = vmatprep.subr.bf16.mxu1 %v8680_v12  ;;  %v8728_v60 = vld [vmem:[#allocation5 + $0x160c] ss:$16 sps:$4 sm:$0xff]   ;;  %v4887_v12 = vadd.f32 %v9267_v43, %v997_v49  ;;  %v8732_v43 = vld [vmem:[#allocation5 + $0x17e8] ss:$16 sps:$4 sm:$0xff]  }
 0x32e   :  { %v8762_v49 = vld [vmem:[#allocation5 + $0x1748] ss:$16 sps:$4 sm:$0xff]  }
 0x32f   :  { %5741 = vmatpush2.bf16.msra.mxu0 %v8675_v13  ;;  %v4934_v13 = vadd.f32 %v9283_v34, %v4891_v40  ;;  %v8737_v34 = vld [vmem:[#allocation5 + $0x15cc] ss:$16 sps:$4 sm:$0xff]  }
 0x330   :  { %5784 = vmatpush2.bf16.msra.mxu1 %v8678_v20  ;;  %5796 = vmatprep.subr.bf16.mxu0 %v8683_v58  ;;  %v8723_v20 = vld [vmem:[#allocation5 + $0x1408] ss:$16 sps:$4 sm:$0xff]  }
 0x331   :  { %5839 = vmatprep.subr.bf16.mxu1 %v8686_v59  ;;  %v8726_v58 = vld [vmem:[#allocation5 + $0x1608] ss:$16 sps:$4 sm:$0xff]   ;;  %v8731_v59 = vld [vmem:[#allocation5 + $0x15ec] ss:$16 sps:$4 sm:$0xff]  }
 0x332   :  { %5743 = vmatmul.mubr.bf16.vlgmr.msra.gmra.mxu0 %v9277_v31  ;;  %v8701_v31 = vld [vmem:[#allocation5 + $0x148c] ss:$16 sps:$4 sm:$0xff]  }
 0x333   :  { %5786 = vmatmul.mubr.bf16.vlgmr.msra.gmra.mxu1 %v9279_v32  ;;  %5797 = vmatpush1.bf16.msra.mxu0 %v8681_v24  ;;  %v8704_v32 = vld [vmem:[#allocation5 + $0x168c] ss:$16 sps:$4 sm:$0xff]   ;;  %v4930_v24 = vadd.f32 %v9269_v44, %v4887_v12  ;;  %v8735_v44 = vld [vmem:[#allocation5 + $0x15c8] ss:$16 sps:$4 sm:$0xff]  }
 0x334   :  { %5840 = vmatpush1.bf16.msra.mxu1 %v8684_v14  ;;  %5798 = vmatprep.subr.bf16.mxu0 %v8689_v62  ;;  %v4977_v14 = vadd.f32 %v9307_v50, %v4934_v13  ;;  %v8738_v50 = vld [vmem:[#allocation5 + $0x17c8] ss:$16 sps:$4 sm:$0xff]   ;;  %v8776_v12 = vld [vmem:[#allocation5 + $0x170c] ss:$16 sps:$4 sm:$0xff]  }
 0x335   :  { %5841 = vmatprep.subr.bf16.mxu1 %v8692_v45  ;;  %5828 = vmatprep.mubr.bf16.mxu0 %v9285_v42  ;;  %v8705_v42 = vld [vmem:[#allocation5 + $0x1468] ss:$16 sps:$4 sm:$0xff]   ;;  %v4973_v62 = vadd.f32 %v9292_v55, %v4930_v24  ;;  %v8743_v55 = vld [vmem:[#allocation5 + $0x15ac] ss:$16 sps:$4 sm:$0xff]  }
 0x336   :  { %5871 = vmatprep.mubr.bf16.mxu1 %v9287_v48  ;;  %v8708_v48 = vld [vmem:[#allocation5 + $0x1668] ss:$16 sps:$4 sm:$0xff]   ;;  %v8777_v24 = vld [vmem:[#allocation8 + $0x70] ss:$8 sps:$4 sm:$0xff]  }
 0x337   :  { %5799 = vmatpush1.bf16.msra.mxu0 %v8687_v47  ;;  %v8729_v45 = vld [vmem:[#allocation5 + $0x15e8] ss:$16 sps:$4 sm:$0xff]   ;;  %v8740_v47 = vld [vmem:[#allocation5 + $0x17cc] ss:$16 sps:$4 sm:$0xff]  }
 0x338   :  { %5842 = vmatpush1.bf16.msra.mxu1 %v8690_v37  ;;  %5800 = vmatprep.subr.bf16.mxu0 %v8695_v17  ;;  %v5020_v37 = vadd.f32 %v9309_v4, %v4977_v14  ;;  %v5016_v17 = vadd.f32 %v9294_v56, %v4973_v62  ;;  %v8744_v4 = vld [vmem:[#allocation5 + $0x17a8] ss:$16 sps:$4 sm:$0xff]   ;;  %v8749_v56 = vld [vmem:[#allocation5 + $0x158c] ss:$16 sps:$4 sm:$0xff]  }
 0x339   :  { %5843 = vmatprep.subr.bf16.mxu1 %v8698_v18  ;;  %v8782_v14 = vld [vmem:[#allocation8 + $0x64] ss:$8 sps:$4 sm:$0xff]  }
 0x33a   :  { %v5063_v18 = vadd.f32 %v9325_v25, %v5020_v37  ;;  %v8752_v25 = vld [vmem:[#allocation5 + $0x178c] ss:$16 sps:$4 sm:$0xff]  }
 0x33b   :  { %5801 = vmatpush1.bf16.msra.mxu0 %v8693_v0  ;;  %v8746_v0 = vld [vmem:[#allocation5 + $0x17ac] ss:$16 sps:$4 sm:$0xff]  }
 0x33c   :  { %5844 = vmatpush1.bf16.msra.mxu1 %v8696_v23  ;;  %5802 = vmatprep.subr.bf16.mxu0 %v8701_v31  ;;  %v5059_v23 = vadd.f32 %v9314_v15, %v5016_v17  ;;  %v5106_v31 = vadd.f32 %v9327_v30, %v5063_v18  ;;  %v8750_v15 = vld [vmem:[#allocation5 + $0x1788] ss:$16 sps:$4 sm:$0xff]   ;;  %v8755_v30 = vld [vmem:[#allocation5 + $0x156c] ss:$16 sps:$4 sm:$0xff]  }
 0x33d   :  { %5845 = vmatprep.subr.bf16.mxu1 %v8704_v32  ;;  %v8741_v32 = vld [vmem:[#allocation5 + $0x15a8] ss:$16 sps:$4 sm:$0xff]   ;;  %v8825_v37 = vld [vmem:[#allocation8 + $0x170] ss:$8 sps:$4 sm:$0xff]  }
 0x33e   :  { %v8827_v17 = vld [vmem:[#allocation8 + $0x174] ss:$8 sps:$4 sm:$0xff]  }
 0x33f   :  { %5803 = vmatpush1.bf16.msra.mxu0 %v8699_v1  ;;  %v5102_v1 = vadd.f32 %v9316_v16, %v5059_v23  ;;  %v8753_v16 = vld [vmem:[#allocation5 + $0x1568] ss:$16 sps:$4 sm:$0xff]   ;;  %v8792_v23 = vld [vmem:[#allocation8 + $0x20] ss:$8 sps:$4 sm:$0xff]  }
 0x340   :  { %5846 = vmatpush1.bf16.msra.mxu1 %v8702_v8  ;;  %5804 = vmatprep.subr.bf16.mxu0 %v8707_v26  ;;  %v5149_v8 = vadd.f32 %v9343_v9, %v5106_v31  ;;  %v8756_v9 = vld [vmem:[#allocation5 + $0x1768] ss:$16 sps:$4 sm:$0xff]  }
 0x341   :  { %5847 = vmatprep.subr.bf16.mxu1 %v8710_v27  ;;  %v5145_v26 = vadd.f32 %v9332_v51, %v5102_v1  ;;  %v8747_v27 = vld [vmem:[#allocation5 + $0x1588] ss:$16 sps:$4 sm:$0xff]   ;;  %v8761_v51 = vld [vmem:[#allocation5 + $0x154c] ss:$16 sps:$4 sm:$0xff]  }
 0x342   :  { %v8791_v18 = vld [vmem:[#allocation8 + $0x34] ss:$8 sps:$4 sm:$0xff]   ;;  %v8836_v31 = vld [vmem:[#allocation8 + $0x144] ss:$8 sps:$4 sm:$0xff]  }
 0x343   :  { %5805 = vmatpush1.bf16.msra.mxu0 %v8705_v42  ;;  %v8758_v42 = vld [vmem:[#allocation5 + $0x176c] ss:$16 sps:$4 sm:$0xff]   ;;  %v8800_v1 = vld [vmem:[#allocation8 + $0x4] ss:$8 sps:$4 sm:$0xff]  }
 0x344   :  { %5848 = vmatpush1.bf16.msra.mxu1 %v8708_v48  ;;  %5806 = vmatprep.subr.bf16.mxu0 %v8713_v38  ;;  %v5192_v48 = vadd.f32 %v9345_v10, %v5149_v8  ;;  %v5188_v38 = vadd.f32 %v9334_v52, %v5145_v26  ;;  %v8759_v10 = vld [vmem:[#allocation5 + $0x1548] ss:$16 sps:$4 sm:$0xff]   ;;  %v8767_v52 = vld [vmem:[#allocation5 + $0x152c] ss:$16 sps:$4 sm:$0xff]  }
 0x345   :  { %5849 = vmatprep.subr.bf16.mxu1 %v8716_v39  ;;  %v8837_v8 = vld [vmem:[#allocation8 + $0x130] ss:$8 sps:$4 sm:$0xff]   ;;  %v8798_v26 = vld [vmem:[#allocation8] ss:$8 sps:$4 sm:$0xff]  }
 0x346   :  { %v5235_v39 = vadd.f32 %v9361_v53, %v5192_v48  ;;  %v8770_v53 = vld [vmem:[#allocation5 + $0x172c] ss:$16 sps:$4 sm:$0xff]   ;;  %v8845_v48 = vld [vmem:[#allocation8 + $0x114] ss:$8 sps:$4 sm:$0xff]  }
 0x347   :  { %5807 = vmatpush1.bf16.msra.mxu0 %v8711_v29  ;;  %v8764_v29 = vld [vmem:[#allocation5 + $0x174c] ss:$16 sps:$4 sm:$0xff]  }
 0x348   :  { %5850 = vmatpush1.bf16.msra.mxu1 %v8714_v35  ;;  %5808 = vmatprep.subr.bf16.mxu0 %v8719_v36  ;;  %v5231_v35 = vadd.f32 %v9350_v21, %v5188_v38  ;;  %v5320_v36 = vpop.f32.mrf.mxu0  ;;  %v8768_v21 = vld [vmem:[#allocation5 + $0x1728] ss:$16 sps:$4 sm:$0xff]  }
 0x349   :  { %5851 = vmatprep.subr.bf16.mxu1 %v8722_v63  ;;  %v5278_v63 = vadd.f32 %v9363_v54, %v5235_v39  ;;  %v8773_v54 = vld [vmem:[#allocation5 + $0x150c] ss:$16 sps:$4 sm:$0xff]   ;;  %v8806_v38 = vld [vmem:[#allocation8 + $0xe4] ss:$8 sps:$4 sm:$0xff]  }
 0x34a   :  { %v5274_v40 = vadd.f32 %v9352_v22, %v5231_v35  ;;  %v8779_v22 = vld [vmem:[#allocation8 + $0x74] ss:$8 sps:$4 sm:$0xff]   ;;  %v8843_v39 = vld [vmem:[#allocation8 + $0x110] ss:$8 sps:$4 sm:$0xff]  }
 0x34b   :  { %5809 = vmatpush1.bf16.msra.mxu0 %v8717_v46  ;;  %v5321_v46 = vadd.f32 %v5320_v36, %v5278_v63  ;;  %v8807_v35 = vld [vmem:[#allocation8 + $0xd0] ss:$8 sps:$4 sm:$0xff]   ;;  %v8851_v36 = vld [vmem:[#allocation8 + $0x1f4] ss:$8 sps:$4 sm:$0xff]   ;;  %v8812_v63 = vld [vmem:[#allocation8 + $0xc4] ss:$8 sps:$4 sm:$0xff]  }
 0x34c   :  { %5852 = vmatpush1.bf16.msra.mxu1 %v8720_v11  ;;  %5810 = vmatprep.subr.bf16.mxu0 %v8725_v57  ;;  %v5317_v11 = vadd.f32 %v9368_v5, %v5274_v40  ;;  %v8765_v57 = vld [vmem:[#allocation5 + $0x1528] ss:$16 sps:$4 sm:$0xff]   ;;  %v8852_v40 = vld [vmem:[#allocation8 + $0x1e0] ss:$8 sps:$4 sm:$0xff]  }
 0x34d   :  { %5853 = vmatprep.subr.bf16.mxu1 %v8728_v60  ;;  %v5363_v60 = vpop.f32.mrf.mxu1 }
 0x34e   :  { %v5364_v13 = vadd.f32 %v5363_v60, %v5321_v46  ;;  %v8813_v46 = vld [vmem:[#allocation8 + $0xb0] ss:$8 sps:$4 sm:$0xff]   ;;  %v8816_v60 = vld [vmem:[#allocation8 + $0xa0] ss:$8 sps:$4 sm:$0xff]  }
 0x34f   :  { %5811 = vmatpush1.bf16.msra.mxu0 %v8723_v20  ;;  %v5360_v20 = vadd.f32 %v9370_v6, %v5317_v11  ;;  %v8780_v6 = vld [vmem:[#allocation8 + $0x60] ss:$8 sps:$4 sm:$0xff]   ;;  %v8857_v11 = vld [vmem:[#allocation8 + $0x1d4] ss:$8 sps:$4 sm:$0xff]  }
 0x350   :  { %5854 = vmatpush1.bf16.msra.mxu1 %v8726_v58  ;;  %5812 = vmatprep.subr.bf16.mxu0 %v8731_v59  ;;  %v8771_v58 = vld [vmem:[#allocation5 + $0x1508] ss:$16 sps:$4 sm:$0xff]   ;;  %v5887_v5 = vmax.f32 %v5364_v13, 0.0  ;;  %v8858_v13 = vld [vmem:[#allocation8 + $0x1c0] ss:$8 sps:$4 sm:$0xff]  }
 0x351   :  { %5855 = vmatprep.subr.bf16.mxu1 %v8734_v33  ;;  %v8774_v59 = vld [vmem:[#allocation5 + $0x1708] ss:$16 sps:$4 sm:$0xff]   ;;  %v5883_v33 = vmax.f32 %v5360_v20, 0.0  ;;  %v8819_v20 = vld [vmem:[#allocation8 + $0x90] ss:$8 sps:$4 sm:$0xff]  }
 0x353   :  { %5813 = vmatpush2.bf16.msra.mxu0 %v8729_v45  ;;  %v5891_v62 = vpack.c.bf16 %v5887_v5, %v5883_v33  ;;  %v8785_v45 = vld [vmem:[#allocation8 + $0x54] ss:$8 sps:$4 sm:$0xff]   ;;  %v8861_v5 = vld [vmem:[#allocation8 + $0x1b0] ss:$8 sps:$4 sm:$0xff]   ;;  %v8866_v33 = vld [vmem:[#allocation8 + $0x1a4] ss:$8 sps:$4 sm:$0xff]  }
 0x354   :  { %5856 = vmatpush2.bf16.msra.mxu1 %v8732_v43  ;;  %5814 = vmatprep.subr.bf16.mxu0 %v8737_v34  ;;  %v8783_v43 = vld [vmem:[#allocation8 + $0x50] ss:$8 sps:$4 sm:$0xff]   ;;  %v8788_v34 = vld [vmem:[#allocation8 + $0x44] ss:$8 sps:$4 sm:$0xff]  }
 0x355   :  { %5857 = vmatprep.subr.bf16.mxu1 %v8740_v47  ;;  %v8786_v47 = vld [vmem:[#allocation8 + $0x40] ss:$8 sps:$4 sm:$0xff]  }
 0x357   :  { %5815 = vmatpush2.bf16.msra.mxu0 %v8735_v44  ;;  %v8830_v44 = vld [vmem:[#allocation8 + $0x164] ss:$8 sps:$4 sm:$0xff]  }
 0x358   :  { %5858 = vmatpush2.bf16.msra.mxu1 %v8738_v50  ;;  %5816 = vmatprep.subr.bf16.mxu0 %v8743_v55  ;;  %v8833_v50 = vld [vmem:[#allocation8 + $0x154] ss:$8 sps:$4 sm:$0xff]   ;;  %v8794_v55 = vld [vmem:[#allocation8 + $0x24] ss:$8 sps:$4 sm:$0xff]  }
 0x359   :  { %5859 = vmatprep.subr.bf16.mxu1 %v8746_v0  ;;  %v8831_v0 = vld [vmem:[#allocation8 + $0x150] ss:$8 sps:$4 sm:$0xff]  }
 0x35b   :  { %5817 = vmatpush2.bf16.msra.mxu0 %v8741_v32  ;;  %v8797_v32 = vld [vmem:[#allocation8 + $0x14] ss:$8 sps:$4 sm:$0xff]  }
 0x35c   :  { %5860 = vmatpush2.bf16.msra.mxu1 %v8744_v4  ;;  %5818 = vmatprep.subr.bf16.mxu0 %v8749_v56  ;;  %v8834_v4 = vld [vmem:[#allocation8 + $0x140] ss:$8 sps:$4 sm:$0xff]   ;;  %v8795_v56 = vld [vmem:[#allocation8 + $0x10] ss:$8 sps:$4 sm:$0xff]  }
 0x35d   :  { %5861 = vmatprep.subr.bf16.mxu1 %v8752_v25  ;;  %v8839_v25 = vld [vmem:[#allocation8 + $0x134] ss:$8 sps:$4 sm:$0xff]  }
 0x35f   :  { %5819 = vmatpush2.bf16.msra.mxu0 %v8747_v27  ;;  %v8842_v27 = vld [vmem:[#allocation8 + $0x124] ss:$8 sps:$4 sm:$0xff]  }
 0x360   :  { %5862 = vmatpush2.bf16.msra.mxu1 %v8750_v15  ;;  %5820 = vmatprep.subr.bf16.mxu0 %v8755_v30  ;;  %v8803_v15 = vld [vmem:[#allocation8 + $0xf4] ss:$8 sps:$4 sm:$0xff]   ;;  %v8840_v30 = vld [vmem:[#allocation8 + $0x120] ss:$8 sps:$4 sm:$0xff]  }
 0x361   :  { %5863 = vmatprep.subr.bf16.mxu1 %v8758_v42  ;;  %v8801_v42 = vld [vmem:[#allocation8 + $0xf0] ss:$8 sps:$4 sm:$0xff]  }
 0x363   :  { %5821 = vmatpush2.bf16.msra.mxu0 %v8753_v16  ;;  %v8804_v16 = vld [vmem:[#allocation8 + $0xe0] ss:$8 sps:$4 sm:$0xff]  }
 0x364   :  { %5864 = vmatpush2.bf16.msra.mxu1 %v8756_v9  ;;  %5822 = vmatprep.subr.bf16.mxu0 %v8761_v51  ;;  %v8848_v9 = vld [vmem:[#allocation8 + $0x104] ss:$8 sps:$4 sm:$0xff]   ;;  %v8809_v51 = vld [vmem:[#allocation8 + $0xd4] ss:$8 sps:$4 sm:$0xff]  }
 0x365   :  { %5865 = vmatprep.subr.bf16.mxu1 %v8764_v29  ;;  %v8846_v29 = vld [vmem:[#allocation8 + $0x100] ss:$8 sps:$4 sm:$0xff]  }
 0x367   :  { %5823 = vmatpush2.bf16.msra.mxu0 %v8759_v10  ;;  %v8849_v10 = vld [vmem:[#allocation8 + $0x1f0] ss:$8 sps:$4 sm:$0xff]  }
 0x368   :  { %5866 = vmatpush2.bf16.msra.mxu1 %v8762_v49  ;;  %5824 = vmatprep.subr.bf16.mxu0 %v8767_v52  ;;  %v8810_v49 = vld [vmem:[#allocation8 + $0xc0] ss:$8 sps:$4 sm:$0xff]   ;;  %v8854_v52 = vld [vmem:[#allocation8 + $0x1e4] ss:$8 sps:$4 sm:$0xff]  }
 0x369   :  { %5867 = vmatprep.subr.bf16.mxu1 %v8770_v53  ;;  %v8815_v53 = vld [vmem:[#allocation8 + $0xb4] ss:$8 sps:$4 sm:$0xff]  }
 0x36b   :  { %5825 = vmatpush2.bf16.msra.mxu0 %v8765_v57  ;;  %v8818_v57 = vld [vmem:[#allocation8 + $0xa4] ss:$8 sps:$4 sm:$0xff]  }
 0x36c   :  { %5868 = vmatpush2.bf16.msra.mxu1 %v8768_v21  ;;  %5826 = vmatprep.subr.bf16.mxu0 %v8773_v54  ;;  %v8855_v21 = vld [vmem:[#allocation8 + $0x1d0] ss:$8 sps:$4 sm:$0xff]   ;;  %v8860_v54 = vld [vmem:[#allocation8 + $0x1c4] ss:$8 sps:$4 sm:$0xff]  }
 0x36d   :  { %5869 = vmatprep.subr.bf16.mxu1 %v8776_v12  ;;  %v8821_v12 = vld [vmem:[#allocation8 + $0x94] ss:$8 sps:$4 sm:$0xff]  }
 0x36f   :  { %5827 = vmatpush2.bf16.msra.mxu0 %v8771_v58  ;;  %v8824_v58 = vld [vmem:[#allocation8 + $0x84] ss:$8 sps:$4 sm:$0xff]  }
 0x370   :  { %5870 = vmatpush2.bf16.msra.mxu1 %v8774_v59  ;;  %6290 = vmatprep.subr.bf16.mxu0 %v8779_v22  ;;  %v8822_v59 = vld [vmem:[#allocation8 + $0x80] ss:$8 sps:$4 sm:$0xff]   ;;  %v8863_v22 = vld [vmem:[#allocation8 + $0x1b4] ss:$8 sps:$4 sm:$0xff]  }
 0x371   :  { %6333 = vmatprep.subr.bf16.mxu1 %v8827_v17 }
 0x372   :  { %5829 = vmatmul.mubr.bf16.vlgmr.msra.gmra.mxu0 %v9303_v2  ;;  %v8828_v2 = vld [vmem:[#allocation8 + $0x160] ss:$8 sps:$4 sm:$0xff]  }
 0x373   :  { %5872 = vmatmul.mubr.bf16.vlgmr.msra.gmra.mxu1 %v9305_v3  ;;  %6291 = vmatpush1.bf16.msra.mxu0 %v8777_v24  ;;  %v8789_v3 = vld [vmem:[#allocation8 + $0x30] ss:$8 sps:$4 sm:$0xff]   ;;  %v8864_v24 = vld [vmem:[#allocation8 + $0x1a0] ss:$8 sps:$4 sm:$0xff]  }
 0x374   :  { %6322 = vmatprep.mubr.bf16.mxu0 %v5891_v62  ;;  %6292 = vmatprep.subr.bf16.mxu0 %v8782_v14  ;;  %v8869_v14 = vld [vmem:[#allocation8 + $0x194] ss:$8 sps:$4 sm:$0xff]   ;;  %v8867_v62 = vld [vmem:[#allocation8 + $0x190] ss:$8 sps:$4 sm:$0xff]  }
 0x375   :  { %6334 = vmatpush1.bf16.msra.mxu1 %v8825_v37 }
 0x376   :  { %6335 = vmatprep.subr.bf16.mxu1 %v8830_v44 }
 0x377   :  { %6293 = vmatpush1.bf16.msra.mxu0 %v8780_v6  ;;  %v8872_v6 = vld [vmem:[#allocation8 + $0x184] ss:$8 sps:$4 sm:$0xff]  }
 0x378   :  { %6294 = vmatprep.subr.bf16.mxu0 %v8785_v45  ;;  %v8870_v45 = vld [vmem:[#allocation8 + $0x180] ss:$8 sps:$4 sm:$0xff]  }
 0x379   :  { %6336 = vmatpush1.bf16.msra.mxu1 %v8828_v2  ;;  %v8873_v2 = vld [vmem:[#allocation11 + $0x78] sm:$0xff]  }
 0x37a   :  { %6337 = vmatprep.subr.bf16.mxu1 %v8833_v50  ;;  %v8875_v50 = vld [vmem:[#allocation11 + $0x70] sm:$0xff]  }
 0x37b   :  { %6295 = vmatpush1.bf16.msra.mxu0 %v8783_v43  ;;  %v5400_v43 = vpop.f32.mrf.mxu0 }
 0x37c   :  { %6296 = vmatprep.subr.bf16.mxu0 %v8788_v34  ;;  %v5443_v34 = vpop.f32.mrf.mxu1 }
 0x37d   :  { %6338 = vmatpush1.bf16.msra.mxu1 %v8831_v0 }
 0x37e   :  { %6339 = vmatprep.subr.bf16.mxu1 %v8836_v31  ;;  %v5445_v37 = vpop.f32.mrf.mxu1  ;;  %v8877_v31 = vld [vmem:[#allocation11 + $0x68] sm:$0xff]  }
 0x37f   :  { %6297 = vmatpush1.bf16.msra.mxu0 %v8786_v47  ;;  %v5402_v47 = vpop.f32.mrf.mxu0 }
 0x380   :  { %6298 = vmatprep.subr.bf16.mxu0 %v8791_v18 }
 0x381   :  { %6340 = vmatpush1.bf16.msra.mxu1 %v8834_v4  ;;  %v5404_v17 = vpop.f32.mrf.mxu0 }
 0x382   :  { %6341 = vmatprep.subr.bf16.mxu1 %v8839_v25  ;;  %v8879_v25 = vld [vmem:[#allocation11 + $0x60] sm:$0xff]  }
 0x383   :  { %6299 = vmatpush1.bf16.msra.mxu0 %v8789_v3  ;;  %v5406_v18 = vpop.f32.mrf.mxu0  ;;  %v8874_v3 = vld [vmem:[#allocation11 + $0x38] sm:$0xff]  }
 0x384   :  { %6300 = vmatprep.subr.bf16.mxu0 %v8794_v55 }
 0x385   :  { %6342 = vmatpush1.bf16.msra.mxu1 %v8837_v8  ;;  %v5486_v55 = vpop.f32.mrf.mxu0 }
 0x386   :  { %6343 = vmatprep.subr.bf16.mxu1 %v8842_v27  ;;  %v8881_v27 = vld [vmem:[#allocation11 + $0x58] sm:$0xff]  }
 0x387   :  { %6301 = vmatpush1.bf16.msra.mxu0 %v8792_v23  ;;  %v8876_v23 = vld [vmem:[#allocation11 + $0x30] sm:$0xff]  }
 0x388   :  { %6302 = vmatprep.subr.bf16.mxu0 %v8797_v32  ;;  %v5488_v32 = vpop.f32.mrf.mxu0 }
 0x389   :  { %6344 = vmatpush1.bf16.msra.mxu1 %v8840_v30 }
 0x38a   :  { %6345 = vmatprep.subr.bf16.mxu1 %v8845_v48 }
 0x38b   :  { %6303 = vmatpush1.bf16.msra.mxu0 %v8795_v56  ;;  %v8878_v56 = vld [vmem:[#allocation11 + $0x28] sm:$0xff]  }
 0x38c   :  { %6304 = vmatprep.subr.bf16.mxu0 %v8800_v1  ;;  %v5490_v1 = vpop.f32.mrf.mxu0 }
 0x38d   :  { %6346 = vmatpush1.bf16.msra.mxu1 %v8843_v39 }
 0x38e   :  { %6347 = vmatprep.subr.bf16.mxu1 %v8848_v9  ;;  %v1004_v9 = vsub.s32 3, %v9252_v7 }
 0x38f   :  { %6305 = vmatpush1.bf16.msra.mxu0 %v8798_v26  ;;  %v8880_v26 = vld [vmem:[#allocation11 + $0x20] sm:$0xff]  }
 0x390   :  { %6306 = vmatprep.subr.bf16.mxu0 %v8803_v15  ;;  %v5492_v15 = vpop.f32.mrf.mxu0 }
 0x391   :  { %6348 = vmatpush1.bf16.msra.mxu1 %v8846_v29 }
 0x392   :  { %6349 = vmatprep.subr.bf16.mxu1 %v8851_v36  ;;  %v1005_v36 = vrot.slane %v9386_v41, %v1004_v9 }
 0x393   :  { %6307 = vmatpush2.bf16.msra.mxu0 %v8801_v42  ;;  %v5572_v42 = vpop.f32.mrf.mxu0 }
 0x394   :  { %6308 = vmatprep.subr.bf16.mxu0 %v8806_v38  ;;  %v8882_v38 = vld [vmem:[#allocation11 + $0x18] sm:$0xff]  }
 0x395   :  { %6350 = vmatpush2.bf16.msra.mxu1 %v8849_v10  ;;  %v5574_v39 = vpop.f32.mrf.mxu0 }
 0x396   :  { %6351 = vmatprep.subr.bf16.mxu1 %v8854_v52 }
 0x397   :  { %6309 = vmatpush2.bf16.msra.mxu0 %v8804_v16  ;;  %v5576_v29 = vpop.f32.mrf.mxu0 }
 0x398   :  { %6310 = vmatprep.subr.bf16.mxu0 %v8809_v51  ;;  %v1000_v51 = vsub.s32 2, %v9252_v7 }
 0x399   :  { %6352 = vmatpush2.bf16.msra.mxu1 %v8852_v40  ;;  %v5578_v10 = vpop.f32.mrf.mxu0  ;;  %v5403_v40 = vadd.f32 %v5402_v47, %v1005_v36 }
 0x39a   :  { %6353 = vmatprep.subr.bf16.mxu1 %v8857_v11 }
 0x39b   :  { %6311 = vmatpush2.bf16.msra.mxu0 %v8807_v35 }
 0x39c   :  { %6312 = vmatprep.subr.bf16.mxu0 %v8812_v63  ;;  %v1001_v63 = vrot.slane %v9386_v41, %v1000_v51 }
 0x39d   :  { %6354 = vmatpush2.bf16.msra.mxu1 %v8855_v21 }
 0x39e   :  { %6355 = vmatprep.subr.bf16.mxu1 %v8860_v54  ;;  %v5405_v11 = vadd.f32 %v5404_v17, %v1001_v63  ;;  %v5407_v54 = vadd.f32 %v5406_v18, %v1005_v36 }
 0x39f   :  { %6313 = vmatpush2.bf16.msra.mxu0 %v8810_v49 }
 0x3a0   :  { %6314 = vmatprep.subr.bf16.mxu0 %v8815_v53 }
 0x3a1   :  { %6356 = vmatpush2.bf16.msra.mxu1 %v8858_v13 }
 0x3a2   :  { %6357 = vmatprep.subr.bf16.mxu1 %v8863_v22 }
 0x3a3   :  { %6315 = vmatpush2.bf16.msra.mxu0 %v8813_v46  ;;  %v5401_v46 = vadd.f32 %v5400_v43, %v1001_v63 }
 0x3a4   :  { %6316 = vmatprep.subr.bf16.mxu0 %v8818_v57 }
 0x3a5   :  { %6358 = vmatpush2.bf16.msra.mxu1 %v8861_v5 }
 0x3a6   :  { %6359 = vmatprep.subr.bf16.mxu1 %v8866_v33 }
 0x3a7   :  { %6317 = vmatpush2.bf16.msra.mxu0 %v8816_v60  ;;  %v5446_v60 = vadd.f32 %v5445_v37, %v5403_v40 }
 0x3a8   :  { %6318 = vmatprep.subr.bf16.mxu0 %v8821_v12  ;;  %v5444_v12 = vadd.f32 %v5443_v34, %v5401_v46 }
 0x3a9   :  { %6360 = vmatpush2.bf16.msra.mxu1 %v8864_v24 }
 0x3aa   :  { %6361 = vmatprep.subr.bf16.mxu1 %v8869_v14 }
 0x3ab   :  { %6319 = vmatpush2.bf16.msra.mxu0 %v8819_v20  ;;  %v5489_v20 = vadd.f32 %v5488_v32, %v5446_v60 }
 0x3ac   :  { %6320 = vmatprep.subr.bf16.mxu0 %v8824_v58  ;;  %v5487_v58 = vadd.f32 %v5486_v55, %v5444_v12 }
 0x3ad   :  { %6362 = vmatpush2.bf16.msra.mxu1 %v8867_v62 }
 0x3ae   :  { %6363 = vmatprep.subr.bf16.mxu1 %v8872_v6 }
 0x3af   :  { %6321 = vmatpush2.bf16.msra.mxu0 %v8822_v59 }
 0x3b0   :  { %7554 = vmatprep.subr.bf16.mxu0 %v8873_v2 }
 0x3b1   :  { %6364 = vmatpush2.bf16.msra.mxu1 %v8870_v45 }
 0x3b2   :  { %6323 = vmatmul.mubr.bf16.vlgmr.msra.gmra.mxu0 %v9375_v61  ;;  %v5447_v61 = vpop.f32.mrf.mxu1  ;;  %v5658_v52 = vpop.f32.mrf.mxu0 }
 0x3b3   :  { %7555 = vmatpush3.bf16.msra.mxu0 %v8874_v3  ;;  %v5448_v13 = vadd.f32 %v5447_v61, %v5405_v11 }
 0x3b4   :  { %v5449_v44 = vpop.f32.mrf.mxu1  ;;  %7556 = vmatprep.subr.bf16.mxu0 %v8875_v50  ;;  %v5660_v57 = vpop.f32.mrf.mxu0 }
 0x3b5   :  { %v5450_v5 = vadd.f32 %v5449_v44, %v5407_v54  ;;  %v5491_v33 = vadd.f32 %v5490_v1, %v5448_v13 }
 0x3b6   :  { %v5529_v0 = vpop.f32.mrf.mxu1  ;;  %v5662_v59 = vpop.f32.mrf.mxu0 }
 0x3b7   :  { %7557 = vmatpush3.bf16.msra.mxu0 %v8876_v23  ;;  %v5493_v24 = vadd.f32 %v5492_v15, %v5450_v5  ;;  %v5530_v14 = vadd.f32 %v5529_v0, %v5487_v58 }
 0x3b8   :  { %v5531_v4 = vpop.f32.mrf.mxu1  ;;  %7558 = vmatprep.subr.bf16.mxu0 %v8877_v31  ;;  %v5664_v62 = vpop.f32.mrf.mxu0 }
 0x3b9   :  { %v5532_v41 = vadd.f32 %v5531_v4, %v5489_v20  ;;  %v5573_v47 = vadd.f32 %v5572_v42, %v5530_v14  ;;  %v8885_v14 = vld [vmem:[#allocation11 + $0x48] sm:$0xff]  }
 0x3ba   :  { %v5533_v8 = vpop.f32.mrf.mxu1 }
 0x3bb   :  { %7559 = vmatpush3.bf16.msra.mxu0 %v8878_v56  ;;  %v5534_v45 = vadd.f32 %v5533_v8, %v5491_v33  ;;  %v5575_v43 = vadd.f32 %v5574_v39, %v5532_v41  ;;  %v8883_v41 = vld [vmem:[#allocation11 + $0x50] sm:$0xff]  }
 0x3bc   :  { %7560 = vmatprep.subr.bf16.mxu0 %v8879_v25  ;;  %v5535_v30 = vpop.f32.mrf.mxu1 }
 0x3bd   :  { %v5536_v37 = vadd.f32 %v5535_v30, %v5493_v24  ;;  %v5577_v18 = vadd.f32 %v5576_v29, %v5534_v45  ;;  %v8884_v24 = vld [vmem:[#allocation11 + $0x10] sm:$0xff]   ;;  %v8888_v45 = vld [vmem:[#allocation11] sm:$0xff]  }
 0x3be   :  { %v5615_v48 = vpop.f32.mrf.mxu1 }
 0x3bf   :  { %7561 = vmatpush3.bf16.msra.mxu0 %v8880_v26  ;;  %v5579_v61 = vadd.f32 %v5578_v10, %v5536_v37  ;;  %v5616_v3 = vadd.f32 %v5615_v48, %v5573_v47  ;;  %v9127_v47 = vmov 0.0   ;;  %v8892_v37 = vld [vmem:[#allocation14 + $0x20] sm:$0xff]  }
 0x3c0   :  { %7562 = vmatprep.subr.bf16.mxu0 %v8881_v27  ;;  %v5617_v16 = vpop.f32.mrf.mxu1  ;;  %7585 = vmatprep.subr.bf16.mxu1 %v9127_v47 }
 0x3c1   :  { %v5618_v34 = vadd.f32 %v5617_v16, %v5575_v43  ;;  %v5659_v31 = vadd.f32 %v5658_v52, %v5616_v3  ;;  %v8889_v43 = vld [vmem:[#allocation14 + $0x38] sm:$0xff]  }
 0x3c2   :  { %v5619_v35 = vpop.f32.mrf.mxu1 }
 0x3c3   :  { %7563 = vmatpush3.bf16.msra.mxu0 %v8882_v38  ;;  %v5620_v23 = vadd.f32 %v5619_v35, %v5577_v18  ;;  %v5661_v44 = vadd.f32 %v5660_v57, %v5618_v34 }
 0x3c4   :  { %v5621_v49 = vpop.f32.mrf.mxu1  ;;  %7564 = vmatprep.subr.bf16.mxu0 %v8883_v41 }
 0x3c5   :  { %v5622_v32 = vadd.f32 %v5621_v49, %v5579_v61  ;;  %v5663_v4 = vadd.f32 %v5662_v59, %v5620_v23  ;;  %v5958_v61 = vld [vmem:[#allocation10] sm:$0x3] }
 0x3c6   :  { %v5701_v53 = vpop.f32.mrf.mxu1 }
 0x3c7   :  { %v5665_v1 = vadd.f32 %v5664_v62, %v5622_v32  ;;  %v5702_v8 = vadd.f32 %v5701_v53, %v5659_v31  ;;  %7565 = vmatpush3.bf16.msra.mxu0 %v8884_v24  ;;  %v8886_v62 = vld [vmem:[#allocation11 + $0x8] sm:$0xff]  }
 0x3c8   :  { %v5703_v21 = vpop.f32.mrf.mxu1  ;;  %7566 = vmatprep.subr.bf16.mxu0 %v8885_v14 }
 0x3c9   :  { %v5704_v25 = vadd.f32 %v5703_v21, %v5661_v44 }
 0x3ca   :  { %v5705_v22 = vpop.f32.mrf.mxu1 }
 0x3cb   :  { %v5706_v26 = vadd.f32 %v5705_v22, %v5663_v4  ;;  %7567 = vmatpush3.bf16.msra.mxu0 %v8886_v62 }
 0x3cc   :  { %v5707_v6 = vpop.f32.mrf.mxu1 }
 0x3cd   :  { %v5708_v38 = vadd.f32 %v5707_v6, %v5665_v1  ;;  %v8887_v6 = vld [vmem:[#allocation11 + $0x40] sm:$0xff]  }
 0x3ce   :  { %7568 = vmatprep.subr.bf16.mxu0 %v8887_v6 }
 0x3cf   :  { %7569 = vmatpush3.bf16.msra.mxu0 %v8888_v45 }
 0x3f2   :  { %v5744_v17 = vpop.f32.mrf.mxu0 }
 0x3f3   :  { %v5787_v2 = vpop.f32.mrf.mxu1  ;;  %v5745_v15 = vadd.f32 %v5744_v17, %v5702_v8  ;;  %v8890_v17 = vld [vmem:[#allocation14 + $0x30] sm:$0xff]  }
 0x3f4   :  { %v5746_v50 = vpop.f32.mrf.mxu0 }
 0x3f5   :  { %v5789_v55 = vpop.f32.mrf.mxu1  ;;  %v5747_v27 = vadd.f32 %v5746_v50, %v5704_v25  ;;  %v5788_v29 = vadd.f32 %v5787_v2, %v5745_v15  ;;  %v8891_v2 = vld [vmem:[#allocation14 + $0x28] sm:$0xff]   ;;  %v5967_v50 = vrot.slane %v5958_v61, %v996_v28 }
 0x3f6   :  { %v5748_v0 = vpop.f32.mrf.mxu0 }
 0x3f7   :  { %v5791_v56 = vpop.f32.mrf.mxu1  ;;  %v5749_v39 = vadd.f32 %v5748_v0, %v5706_v26  ;;  %v5790_v9 = vadd.f32 %v5789_v55, %v5747_v27  ;;  %v5963_v55 = vrot.slane %v5958_v61, %v992_v19  ;;  %v8893_v19 = vld [vmem:[#allocation14 + $0x18] sm:$0xff]  }
 0x3f8   :  { %v5750_v30 = vpop.f32.mrf.mxu0 }
 0x3f9   :  { %v5793_v42 = vpop.f32.mrf.mxu1  ;;  %v5751_v51 = vadd.f32 %v5750_v30, %v5708_v38  ;;  %v5792_v63 = vadd.f32 %v5791_v56, %v5749_v39 }
 0x3fb   :  { %v5794_v53 = vadd.f32 %v5793_v42, %v5751_v51 }
 0x432   :  { %v5830_v48 = vpop.f32.mrf.mxu0 }
 0x433   :  { %v5873_v16 = vpop.f32.mrf.mxu1  ;;  %v5831_v49 = vadd.f32 %v5830_v48, %v5788_v29  ;;  %v8894_v48 = vld [vmem:[#allocation14 + $0x10] sm:$0xff]  }
 0x434   :  { %v5832_v35 = vpop.f32.mrf.mxu0 }
 0x435   :  { %v5875_v36 = vpop.f32.mrf.mxu1  ;;  %v5833_v10 = vadd.f32 %v5832_v35, %v5790_v9  ;;  %v5874_v54 = vadd.f32 %v5873_v16, %v5831_v49  ;;  %v8895_v16 = vld [vmem:[#allocation14 + $0x8] sm:$0xff]   ;;  %v8896_v9 = vld [vmem:[#allocation14] sm:$0xff]  }
 0x436   :  { %v5834_v52 = vpop.f32.mrf.mxu0 }
 0x437   :  { %v5877_v40 = vpop.f32.mrf.mxu1  ;;  %v5835_v46 = vadd.f32 %v5834_v52, %v5792_v63  ;;  %v5876_v57 = vadd.f32 %v5875_v36, %v5833_v10  ;;  %v5884_v22 = vmax.f32 %v5874_v54, 0.0  ;;  %v7528_v36 = vld [vmem:[#allocation13] ss:$0 sm:$0xff] }
 0x438   :  { %v5836_v11 = vpop.f32.mrf.mxu0 }
 0x439   :  { %v5878_v21 = vadd.f32 %v5877_v40, %v5835_v46  ;;  %v5837_v60 = vadd.f32 %v5836_v11, %v5794_v53  ;;  %v5879_v12 = vpop.f32.mrf.mxu1  ;;  %v5885_v58 = vmax.f32 %v5876_v57, 0.0  ;;  %v7545_v57 = vld [vmem:[#allocation16] ss:$0 sm:$0xff] }
 0x43b   :  { %v5880_v13 = vadd.f32 %v5879_v12, %v5837_v60  ;;  %v5888_v20 = vmax.f32 %v5878_v21, 0.0 }
 0x43d   :  { %v5889_v59 = vmax.f32 %v5880_v13, 0.0  ;;  %v5892_v33 = vpack.c.bf16 %v5888_v20, %v5884_v22 }
 0x43f   :  { %v5893_v5 = vpack.c.bf16 %v5889_v59, %v5885_v58 }
 0x441   :  { %6365 = vmatprep.mubr.bf16.mxu1 %v5893_v5 }
 0x442   :  { %6366 = vmatmul.mubr.bf16.vlgmr.msra.gmra.mxu1 %v5892_v33 }
 0x443   :  { %7586 = vmatpush3.bf16.msra.mxu1 %v8889_v43  ;;  %7601 = vmatprep.mubr.msk.bf16.mxu1 %vm9128_vm0, %v9127_v47 }
 0x444   :  { %7587 = vmatprep.subr.bf16.mxu1 %v9127_v47 }
 0x447   :  { %7588 = vmatpush3.bf16.msra.mxu1 %v8890_v17 }
 0x448   :  { %7589 = vmatprep.subr.bf16.mxu1 %v9127_v47 }
 0x44b   :  { %7590 = vmatpush3.bf16.msra.mxu1 %v8891_v2 }
 0x44c   :  { %7591 = vmatprep.subr.bf16.mxu1 %v9127_v47 }
 0x44f   :  { %7592 = vmatpush3.bf16.msra.mxu1 %v8892_v37 }
 0x450   :  { %7593 = vmatprep.subr.bf16.mxu1 %v9127_v47 }
 0x453   :  { %7594 = vmatpush3.bf16.msra.mxu1 %v8893_v19 }
 0x454   :  { %7595 = vmatprep.subr.bf16.mxu1 %v9127_v47 }
 0x457   :  { %7596 = vmatpush3.bf16.msra.mxu1 %v8894_v48 }
 0x458   :  { %7597 = vmatprep.subr.bf16.mxu1 %v9127_v47 }
 0x45b   :  { %7598 = vmatpush3.bf16.msra.mxu1 %v8895_v16 }
 0x45c   :  { %7599 = vmatprep.subr.bf16.mxu1 %v9127_v47 }
 0x45f   :  { %7600 = vmatpush3.bf16.msra.mxu1 %v8896_v9 }
 0x472   :  { %v6324_v18 = vpop.f32.mrf.mxu0 }
 0x473   :  { %v6325_v0 = vadd.f32 %v6324_v18, %v5963_v55 }
 0x474   :  { %v6326_v34 = vpop.f32.mrf.mxu0 }
 0x475   :  { %v6327_v32 = vadd.f32 %v6326_v34, %v5967_v50 }
 0x476   :  { %v6328_v3 = vpop.f32.mrf.mxu0 }
 0x477   :  { %v6329_v4 = vadd.f32 %v6328_v3, %v5963_v55 }
 0x478   :  { %v6330_v44 = vpop.f32.mrf.mxu0 }
 0x479   :  { %v6331_v25 = vadd.f32 %v6330_v44, %v5967_v50 }
 0x502   :  { %v6367_v23 = vpop.f32.mrf.mxu1 }
 0x503   :  { %v6368_v26 = vadd.f32 %v6367_v23, %v6325_v0 }
 0x504   :  { %v6369_v31 = vpop.f32.mrf.mxu1 }
 0x505   :  { %v6370_v1 = vadd.f32 %v6369_v31, %v6327_v32  ;;  %v6376_v28 = vmax.f32 %v6368_v26, 0.0 }
 0x506   :  { %v6371_v56 = vpop.f32.mrf.mxu1 }
 0x507   :  { %v6372_v8 = vadd.f32 %v6371_v56, %v6329_v4  ;;  %v6377_v42 = vmax.f32 %v6370_v1, 0.0 }
 0x508   :  { %v6373_v27 = vpop.f32.mrf.mxu1 }
 0x509   :  { %v6374_v15 = vadd.f32 %v6373_v27, %v6331_v25  ;;  %v6378_v30 = vmax.f32 %v6372_v8, 0.0 }
 0x50b   :  { %v6379_v38 = vmax.f32 %v6374_v15, 0.0  ;;  %v6380_v7 = vpack.c.bf16 %v6378_v30, %v6376_v28 }
 0x50d   :  { %v6381_v39 = vpack.c.bf16 %v6379_v38, %v6377_v42 }
 0x50f   :  { %6549 = vmatprep.mubr.bf16.mxu0 %v6381_v39 }
 0x510   :  { %6550 = vmatmul.mubr.bf16.vlgmr.msra.gmra.mxu0 %v6380_v7 }
 0x5d0   :  { %v7570_v51 = vpop.f32.mrf.mxu0 }
 0x5d2   :  { %v7571_v29 = vpop.f32.mrf.mxu0 }
 0x5d3   :  { %v7572_v35 = vadd.f32 %v7571_v29, %v7570_v51 }
 0x5d4   :  { %v7573_v63 = vpop.f32.mrf.mxu0 }
 0x5d5   :  { %v6552_v49 = vadd.f32 %v7572_v35, %v7528_v36 }
 0x5d6   :  { %v7574_v10 = vpop.f32.mrf.mxu0 }
 0x5d7   :  { %v7575_v52 = vadd.f32 %v7574_v10, %v7573_v63  ;;  %v6558_v53 = vmax.f32 %v6552_v49, 0.0 }
 0x5d9   :  { %v6555_v40 = vadd.f32 %v7575_v52, %v7528_v36 }
 0x5db   :  { %v6559_v46 = vmax.f32 %v6555_v40, 0.0 }
 0x5dd   :  { %v6560_v11 = vpack.c.bf16 %v6559_v46, %v6558_v53 }
 0x5df   :  { %7602 = vmatmul.mubr.bf16.vlgmr.msra.gmra.mxu1 %v6560_v11 }
 0x69f   :  { %v6666_v21 = vpop.f32.mrf.mxu1 }
 0x6a0   :  { %v6667_v60 = vadd.f32 %v7545_v57, %v6666_v21 }
 0x6a1   :  { %v7603_v54 = vpop.f32.mrf.mxu1 }
 0x6a2   :  { %6673 = vst [vmem:[#allocation17] sm:$0xff] %v6667_v60 }
 0x6a3   :  { %v6669_v12 = vpop.f32.mrf.mxu1 }
 0x6a4   :  { %v6670_v13 = vadd.f32 %v7545_v57, %v6669_v12 }
 0x6a5   :  { %v7604_v20 = vpop.f32.mrf.mxu1 }
 0x6a6   :  { %6674 = vst [vmem:[#allocation17 + $0x8] sm:$0xff] %v6670_v13 }
 0x6a7   :  { %9089 = shalt.err (!%p9086_p7)
}
 0x6a8   :  { %6686 = dma.vmem_to_hbm [thread:$0]  %s6681_s8, 256, %s9439_s9, [#allocation4], %s9114_s19, %s9114_s19, %s9115_s20  }
 0x6a9   :  { %9108 = dma.done.wait [#allocation4], 256  }
 0x6aa   :  { %9109 = vsyncadd [#allocation4], 4294967040 }
 0x6ab   :  { %6690 = vsyncpa [#allocation3], 1 }
 0x6ac   :  { %6691 = vsyncpa [#allocation6], 1 }
 0x6ad   :  { %6692 = vsyncpa [#allocation9], 1 }
 0x6ae   :  { %6693 = vsyncpa [#allocation12], 1 }
 0x6af   :  { %6694 = vsyncpa [#allocation15], 1 }
 0x6b0   :  { %6695 = vsyncpa [#allocation4], 1 }

</bundles_post_ra>
